<compile_context>
chip_gen: v6e
topology: v6e:2x2x1
jax: 0.10.0
libtpu: 0.0.40
codegen_flags: <defaults>
</compile_context>

<pallas_src>
import jax
import jax.numpy as jnp
from jax.experimental import pallas as pl
from jax.experimental.pallas import tpu as pltpu

VMEM_SPEC = pl.BlockSpec(memory_space=pltpu.MemorySpace.VMEM)
BN_EPS = 1e-5


# ----------------------------------------------------------------------------
# Fused Pallas kernel
# ----------------------------------------------------------------------------
def make_fused_kernel(num_skips, n, ho, wo, cout):
    """Fused DecBottleneck forward.

    All activations are lane-dense 2-D slabs of shape (n*ho, wo*cout):
    rows = (image, output row), lanes = (output column, channel).
    """
    lanes = wo * cout
    m = n * ho

    def kernel(*refs):
        x_ref, d0_ref, d1_ref, t0_ref, t1_ref, btt_ref = refs[0:6]
        skip_refs = refs[6:6 + num_skips]
        (shift_ref, avg_ref,
         bw1u_ref, bw1s_ref, b1_ref, g1_ref, be1_ref,
         bw2_ref, b2_ref, g2_ref, be2_ref,
         bw3_ref, b3_ref, g3_ref, be3_ref,
         out_ref) = refs[6 + num_skips:]

        def dot(a, b):
            return jnp.dot(a, b, preferred_element_type=jnp.float32)

        # --- ConvTranspose2d(k=2, s=2): row-parity duplication + block-diag
        #     weight matmuls produce `up` directly in slab layout.
        x2d = x_ref[...]                                        # (n*h, w*cin)
        up = (dot(dot(d0_ref[...], x2d), t0_ref[...]) +         # even rows
              dot(dot(d1_ref[...], x2d), t1_ref[...]) +         # odd rows
              btt_ref[...])                                     # (m, lanes)

        # --- x_skips_cat = relu(sum_i processed_skip_i)
        ssum = skip_refs[0][...]
        for r in skip_refs[1:]:
            ssum = ssum + r[...]
        srelu = jnp.maximum(ssum, 0.0)

        avg = avg_ref[...]                                      # (lanes, lanes)

        def conv_bn_relu(sources, b_ref, g_ref, be_ref):
            # 3x3 SAME conv: for each kernel row kh, a row-shift matmul
            # (zero padding folded into the shift matrix; kh==1 is identity)
            # followed by a banded block-weight matmul (width taps + width
            # padding folded into the band).
            acc = jnp.zeros((m, lanes), jnp.float32)
            for slab, bw_ref in sources:
                for kh in range(3):
                    win = slab if kh == 1 else dot(shift_ref[kh], slab)
                    acc = acc + dot(win, bw_ref[kh])
            acc = acc + b_ref[...]                              # conv bias

            # BatchNorm2d (training-mode batch stats), per channel.  Channels
            # are interleaved in the lane dim: reduce rows with a sum and the
            # lane groups with the per-channel averaging matmul.
            rs = jnp.sum(acc, axis=0, keepdims=True)            # (1, lanes)
            rs2 = jnp.sum(acc * acc, axis=0, keepdims=True)
            mean = dot(rs, avg)                                 # E[x]  per ch.
            var = dot(rs2, avg) - mean * mean                   # biased var
            y = (acc - mean) * jax.lax.rsqrt(var + BN_EPS)
            y = y * g_ref[...] + be_ref[...]
            return jnp.maximum(y, 0.0)

        # conv1 consumes cat((up, skips), C) via split-K: up half + skip half.
        x1 = conv_bn_relu([(up, bw1u_ref), (srelu, bw1s_ref)],
                          b1_ref, g1_ref, be1_ref)
        x2 = conv_bn_relu([(x1, bw2_ref)], b2_ref, g2_ref, be2_ref)
        x3 = conv_bn_relu([(x2, bw3_ref)], b3_ref, g3_ref, be3_ref)

        # x_add = relu(x3 + x_skip + x), fused with the lane-dense output store.
        out_ref[...] = jnp.maximum(x3 + skip_refs[0][...] + up, 0.0)

    return kernel


# ----------------------------------------------------------------------------
# Wrapper-side operand preparation (layout-only; would be precomputed once)
# ----------------------------------------------------------------------------
def _prep_operands(p, n, h, w, cin, cout):
    f32 = jnp.float32
    ho, wo = 2 * h, 2 * w

    # ConvTranspose2d pieces ---------------------------------------------------
    wt0 = p["wt"][:, :2 * cout]               # columns (dj, co) for di = 0
    wt1 = p["wt"][:, 2 * cout:]               # columns (dj, co) for di = 1
    t0 = jnp.kron(jnp.eye(w, dtype=f32), wt0)             # (w*cin, wo*cout)
    t1 = jnp.kron(jnp.eye(w, dtype=f32), wt1)
    rowdup = jnp.repeat(jnp.eye(h, dtype=f32), 2, axis=0)  # (ho, h)
    par = (jnp.arange(ho) % 2).astype(f32)[:, None]
    d0 = jnp.kron(jnp.eye(n, dtype=f32), rowdup * (1.0 - par))   # even rows
    d1 = jnp.kron(jnp.eye(n, dtype=f32), rowdup * par)           # odd rows

    # Row-shift matrices for the 3x3 convs (zero row-padding built in) ---------
    shift = jnp.stack(
        [jnp.kron(jnp.eye(n, dtype=f32), jnp.eye(ho, ho, k=kh - 1, dtype=f32))
         for kh in range(3)], axis=0)                     # (3, n*ho, n*ho)

    # 3x3 convs as banded block weight matrices (one per kernel row) -----------
    def banded(wc):                                       # wc: (3, 3, ci, co)
        rows = []
        for kh in range(3):
            mat = sum(jnp.kron(jnp.eye(wo, wo, k=1 - kw, dtype=f32), wc[kh, kw])
                      for kw in range(3))
            rows.append(mat)
        return jnp.stack(rows, axis=0)                    # (3, wo*ci, wo*co)

    bw1u = banded(p["w1"][:, :, :cout, :])     # input channels from `up`
    bw1s = banded(p["w1"][:, :, cout:, :])     # input channels from the skips
    bw2 = banded(p["w2"])
    bw3 = banded(p["w3"])

    # Per-channel vectors tiled over the (width, channel) lane layout ----------
    def tile_c(v):
        return jnp.tile(v, wo)[None, :]                   # (1, wo*cout)

    gmat = jnp.tile(jnp.eye(cout, dtype=f32), (wo, 1))    # (wo*cout, cout)
    avg = (gmat @ gmat.T) / float(n * ho * wo)            # channel-averaging mat

    return dict(
        d0=d0, d1=d1, t0=t0, t1=t1, btt=tile_c(p["bt"]), shift=shift, avg=avg,
        bw1u=bw1u, bw1s=bw1s,
        b1t=tile_c(p["b1"]), g1t=tile_c(p["g1"]), be1t=tile_c(p["be1"]),
        bw2=bw2,
        b2t=tile_c(p["b2"]), g2t=tile_c(p["g2"]), be2t=tile_c(p["be2"]),
        bw3=bw3,
        b3t=tile_c(p["b3"]), g3t=tile_c(p["g3"]), be3t=tile_c(p["be3"]),
    )


def process_skip(s, level):
    # torch: cat([s] * 2**level, dim=1) then max_pool2d(k=2**level) ==
    # max-pool then channel-tile.
    # TODO(synk): this channel-tile + max-pool preprocessing stays as plain
    # JAX wrapper glue (pure data rearrangement on tiny inputs); all matmul /
    # BN / ReLU math runs inside the single fused Pallas kernel.
    k = 2 ** level
    n, hs, ws, c = s.shape
    pooled = s.reshape(n, hs // k, k, ws // k, k, c).max(axis=(2, 4))
    return jnp.tile(pooled, (1, 1, 1, k))


def dec_bottleneck_forward(x, x_skip_list, params):
    n, h, w, cin = x.shape
    cout = cin // 2
    ho, wo = 2 * h, 2 * w
    lanes = wo * cout

    # Wrapper: layout-only reshapes to lane-dense slabs + operand preparation.
    skip_slabs = [process_skip(s, i).reshape(n * ho, lanes)
                  for i, s in enumerate(x_skip_list)]
    x2d = x.reshape(n * h, w * cin)
    pp = _prep_operands(params, n, h, w, cin, cout)

    args = (x2d, pp["d0"], pp["d1"], pp["t0"], pp["t1"], pp["btt"],
            *skip_slabs, pp["shift"], pp["avg"],
            pp["bw1u"], pp["bw1s"], pp["b1t"], pp["g1t"], pp["be1t"],
            pp["bw2"], pp["b2t"], pp["g2t"], pp["be2t"],
            pp["bw3"], pp["b3t"], pp["g3t"], pp["be3t"])

    out2d = pl.pallas_call(
        make_fused_kernel(len(skip_slabs), n, ho, wo, cout),
        out_shape=jax.ShapeDtypeStruct((n * ho, lanes), jnp.float32),
        in_specs=[VMEM_SPEC] * len(args),
        out_specs=VMEM_SPEC,
    )(*args)
    return out2d.reshape(n, ho, wo, cout)      # free row-major reshape to NHWC


# ----------------------------------------------------------------------------
# Deterministic parameter init (shapes follow DecBottleneck.__init__)
# ----------------------------------------------------------------------------
def init_params(key, cin, cout):
    ks = jax.random.split(key, 8)
    wt = 0.1 * jax.random.normal(ks[0], (cin, 4 * cout), jnp.float32)
    bt = 0.1 * jax.random.normal(ks[1], (cout,), jnp.float32)
    w1 = 0.1 * jax.random.normal(ks[2], (3, 3, cin, cout), jnp.float32)
    b1 = 0.1 * jax.random.normal(ks[3], (cout,), jnp.float32)
    w2 = 0.1 * jax.random.normal(ks[4], (3, 3, cout, cout), jnp.float32)
    b2 = 0.1 * jax.random.normal(ks[5], (cout,), jnp.float32)
    w3 = 0.1 * jax.random.normal(ks[6], (3, 3, cout, cout), jnp.float32)
    b3 = 0.1 * jax.random.normal(ks[7], (cout,), jnp.float32)
    ones = jnp.ones((cout,), jnp.float32)
    zeros = jnp.zeros((cout,), jnp.float32)
    return dict(wt=wt, bt=bt,
                w1=w1, b1=b1, g1=ones, be1=zeros,
                w2=w2, b2=b2, g2=ones, be2=zeros,
                w3=w3, b3=b3, g3=ones, be3=zeros)


# ----------------------------------------------------------------------------
# Pure-JAX reference (independent implementation for a numerical check)
# ----------------------------------------------------------------------------
def reference_forward(x, x_skip_list, p):
    n, h, w, cin = x.shape
    cout = cin // 2
    skips = [process_skip(s, i) for i, s in enumerate(x_skip_list)]
    skip0 = skips[0]
    scat = jax.nn.relu(sum(skips))
    y4 = x.reshape(-1, cin) @ p["wt"]
    up = (y4.reshape(n, h, w, 2, 2, cout).transpose(0, 1, 3, 2, 4, 5)
            .reshape(n, 2 * h, 2 * w, cout)) + p["bt"].reshape(1, 1, 1, -1)
    xcat = jnp.concatenate([up, scat], axis=-1)

    def cbr(xin, wk, bk, gk, bek):
        o = jax.lax.conv_general_dilated(
            xin, wk, (1, 1), "SAME",
            dimension_numbers=("NHWC", "HWIO", "NHWC"))
        o = o + bk.reshape(1, 1, 1, -1)
        mu = o.mean(axis=(0, 1, 2), keepdims=True)
        va = ((o - mu) ** 2).mean(axis=(0, 1, 2), keepdims=True)
        o = (o - mu) / jnp.sqrt(va + BN_EPS)
        o = o * gk.reshape(1, 1, 1, -1) + bek.reshape(1, 1, 1, -1)
        return jax.nn.relu(o)

    x1 = cbr(xcat, p["w1"], p["b1"], p["g1"], p["be1"])
    x2 = cbr(x1, p["w2"], p["b2"], p["g2"], p["be2"])
    x3 = cbr(x2, p["w3"], p["b3"], p["g3"], p["be3"])
    return jax.nn.relu(x3 + skip0 + up)


if __name__ == "__main__":
    key = jax.random.PRNGKey(0)
    k_x, k_s0, k_s1, k_p = jax.random.split(key, 4)

    N, CIN, H, W = 2, 8, 8, 8          # in_channels = 8, out_channels = 4
    COUT = CIN // 2
    # NHWC inputs (torch NCHW equivalents: x (2,8,8,8), skips (2,4,16,16), (2,2,32,32))
    x = jax.random.normal(k_x, (N, H, W, CIN), jnp.float32)
    x_skip_list = [
        jax.random.normal(k_s0, (N, 2 * H, 2 * W, COUT), jnp.float32),
        jax.random.normal(k_s1, (N, 4 * H, 4 * W, COUT // 2), jnp.float32),
    ]
    params = init_params(k_p, CIN, COUT)

    fwd = jax.jit(dec_bottleneck_forward)
    out = jax.block_until_ready(fwd(x, x_skip_list, params))

    ref = reference_forward(x, x_skip_list, params)
    assert out.shape == (N, 2 * H, 2 * W, COUT), out.shape
    max_err = float(jnp.max(jnp.abs(out - ref)))
    assert max_err < 1e-2, f"max abs err {max_err}"
    print("KERNEL_OK")
</pallas_src>

<mosaic_0001>
module attributes {stable_mosaic.version = 11 : i64} {
  func.func @kernel(%arg0: memref<16x64xf32, #tpu.memory_space<vmem>>, %arg1: memref<32x16xf32, #tpu.memory_space<vmem>>, %arg2: memref<32x16xf32, #tpu.memory_space<vmem>>, %arg3: memref<64x64xf32, #tpu.memory_space<vmem>>, %arg4: memref<64x64xf32, #tpu.memory_space<vmem>>, %arg5: memref<1x64xf32, #tpu.memory_space<vmem>>, %arg6: memref<32x64xf32, #tpu.memory_space<vmem>>, %arg7: memref<32x64xf32, #tpu.memory_space<vmem>>, %arg8: memref<3x32x32xf32, #tpu.memory_space<vmem>>, %arg9: memref<64x64xf32, #tpu.memory_space<vmem>>, %arg10: memref<3x64x64xf32, #tpu.memory_space<vmem>>, %arg11: memref<3x64x64xf32, #tpu.memory_space<vmem>>, %arg12: memref<1x64xf32, #tpu.memory_space<vmem>>, %arg13: memref<1x64xf32, #tpu.memory_space<vmem>>, %arg14: memref<1x64xf32, #tpu.memory_space<vmem>>, %arg15: memref<3x64x64xf32, #tpu.memory_space<vmem>>, %arg16: memref<1x64xf32, #tpu.memory_space<vmem>>, %arg17: memref<1x64xf32, #tpu.memory_space<vmem>>, %arg18: memref<1x64xf32, #tpu.memory_space<vmem>>, %arg19: memref<3x64x64xf32, #tpu.memory_space<vmem>>, %arg20: memref<1x64xf32, #tpu.memory_space<vmem>>, %arg21: memref<1x64xf32, #tpu.memory_space<vmem>>, %arg22: memref<1x64xf32, #tpu.memory_space<vmem>>, %arg23: memref<32x64xf32, #tpu.memory_space<vmem>>) attributes {dimension_semantics = [], scalar_prefetch = 0 : i64, scratch_operands = 0 : i64, tpu.core_type = #tpu.core_type<tc>} {
    %c0 = arith.constant 0 : index
    %c0_0 = arith.constant 0 : index
    %0 = vector.load %arg0[%c0, %c0_0] : memref<16x64xf32, #tpu.memory_space<vmem>>, vector<16x64xf32>
    %c0_1 = arith.constant 0 : index
    %c0_2 = arith.constant 0 : index
    %1 = vector.load %arg1[%c0_1, %c0_2] : memref<32x16xf32, #tpu.memory_space<vmem>>, vector<32x16xf32>
    %cst = arith.constant dense<0.000000e+00> : vector<32x64xf32>
    %2 = tpu.matmul %1, %0, %cst {dimension_numbers = #tpu.dot_dimension_numbers<[1], [0], [0], [1], [0, 0, 1, 1], [], []>} : vector<32x16xf32>, vector<16x64xf32>, vector<32x64xf32> -> vector<32x64xf32>
    %c0_3 = arith.constant 0 : index
    %c0_4 = arith.constant 0 : index
    %3 = vector.load %arg3[%c0_3, %c0_4] : memref<64x64xf32, #tpu.memory_space<vmem>>, vector<64x64xf32>
    %cst_5 = arith.constant dense<0.000000e+00> : vector<32x64xf32>
    %4 = tpu.matmul %2, %3, %cst_5 {dimension_numbers = #tpu.dot_dimension_numbers<[1], [0], [0], [1], [0, 0, 1, 1], [], []>} : vector<32x64xf32>, vector<64x64xf32>, vector<32x64xf32> -> vector<32x64xf32>
    %c0_6 = arith.constant 0 : index
    %c0_7 = arith.constant 0 : index
    %5 = vector.load %arg2[%c0_6, %c0_7] : memref<32x16xf32, #tpu.memory_space<vmem>>, vector<32x16xf32>
    %cst_8 = arith.constant dense<0.000000e+00> : vector<32x64xf32>
    %6 = tpu.matmul %5, %0, %cst_8 {dimension_numbers = #tpu.dot_dimension_numbers<[1], [0], [0], [1], [0, 0, 1, 1], [], []>} : vector<32x16xf32>, vector<16x64xf32>, vector<32x64xf32> -> vector<32x64xf32>
    %c0_9 = arith.constant 0 : index
    %c0_10 = arith.constant 0 : index
    %7 = vector.load %arg4[%c0_9, %c0_10] : memref<64x64xf32, #tpu.memory_space<vmem>>, vector<64x64xf32>
    %cst_11 = arith.constant dense<0.000000e+00> : vector<32x64xf32>
    %8 = tpu.matmul %6, %7, %cst_11 {dimension_numbers = #tpu.dot_dimension_numbers<[1], [0], [0], [1], [0, 0, 1, 1], [], []>} : vector<32x64xf32>, vector<64x64xf32>, vector<32x64xf32> -> vector<32x64xf32>
    %9 = arith.addf %4, %8 : vector<32x64xf32>
    %c0_12 = arith.constant 0 : index
    %c0_13 = arith.constant 0 : index
    %10 = vector.load %arg5[%c0_12, %c0_13] : memref<1x64xf32, #tpu.memory_space<vmem>>, vector<1x64xf32>
    %11 = vector.broadcast %10 : vector<1x64xf32> to vector<32x64xf32>
    %12 = arith.addf %9, %11 : vector<32x64xf32>
    %c0_14 = arith.constant 0 : index
    %c0_15 = arith.constant 0 : index
    %13 = vector.load %arg6[%c0_14, %c0_15] : memref<32x64xf32, #tpu.memory_space<vmem>>, vector<32x64xf32>
    %c0_16 = arith.constant 0 : index
    %c0_17 = arith.constant 0 : index
    %14 = vector.load %arg7[%c0_16, %c0_17] : memref<32x64xf32, #tpu.memory_space<vmem>>, vector<32x64xf32>
    %15 = arith.addf %13, %14 : vector<32x64xf32>
    %cst_18 = arith.constant 0.000000e+00 : f32
    %16 = vector.broadcast %cst_18 : f32 to vector<32x64xf32>
    %17 = arith.maximumf %15, %16 : vector<32x64xf32>
    %c0_19 = arith.constant 0 : index
    %c0_20 = arith.constant 0 : index
    %18 = vector.load %arg9[%c0_19, %c0_20] : memref<64x64xf32, #tpu.memory_space<vmem>>, vector<64x64xf32>
    %cst_21 = arith.constant 0.000000e+00 : f32
    %19 = vector.broadcast %cst_21 : f32 to vector<32x64xf32>
    %c0_22 = arith.constant 0 : index
    %c0_23 = arith.constant 0 : index
    %c0_24 = arith.constant 0 : index
    %20 = vector.load %arg8[%c0_22, %c0_23, %c0_24] : memref<3x32x32xf32, #tpu.memory_space<vmem>>, vector<1x32x32xf32>
    %21 = vector.shape_cast %20 : vector<1x32x32xf32> to vector<32x32xf32>
    %cst_25 = arith.constant dense<0.000000e+00> : vector<32x64xf32>
    %22 = tpu.matmul %21, %12, %cst_25 {dimension_numbers = #tpu.dot_dimension_numbers<[1], [0], [0], [1], [0, 0, 1, 1], [], []>} : vector<32x32xf32>, vector<32x64xf32>, vector<32x64xf32> -> vector<32x64xf32>
    %c0_26 = arith.constant 0 : index
    %c0_27 = arith.constant 0 : index
    %c0_28 = arith.constant 0 : index
    %23 = vector.load %arg10[%c0_26, %c0_27, %c0_28] : memref<3x64x64xf32, #tpu.memory_space<vmem>>, vector<1x64x64xf32>
    %24 = vector.shape_cast %23 : vector<1x64x64xf32> to vector<64x64xf32>
    %cst_29 = arith.constant dense<0.000000e+00> : vector<32x64xf32>
    %25 = tpu.matmul %22, %24, %cst_29 {dimension_numbers = #tpu.dot_dimension_numbers<[1], [0], [0], [1], [0, 0, 1, 1], [], []>} : vector<32x64xf32>, vector<64x64xf32>, vector<32x64xf32> -> vector<32x64xf32>
    %26 = arith.addf %19, %25 : vector<32x64xf32>
    %c1 = arith.constant 1 : index
    %c0_30 = arith.constant 0 : index
    %c0_31 = arith.constant 0 : index
    %27 = vector.load %arg10[%c1, %c0_30, %c0_31] : memref<3x64x64xf32, #tpu.memory_space<vmem>>, vector<1x64x64xf32>
    %28 = vector.shape_cast %27 : vector<1x64x64xf32> to vector<64x64xf32>
    %cst_32 = arith.constant dense<0.000000e+00> : vector<32x64xf32>
    %29 = tpu.matmul %12, %28, %cst_32 {dimension_numbers = #tpu.dot_dimension_numbers<[1], [0], [0], [1], [0, 0, 1, 1], [], []>} : vector<32x64xf32>, vector<64x64xf32>, vector<32x64xf32> -> vector<32x64xf32>
    %30 = arith.addf %26, %29 : vector<32x64xf32>
    %c2 = arith.constant 2 : index
    %c0_33 = arith.constant 0 : index
    %c0_34 = arith.constant 0 : index
    %31 = vector.load %arg8[%c2, %c0_33, %c0_34] : memref<3x32x32xf32, #tpu.memory_space<vmem>>, vector<1x32x32xf32>
    %32 = vector.shape_cast %31 : vector<1x32x32xf32> to vector<32x32xf32>
    %cst_35 = arith.constant dense<0.000000e+00> : vector<32x64xf32>
    %33 = tpu.matmul %32, %12, %cst_35 {dimension_numbers = #tpu.dot_dimension_numbers<[1], [0], [0], [1], [0, 0, 1, 1], [], []>} : vector<32x32xf32>, vector<32x64xf32>, vector<32x64xf32> -> vector<32x64xf32>
    %c2_36 = arith.constant 2 : index
    %c0_37 = arith.constant 0 : index
    %c0_38 = arith.constant 0 : index
    %34 = vector.load %arg10[%c2_36, %c0_37, %c0_38] : memref<3x64x64xf32, #tpu.memory_space<vmem>>, vector<1x64x64xf32>
    %35 = vector.shape_cast %34 : vector<1x64x64xf32> to vector<64x64xf32>
    %cst_39 = arith.constant dense<0.000000e+00> : vector<32x64xf32>
    %36 = tpu.matmul %33, %35, %cst_39 {dimension_numbers = #tpu.dot_dimension_numbers<[1], [0], [0], [1], [0, 0, 1, 1], [], []>} : vector<32x64xf32>, vector<64x64xf32>, vector<32x64xf32> -> vector<32x64xf32>
    %37 = arith.addf %30, %36 : vector<32x64xf32>
    %c0_40 = arith.constant 0 : index
    %c0_41 = arith.constant 0 : index
    %c0_42 = arith.constant 0 : index
    %38 = vector.load %arg8[%c0_40, %c0_41, %c0_42] : memref<3x32x32xf32, #tpu.memory_space<vmem>>, vector<1x32x32xf32>
    %39 = vector.shape_cast %38 : vector<1x32x32xf32> to vector<32x32xf32>
    %cst_43 = arith.constant dense<0.000000e+00> : vector<32x64xf32>
    %40 = tpu.matmul %39, %17, %cst_43 {dimension_numbers = #tpu.dot_dimension_numbers<[1], [0], [0], [1], [0, 0, 1, 1], [], []>} : vector<32x32xf32>, vector<32x64xf32>, vector<32x64xf32> -> vector<32x64xf32>
    %c0_44 = arith.constant 0 : index
    %c0_45 = arith.constant 0 : index
    %c0_46 = arith.constant 0 : index
    %41 = vector.load %arg11[%c0_44, %c0_45, %c0_46] : memref<3x64x64xf32, #tpu.memory_space<vmem>>, vector<1x64x64xf32>
    %42 = vector.shape_cast %41 : vector<1x64x64xf32> to vector<64x64xf32>
    %cst_47 = arith.constant dense<0.000000e+00> : vector<32x64xf32>
    %43 = tpu.matmul %40, %42, %cst_47 {dimension_numbers = #tpu.dot_dimension_numbers<[1], [0], [0], [1], [0, 0, 1, 1], [], []>} : vector<32x64xf32>, vector<64x64xf32>, vector<32x64xf32> -> vector<32x64xf32>
    %44 = arith.addf %37, %43 : vector<32x64xf32>
    %c1_48 = arith.constant 1 : index
    %c0_49 = arith.constant 0 : index
    %c0_50 = arith.constant 0 : index
    %45 = vector.load %arg11[%c1_48, %c0_49, %c0_50] : memref<3x64x64xf32, #tpu.memory_space<vmem>>, vector<1x64x64xf32>
    %46 = vector.shape_cast %45 : vector<1x64x64xf32> to vector<64x64xf32>
    %cst_51 = arith.constant dense<0.000000e+00> : vector<32x64xf32>
    %47 = tpu.matmul %17, %46, %cst_51 {dimension_numbers = #tpu.dot_dimension_numbers<[1], [0], [0], [1], [0, 0, 1, 1], [], []>} : vector<32x64xf32>, vector<64x64xf32>, vector<32x64xf32> -> vector<32x64xf32>
    %48 = arith.addf %44, %47 : vector<32x64xf32>
    %c2_52 = arith.constant 2 : index
    %c0_53 = arith.constant 0 : index
    %c0_54 = arith.constant 0 : index
    %49 = vector.load %arg8[%c2_52, %c0_53, %c0_54] : memref<3x32x32xf32, #tpu.memory_space<vmem>>, vector<1x32x32xf32>
    %50 = vector.shape_cast %49 : vector<1x32x32xf32> to vector<32x32xf32>
    %cst_55 = arith.constant dense<0.000000e+00> : vector<32x64xf32>
    %51 = tpu.matmul %50, %17, %cst_55 {dimension_numbers = #tpu.dot_dimension_numbers<[1], [0], [0], [1], [0, 0, 1, 1], [], []>} : vector<32x32xf32>, vector<32x64xf32>, vector<32x64xf32> -> vector<32x64xf32>
    %c2_56 = arith.constant 2 : index
    %c0_57 = arith.constant 0 : index
    %c0_58 = arith.constant 0 : index
    %52 = vector.load %arg11[%c2_56, %c0_57, %c0_58] : memref<3x64x64xf32, #tpu.memory_space<vmem>>, vector<1x64x64xf32>
    %53 = vector.shape_cast %52 : vector<1x64x64xf32> to vector<64x64xf32>
    %cst_59 = arith.constant dense<0.000000e+00> : vector<32x64xf32>
    %54 = tpu.matmul %51, %53, %cst_59 {dimension_numbers = #tpu.dot_dimension_numbers<[1], [0], [0], [1], [0, 0, 1, 1], [], []>} : vector<32x64xf32>, vector<64x64xf32>, vector<32x64xf32> -> vector<32x64xf32>
    %55 = arith.addf %48, %54 : vector<32x64xf32>
    %c0_60 = arith.constant 0 : index
    %c0_61 = arith.constant 0 : index
    %56 = vector.load %arg12[%c0_60, %c0_61] : memref<1x64xf32, #tpu.memory_space<vmem>>, vector<1x64xf32>
    %57 = vector.broadcast %56 : vector<1x64xf32> to vector<32x64xf32>
    %58 = arith.addf %55, %57 : vector<32x64xf32>
    %cst_62 = arith.constant dense<0.000000e+00> : vector<64xf32>
    %59 = vector.multi_reduction <add>, %58, %cst_62 [0] : vector<32x64xf32> to vector<64xf32>
    %60 = vector.shape_cast %59 : vector<64xf32> to vector<1x64xf32>
    %61 = arith.mulf %58, %58 : vector<32x64xf32>
    %cst_63 = arith.constant dense<0.000000e+00> : vector<64xf32>
    %62 = vector.multi_reduction <add>, %61, %cst_63 [0] : vector<32x64xf32> to vector<64xf32>
    %63 = vector.shape_cast %62 : vector<64xf32> to vector<1x64xf32>
    %cst_64 = arith.constant dense<0.000000e+00> : vector<1x64xf32>
    %64 = tpu.matmul %60, %18, %cst_64 {dimension_numbers = #tpu.dot_dimension_numbers<[1], [0], [0], [1], [0, 0, 1, 1], [], []>} : vector<1x64xf32>, vector<64x64xf32>, vector<1x64xf32> -> vector<1x64xf32>
    %cst_65 = arith.constant dense<0.000000e+00> : vector<1x64xf32>
    %65 = tpu.matmul %63, %18, %cst_65 {dimension_numbers = #tpu.dot_dimension_numbers<[1], [0], [0], [1], [0, 0, 1, 1], [], []>} : vector<1x64xf32>, vector<64x64xf32>, vector<1x64xf32> -> vector<1x64xf32>
    %66 = arith.mulf %64, %64 : vector<1x64xf32>
    %67 = arith.subf %65, %66 : vector<1x64xf32>
    %68 = vector.broadcast %64 : vector<1x64xf32> to vector<32x64xf32>
    %69 = arith.subf %58, %68 : vector<32x64xf32>
    %cst_66 = arith.constant 9.99999974E-6 : f32
    %70 = vector.broadcast %cst_66 : f32 to vector<1x64xf32>
    %71 = arith.addf %67, %70 : vector<1x64xf32>
    %72 = math.rsqrt %71 : vector<1x64xf32>
    %73 = vector.broadcast %72 : vector<1x64xf32> to vector<32x64xf32>
    %74 = arith.mulf %69, %73 : vector<32x64xf32>
    %c0_67 = arith.constant 0 : index
    %c0_68 = arith.constant 0 : index
    %75 = vector.load %arg13[%c0_67, %c0_68] : memref<1x64xf32, #tpu.memory_space<vmem>>, vector<1x64xf32>
    %76 = vector.broadcast %75 : vector<1x64xf32> to vector<32x64xf32>
    %77 = arith.mulf %74, %76 : vector<32x64xf32>
    %c0_69 = arith.constant 0 : index
    %c0_70 = arith.constant 0 : index
    %78 = vector.load %arg14[%c0_69, %c0_70] : memref<1x64xf32, #tpu.memory_space<vmem>>, vector<1x64xf32>
    %79 = vector.broadcast %78 : vector<1x64xf32> to vector<32x64xf32>
    %80 = arith.addf %77, %79 : vector<32x64xf32>
    %cst_71 = arith.constant 0.000000e+00 : f32
    %81 = vector.broadcast %cst_71 : f32 to vector<32x64xf32>
    %82 = arith.maximumf %80, %81 : vector<32x64xf32>
    %cst_72 = arith.constant 0.000000e+00 : f32
    %83 = vector.broadcast %cst_72 : f32 to vector<32x64xf32>
    %c0_73 = arith.constant 0 : index
    %c0_74 = arith.constant 0 : index
    %c0_75 = arith.constant 0 : index
    %84 = vector.load %arg8[%c0_73, %c0_74, %c0_75] : memref<3x32x32xf32, #tpu.memory_space<vmem>>, vector<1x32x32xf32>
    %85 = vector.shape_cast %84 : vector<1x32x32xf32> to vector<32x32xf32>
    %cst_76 = arith.constant dense<0.000000e+00> : vector<32x64xf32>
    %86 = tpu.matmul %85, %82, %cst_76 {dimension_numbers = #tpu.dot_dimension_numbers<[1], [0], [0], [1], [0, 0, 1, 1], [], []>} : vector<32x32xf32>, vector<32x64xf32>, vector<32x64xf32> -> vector<32x64xf32>
    %c0_77 = arith.constant 0 : index
    %c0_78 = arith.constant 0 : index
    %c0_79 = arith.constant 0 : index
    %87 = vector.load %arg15[%c0_77, %c0_78, %c0_79] : memref<3x64x64xf32, #tpu.memory_space<vmem>>, vector<1x64x64xf32>
    %88 = vector.shape_cast %87 : vector<1x64x64xf32> to vector<64x64xf32>
    %cst_80 = arith.constant dense<0.000000e+00> : vector<32x64xf32>
    %89 = tpu.matmul %86, %88, %cst_80 {dimension_numbers = #tpu.dot_dimension_numbers<[1], [0], [0], [1], [0, 0, 1, 1], [], []>} : vector<32x64xf32>, vector<64x64xf32>, vector<32x64xf32> -> vector<32x64xf32>
    %90 = arith.addf %83, %89 : vector<32x64xf32>
    %c1_81 = arith.constant 1 : index
    %c0_82 = arith.constant 0 : index
    %c0_83 = arith.constant 0 : index
    %91 = vector.load %arg15[%c1_81, %c0_82, %c0_83] : memref<3x64x64xf32, #tpu.memory_space<vmem>>, vector<1x64x64xf32>
    %92 = vector.shape_cast %91 : vector<1x64x64xf32> to vector<64x64xf32>
    %cst_84 = arith.constant dense<0.000000e+00> : vector<32x64xf32>
    %93 = tpu.matmul %82, %92, %cst_84 {dimension_numbers = #tpu.dot_dimension_numbers<[1], [0], [0], [1], [0, 0, 1, 1], [], []>} : vector<32x64xf32>, vector<64x64xf32>, vector<32x64xf32> -> vector<32x64xf32>
    %94 = arith.addf %90, %93 : vector<32x64xf32>
    %c2_85 = arith.constant 2 : index
    %c0_86 = arith.constant 0 : index
    %c0_87 = arith.constant 0 : index
    %95 = vector.load %arg8[%c2_85, %c0_86, %c0_87] : memref<3x32x32xf32, #tpu.memory_space<vmem>>, vector<1x32x32xf32>
    %96 = vector.shape_cast %95 : vector<1x32x32xf32> to vector<32x32xf32>
    %cst_88 = arith.constant dense<0.000000e+00> : vector<32x64xf32>
    %97 = tpu.matmul %96, %82, %cst_88 {dimension_numbers = #tpu.dot_dimension_numbers<[1], [0], [0], [1], [0, 0, 1, 1], [], []>} : vector<32x32xf32>, vector<32x64xf32>, vector<32x64xf32> -> vector<32x64xf32>
    %c2_89 = arith.constant 2 : index
    %c0_90 = arith.constant 0 : index
    %c0_91 = arith.constant 0 : index
    %98 = vector.load %arg15[%c2_89, %c0_90, %c0_91] : memref<3x64x64xf32, #tpu.memory_space<vmem>>, vector<1x64x64xf32>
    %99 = vector.shape_cast %98 : vector<1x64x64xf32> to vector<64x64xf32>
    %cst_92 = arith.constant dense<0.000000e+00> : vector<32x64xf32>
    %100 = tpu.matmul %97, %99, %cst_92 {dimension_numbers = #tpu.dot_dimension_numbers<[1], [0], [0], [1], [0, 0, 1, 1], [], []>} : vector<32x64xf32>, vector<64x64xf32>, vector<32x64xf32> -> vector<32x64xf32>
    %101 = arith.addf %94, %100 : vector<32x64xf32>
    %c0_93 = arith.constant 0 : index
    %c0_94 = arith.constant 0 : index
    %102 = vector.load %arg16[%c0_93, %c0_94] : memref<1x64xf32, #tpu.memory_space<vmem>>, vector<1x64xf32>
    %103 = vector.broadcast %102 : vector<1x64xf32> to vector<32x64xf32>
    %104 = arith.addf %101, %103 : vector<32x64xf32>
    %cst_95 = arith.constant dense<0.000000e+00> : vector<64xf32>
    %105 = vector.multi_reduction <add>, %104, %cst_95 [0] : vector<32x64xf32> to vector<64xf32>
    %106 = vector.shape_cast %105 : vector<64xf32> to vector<1x64xf32>
    %107 = arith.mulf %104, %104 : vector<32x64xf32>
    %cst_96 = arith.constant dense<0.000000e+00> : vector<64xf32>
    %108 = vector.multi_reduction <add>, %107, %cst_96 [0] : vector<32x64xf32> to vector<64xf32>
    %109 = vector.shape_cast %108 : vector<64xf32> to vector<1x64xf32>
    %cst_97 = arith.constant dense<0.000000e+00> : vector<1x64xf32>
    %110 = tpu.matmul %106, %18, %cst_97 {dimension_numbers = #tpu.dot_dimension_numbers<[1], [0], [0], [1], [0, 0, 1, 1], [], []>} : vector<1x64xf32>, vector<64x64xf32>, vector<1x64xf32> -> vector<1x64xf32>
    %cst_98 = arith.constant dense<0.000000e+00> : vector<1x64xf32>
    %111 = tpu.matmul %109, %18, %cst_98 {dimension_numbers = #tpu.dot_dimension_numbers<[1], [0], [0], [1], [0, 0, 1, 1], [], []>} : vector<1x64xf32>, vector<64x64xf32>, vector<1x64xf32> -> vector<1x64xf32>
    %112 = arith.mulf %110, %110 : vector<1x64xf32>
    %113 = arith.subf %111, %112 : vector<1x64xf32>
    %114 = vector.broadcast %110 : vector<1x64xf32> to vector<32x64xf32>
    %115 = arith.subf %104, %114 : vector<32x64xf32>
    %cst_99 = arith.constant 9.99999974E-6 : f32
    %116 = vector.broadcast %cst_99 : f32 to vector<1x64xf32>
    %117 = arith.addf %113, %116 : vector<1x64xf32>
    %118 = math.rsqrt %117 : vector<1x64xf32>
    %119 = vector.broadcast %118 : vector<1x64xf32> to vector<32x64xf32>
    %120 = arith.mulf %115, %119 : vector<32x64xf32>
    %c0_100 = arith.constant 0 : index
    %c0_101 = arith.constant 0 : index
    %121 = vector.load %arg17[%c0_100, %c0_101] : memref<1x64xf32, #tpu.memory_space<vmem>>, vector<1x64xf32>
    %122 = vector.broadcast %121 : vector<1x64xf32> to vector<32x64xf32>
    %123 = arith.mulf %120, %122 : vector<32x64xf32>
    %c0_102 = arith.constant 0 : index
    %c0_103 = arith.constant 0 : index
    %124 = vector.load %arg18[%c0_102, %c0_103] : memref<1x64xf32, #tpu.memory_space<vmem>>, vector<1x64xf32>
    %125 = vector.broadcast %124 : vector<1x64xf32> to vector<32x64xf32>
    %126 = arith.addf %123, %125 : vector<32x64xf32>
    %cst_104 = arith.constant 0.000000e+00 : f32
    %127 = vector.broadcast %cst_104 : f32 to vector<32x64xf32>
    %128 = arith.maximumf %126, %127 : vector<32x64xf32>
    %cst_105 = arith.constant 0.000000e+00 : f32
    %129 = vector.broadcast %cst_105 : f32 to vector<32x64xf32>
    %c0_106 = arith.constant 0 : index
    %c0_107 = arith.constant 0 : index
    %c0_108 = arith.constant 0 : index
    %130 = vector.load %arg8[%c0_106, %c0_107, %c0_108] : memref<3x32x32xf32, #tpu.memory_space<vmem>>, vector<1x32x32xf32>
    %131 = vector.shape_cast %130 : vector<1x32x32xf32> to vector<32x32xf32>
    %cst_109 = arith.constant dense<0.000000e+00> : vector<32x64xf32>
    %132 = tpu.matmul %131, %128, %cst_109 {dimension_numbers = #tpu.dot_dimension_numbers<[1], [0], [0], [1], [0, 0, 1, 1], [], []>} : vector<32x32xf32>, vector<32x64xf32>, vector<32x64xf32> -> vector<32x64xf32>
    %c0_110 = arith.constant 0 : index
    %c0_111 = arith.constant 0 : index
    %c0_112 = arith.constant 0 : index
    %133 = vector.load %arg19[%c0_110, %c0_111, %c0_112] : memref<3x64x64xf32, #tpu.memory_space<vmem>>, vector<1x64x64xf32>
    %134 = vector.shape_cast %133 : vector<1x64x64xf32> to vector<64x64xf32>
    %cst_113 = arith.constant dense<0.000000e+00> : vector<32x64xf32>
    %135 = tpu.matmul %132, %134, %cst_113 {dimension_numbers = #tpu.dot_dimension_numbers<[1], [0], [0], [1], [0, 0, 1, 1], [], []>} : vector<32x64xf32>, vector<64x64xf32>, vector<32x64xf32> -> vector<32x64xf32>
    %136 = arith.addf %129, %135 : vector<32x64xf32>
    %c1_114 = arith.constant 1 : index
    %c0_115 = arith.constant 0 : index
    %c0_116 = arith.constant 0 : index
    %137 = vector.load %arg19[%c1_114, %c0_115, %c0_116] : memref<3x64x64xf32, #tpu.memory_space<vmem>>, vector<1x64x64xf32>
    %138 = vector.shape_cast %137 : vector<1x64x64xf32> to vector<64x64xf32>
    %cst_117 = arith.constant dense<0.000000e+00> : vector<32x64xf32>
    %139 = tpu.matmul %128, %138, %cst_117 {dimension_numbers = #tpu.dot_dimension_numbers<[1], [0], [0], [1], [0, 0, 1, 1], [], []>} : vector<32x64xf32>, vector<64x64xf32>, vector<32x64xf32> -> vector<32x64xf32>
    %140 = arith.addf %136, %139 : vector<32x64xf32>
    %c2_118 = arith.constant 2 : index
    %c0_119 = arith.constant 0 : index
    %c0_120 = arith.constant 0 : index
    %141 = vector.load %arg8[%c2_118, %c0_119, %c0_120] : memref<3x32x32xf32, #tpu.memory_space<vmem>>, vector<1x32x32xf32>
    %142 = vector.shape_cast %141 : vector<1x32x32xf32> to vector<32x32xf32>
    %cst_121 = arith.constant dense<0.000000e+00> : vector<32x64xf32>
    %143 = tpu.matmul %142, %128, %cst_121 {dimension_numbers = #tpu.dot_dimension_numbers<[1], [0], [0], [1], [0, 0, 1, 1], [], []>} : vector<32x32xf32>, vector<32x64xf32>, vector<32x64xf32> -> vector<32x64xf32>
    %c2_122 = arith.constant 2 : index
    %c0_123 = arith.constant 0 : index
    %c0_124 = arith.constant 0 : index
    %144 = vector.load %arg19[%c2_122, %c0_123, %c0_124] : memref<3x64x64xf32, #tpu.memory_space<vmem>>, vector<1x64x64xf32>
    %145 = vector.shape_cast %144 : vector<1x64x64xf32> to vector<64x64xf32>
    %cst_125 = arith.constant dense<0.000000e+00> : vector<32x64xf32>
    %146 = tpu.matmul %143, %145, %cst_125 {dimension_numbers = #tpu.dot_dimension_numbers<[1], [0], [0], [1], [0, 0, 1, 1], [], []>} : vector<32x64xf32>, vector<64x64xf32>, vector<32x64xf32> -> vector<32x64xf32>
    %147 = arith.addf %140, %146 : vector<32x64xf32>
    %c0_126 = arith.constant 0 : index
    %c0_127 = arith.constant 0 : index
    %148 = vector.load %arg20[%c0_126, %c0_127] : memref<1x64xf32, #tpu.memory_space<vmem>>, vector<1x64xf32>
    %149 = vector.broadcast %148 : vector<1x64xf32> to vector<32x64xf32>
    %150 = arith.addf %147, %149 : vector<32x64xf32>
    %cst_128 = arith.constant dense<0.000000e+00> : vector<64xf32>
    %151 = vector.multi_reduction <add>, %150, %cst_128 [0] : vector<32x64xf32> to vector<64xf32>
    %152 = vector.shape_cast %151 : vector<64xf32> to vector<1x64xf32>
    %153 = arith.mulf %150, %150 : vector<32x64xf32>
    %cst_129 = arith.constant dense<0.000000e+00> : vector<64xf32>
    %154 = vector.multi_reduction <add>, %153, %cst_129 [0] : vector<32x64xf32> to vector<64xf32>
    %155 = vector.shape_cast %154 : vector<64xf32> to vector<1x64xf32>
    %cst_130 = arith.constant dense<0.000000e+00> : vector<1x64xf32>
    %156 = tpu.matmul %152, %18, %cst_130 {dimension_numbers = #tpu.dot_dimension_numbers<[1], [0], [0], [1], [0, 0, 1, 1], [], []>} : vector<1x64xf32>, vector<64x64xf32>, vector<1x64xf32> -> vector<1x64xf32>
    %cst_131 = arith.constant dense<0.000000e+00> : vector<1x64xf32>
    %157 = tpu.matmul %155, %18, %cst_131 {dimension_numbers = #tpu.dot_dimension_numbers<[1], [0], [0], [1], [0, 0, 1, 1], [], []>} : vector<1x64xf32>, vector<64x64xf32>, vector<1x64xf32> -> vector<1x64xf32>
    %158 = arith.mulf %156, %156 : vector<1x64xf32>
    %159 = arith.subf %157, %158 : vector<1x64xf32>
    %160 = vector.broadcast %156 : vector<1x64xf32> to vector<32x64xf32>
    %161 = arith.subf %150, %160 : vector<32x64xf32>
    %cst_132 = arith.constant 9.99999974E-6 : f32
    %162 = vector.broadcast %cst_132 : f32 to vector<1x64xf32>
    %163 = arith.addf %159, %162 : vector<1x64xf32>
    %164 = math.rsqrt %163 : vector<1x64xf32>
    %165 = vector.broadcast %164 : vector<1x64xf32> to vector<32x64xf32>
    %166 = arith.mulf %161, %165 : vector<32x64xf32>
    %c0_133 = arith.constant 0 : index
    %c0_134 = arith.constant 0 : index
    %167 = vector.load %arg21[%c0_133, %c0_134] : memref<1x64xf32, #tpu.memory_space<vmem>>, vector<1x64xf32>
    %168 = vector.broadcast %167 : vector<1x64xf32> to vector<32x64xf32>
    %169 = arith.mulf %166, %168 : vector<32x64xf32>
    %c0_135 = arith.constant 0 : index
    %c0_136 = arith.constant 0 : index
    %170 = vector.load %arg22[%c0_135, %c0_136] : memref<1x64xf32, #tpu.memory_space<vmem>>, vector<1x64xf32>
    %171 = vector.broadcast %170 : vector<1x64xf32> to vector<32x64xf32>
    %172 = arith.addf %169, %171 : vector<32x64xf32>
    %cst_137 = arith.constant 0.000000e+00 : f32
    %173 = vector.broadcast %cst_137 : f32 to vector<32x64xf32>
    %174 = arith.maximumf %172, %173 : vector<32x64xf32>
    %c0_138 = arith.constant 0 : index
    %c0_139 = arith.constant 0 : index
    %175 = vector.load %arg6[%c0_138, %c0_139] : memref<32x64xf32, #tpu.memory_space<vmem>>, vector<32x64xf32>
    %176 = arith.addf %174, %175 : vector<32x64xf32>
    %177 = arith.addf %176, %12 : vector<32x64xf32>
    %cst_140 = arith.constant 0.000000e+00 : f32
    %178 = vector.broadcast %cst_140 : f32 to vector<32x64xf32>
    %179 = arith.maximumf %177, %178 : vector<32x64xf32>
    %c0_141 = arith.constant 0 : index
    %c0_142 = arith.constant 0 : index
    %180 = vector.load %arg23[%c0_141, %c0_142] : memref<32x64xf32, #tpu.memory_space<vmem>>, vector<32x64xf32>
    tpu.vector_store %arg23[%c0_141, %c0_142], %179 {strides = array<i32>} : memref<32x64xf32, #tpu.memory_space<vmem>>, vector<32x64xf32>,
    return
  }
}

</mosaic_0001>

<bundles_post_ra>
// kernel: tile.80
= control target key start
LH: loop header
LB: loop body
LE: loop exit
PB: predicated region body
PF: predicated region fallthrough
CT: control target
= control target key end

     0   :  { %s28_s0 = inlined_call_operand.vmem [shape: f32[4], index: 0, kind: input, shape index: {}]   ;;  %s29_s1 = inlined_call_operand.vmem [shape: f32[16,4], index: 1, kind: output, shape index: {}]  }
   0x1   :  { %v4_v0 = vld [vmem:[%s28_s0] ss:$0 sm:$0xff] }
   0x2   :  { %5 = vst [vmem:[%s29_s1] sm:$0xff] %v4_v0  ;;  %8 = vst [vmem:[%s29_s1 + $0x8] sm:$0xff] %v4_v0 }

// kernel: tile.81
= control target key start
LH: loop header
LB: loop body
LE: loop exit
PB: predicated region body
PF: predicated region fallthrough
CT: control target
= control target key end

     0   :  { %s133_s10 = smov 60   ;;  %s134_s11 = smov 52   ;;  %vm3_vm0 = vcmask 31744   ;;  %vm9_vm1 = vcmask 523744   ;;  %vm15_vm2 = vcmask 490944   ;;  %vm21_vm3 = vcmask 458144   ;;  %s209_s0 = inlined_call_operand.vmem [shape: f32[16,4], index: 0, kind: input, shape index: {}]   ;;  %s210_s1 = inlined_call_operand.vmem [shape: f32[1,64], index: 1, kind: output, shape index: {}]  }
   0x1   :  { %v103_v0 = vld [vmem:[%s209_s0 + $0xf] sm:$0x1]   ;;  %v105_v1 = vld [vmem:[%s209_s0 + $0xd] sm:$0x1]   ;;  %v104_v2 = vld [vmem:[%s209_s0 + $0xe] sm:$0x1]  }
   0x2   :  { %7 = vrot.lane.b32.xlu0 %v103_v0, %s133_s10  ;;  %19 = vrot.lane.b32.xlu1 %v105_v1, %s134_s11  ;;  %v106_v3 = vld [vmem:[%s209_s0 + $0xc] sm:$0x1]   ;;  %s135_s16 = smov 56   ;;  %s136_s17 = smov 48   ;;  %v107_v4 = vld [vmem:[%s209_s0 + $0xb] sm:$0x1]  }
   0x3   :  { %v108_v5 = vld [vmem:[%s209_s0 + $0xa] sm:$0x1]   ;;  %v2_v6 = vld [vmem:[%s209_s0] sm:$0x1]   ;;  %s137_s24 = smov 44   ;;  %s138_s25 = smov 40  }
   0x4   :  { %4 = vst.msk [vmem:[#allocation0] sm:$0x1] %vm3_vm0, %v2_v6   ;;  %v109_v7 = vld [vmem:[%s209_s0 + $0x9] sm:$0x1]   ;;  %v110_v8 = vld [vmem:[%s209_s0 + $0x8] sm:$0x1]  }
   0x5   :  { %s139_s30 = smov 36   ;;  %s140_s2 = smov 32   ;;  %v111_v9 = vld [vmem:[%s209_s0 + $0x7] sm:$0x1]   ;;  %v112_v10 = vld [vmem:[%s209_s0 + $0x6] sm:$0x1]  }
   0x6   :  { %13 = vrot.lane.b32.xlu0 %v104_v2, %s135_s16  ;;  %25 = vrot.lane.b32.xlu1 %v106_v3, %s136_s17  ;;  %s141_s7 = smov 28   ;;  %s142_s8 = smov 24   ;;  %v113_v11 = vld [vmem:[%s209_s0 + $0x5] sm:$0x1]   ;;  %v114_v12 = vld [vmem:[%s209_s0 + $0x4] sm:$0x1]  }
   0x7   :  { %s143_s13 = smov 20   ;;  %s144_s14 = smov 16   ;;  %v115_v13 = vld [vmem:[%s209_s0 + $0x3] sm:$0x1]   ;;  %v116_v14 = vld [vmem:[%s209_s0 + $0x2] sm:$0x1]  }
   0x8   :  { %s145_s19 = smov 12   ;;  %s146_s20 = smov 8   ;;  %v117_v15 = vld [vmem:[%s209_s0 + $0x1] sm:$0x1]   ;;  %vm27_vm4 = vcmask 425344   ;;  %vm33_vm5 = vcmask 392544  }
   0x9   :  { %s147_s0 = smov 4   ;;  %vm39_vm6 = vcmask 359744   ;;  %vm45_vm7 = vcmask 326944   ;;  %vm51_vm8 = vcmask 294144   ;;  %vm57_vm9 = vcmask 261344  }
   0xa   :  { %31 = vrot.lane.b32.xlu0 %v107_v4, %s137_s24  ;;  %37 = vrot.lane.b32.xlu1 %v108_v5, %s138_s25  ;;  %vm63_vm10 = vcmask 228544   ;;  %vm69_vm11 = vcmask 195744   ;;  %vm75_vm12 = vcmask 162944   ;;  %vm81_vm13 = vcmask 130144  }
   0xb   :  { %vm87_vm14 = vcmask 97344   ;;  %vm93_vm15 = vcmask 64544  }
   0xe   :  { %43 = vrot.lane.b32.xlu0 %v109_v7, %s139_s30  ;;  %49 = vrot.lane.b32.xlu1 %v110_v8, %s140_s2 }
  0x12   :  { %55 = vrot.lane.b32.xlu0 %v111_v9, %s141_s7  ;;  %61 = vrot.lane.b32.xlu1 %v112_v10, %s142_s8 }
  0x16   :  { %67 = vrot.lane.b32.xlu0 %v113_v11, %s143_s13  ;;  %73 = vrot.lane.b32.xlu1 %v114_v12, %s144_s14 }
  0x1a   :  { %79 = vrot.lane.b32.xlu0 %v115_v13, %s145_s19  ;;  %85 = vrot.lane.b32.xlu1 %v116_v14, %s146_s20 }
  0x1e   :  { %91 = vrot.lane.b32.xlu0 %v117_v15, %s147_s0 }
  0x74   :  { %v8_v16 = vpop.permute.xlu0 %7   ;;  %v20_v17 = vpop.permute.xlu1 %19  }
  0x75   :  { %10 = vst.msk [vmem:[#allocation0] sm:$0x1] %vm9_vm1, %v8_v16  }
  0x78   :  { %v14_v18 = vpop.permute.xlu0 %13   ;;  %v26_v19 = vpop.permute.xlu1 %25  }
  0x79   :  { %16 = vst.msk [vmem:[#allocation0] sm:$0x1] %vm15_vm2, %v14_v18  }
  0x7a   :  { %22 = vst.msk [vmem:[#allocation0] sm:$0x1] %vm21_vm3, %v20_v17  }
  0x7b   :  { %28 = vst.msk [vmem:[#allocation0] sm:$0x1] %vm27_vm4, %v26_v19  }
  0x7c   :  { %v32_v20 = vpop.permute.xlu0 %31   ;;  %v38_v21 = vpop.permute.xlu1 %37  }
  0x7d   :  { %34 = vst.msk [vmem:[#allocation0] sm:$0x1] %vm33_vm5, %v32_v20  }
  0x7e   :  { %40 = vst.msk [vmem:[#allocation0] sm:$0x1] %vm39_vm6, %v38_v21  }
  0x80   :  { %v44_v22 = vpop.permute.xlu0 %43   ;;  %v50_v23 = vpop.permute.xlu1 %49  }
  0x81   :  { %46 = vst.msk [vmem:[#allocation0] sm:$0x1] %vm45_vm7, %v44_v22  }
  0x82   :  { %52 = vst.msk [vmem:[#allocation0] sm:$0x1] %vm51_vm8, %v50_v23  }
  0x84   :  { %v56_v24 = vpop.permute.xlu0 %55   ;;  %v62_v25 = vpop.permute.xlu1 %61  }
  0x85   :  { %58 = vst.msk [vmem:[#allocation0] sm:$0x1] %vm57_vm9, %v56_v24  }
  0x86   :  { %64 = vst.msk [vmem:[#allocation0] sm:$0x1] %vm63_vm10, %v62_v25  }
  0x88   :  { %v68_v26 = vpop.permute.xlu0 %67   ;;  %v74_v27 = vpop.permute.xlu1 %73  }
  0x89   :  { %70 = vst.msk [vmem:[#allocation0] sm:$0x1] %vm69_vm11, %v68_v26  }
  0x8a   :  { %76 = vst.msk [vmem:[#allocation0] sm:$0x1] %vm75_vm12, %v74_v27  }
  0x8c   :  { %v80_v28 = vpop.permute.xlu0 %79   ;;  %v86_v29 = vpop.permute.xlu1 %85  }
  0x8d   :  { %82 = vst.msk [vmem:[#allocation0] sm:$0x1] %vm81_vm13, %v80_v28  }
  0x8e   :  { %88 = vst.msk [vmem:[#allocation0] sm:$0x1] %vm87_vm14, %v86_v29  }
  0x90   :  { %v92_v30 = vpop.permute.xlu0 %91  }
  0x91   :  { %94 = vst.msk [vmem:[#allocation0] sm:$0x1] %vm93_vm15, %v92_v30  }
  0x98   :  { %v99_v31 = vld [vmem:[#allocation0] sm:$0x1] }
  0x99   :  { %102 = vst [vmem:[%s210_s1] sm:$0x1] %v99_v31 }

// kernel: tile.61
= control target key start
LH: loop header
LB: loop body
LE: loop exit
PB: predicated region body
PF: predicated region fallthrough
CT: control target
= control target key end

     0   :  { %vm323_vm0 = vcmask 1047556   ;;  %s617_s10 = smov 16   ;;  %vm325_vm1 = vcmask 130048   ;;  %vm398_vm2 = vcmask 261248   ;;  %s908_s0 = inlined_call_operand.vmem [shape: f32[2,16,16,4], index: 0, kind: input, shape index: {}]   ;;  %s909_s1 = inlined_call_operand.vmem [shape: f32[32,64], index: 1, kind: output, shape index: {}]  }
   0x1   :  { %v595_v0 = vld [vmem:[%s908_s0 + $0xe] sm:$0x3]  ;;  %v596_v1 = vld [vmem:[%s908_s0 + $0xc] sm:$0x3]  ;;  %v597_v2 = vld [vmem:[%s908_s0 + $0xa] sm:$0x3] }
   0x2   :  { %289 = vst [vmem:[#allocation0 + $0x38] sm:$0x3] %v595_v0  ;;  %294 = vst [vmem:[#allocation0 + $0x30] sm:$0x3] %v596_v1  ;;  %v598_v3 = vld [vmem:[%s908_s0 + $0x8] sm:$0x3] }
   0x3   :  { %299 = vst [vmem:[#allocation0 + $0x28] sm:$0x3] %v597_v2  ;;  %v599_v4 = vld [vmem:[%s908_s0 + $0x6] sm:$0x3]  ;;  %v600_v5 = vld [vmem:[%s908_s0 + $0x4] sm:$0x3] }
   0x4   :  { %304 = vst [vmem:[#allocation0 + $0x20] sm:$0x3] %v598_v3  ;;  %309 = vst [vmem:[#allocation0 + $0x18] sm:$0x3] %v599_v4  ;;  %v601_v6 = vld [vmem:[%s908_s0 + $0x2] sm:$0x3] }
   0x5   :  { %314 = vst [vmem:[#allocation0 + $0x10] sm:$0x3] %v600_v5  ;;  %v319_v7 = vld [vmem:[%s908_s0] sm:$0x3]  ;;  %318 = vst [vmem:[#allocation0 + $0x8] sm:$0x3] %v601_v6 }
   0x6   :  { %320 = vst [vmem:[#allocation0] sm:$0x3] %v319_v7  ;;  %v587_v8 = vld [vmem:[%s908_s0 + $0x1e] sm:$0x3]  ;;  %v588_v9 = vld [vmem:[%s908_s0 + $0x1c] sm:$0x3] }
   0x7   :  { %v589_v10 = vld [vmem:[%s908_s0 + $0x1a] sm:$0x3]  ;;  %249 = vst [vmem:[#allocation0 + $0x78] sm:$0x3] %v587_v8  ;;  %254 = vst [vmem:[#allocation0 + $0x70] sm:$0x3] %v588_v9 }
   0x8   :  { %259 = vst [vmem:[#allocation0 + $0x68] sm:$0x3] %v589_v10  ;;  %v590_v11 = vld [vmem:[%s908_s0 + $0x18] sm:$0x3]  ;;  %v591_v12 = vld [vmem:[%s908_s0 + $0x16] sm:$0x3] }
   0x9   :  { %v592_v13 = vld [vmem:[%s908_s0 + $0x14] sm:$0x3]  ;;  %264 = vst [vmem:[#allocation0 + $0x60] sm:$0x3] %v590_v11  ;;  %269 = vst [vmem:[#allocation0 + $0x58] sm:$0x3] %v591_v12 }
   0xa   :  { %274 = vst [vmem:[#allocation0 + $0x50] sm:$0x3] %v592_v13  ;;  %v593_v14 = vld [vmem:[%s908_s0 + $0x12] sm:$0x3]  ;;  %v594_v15 = vld [vmem:[%s908_s0 + $0x10] sm:$0x3] }
   0xb   :  { %v563_v16 = vld [vmem:[%s908_s0 + $0x4e] sm:$0x3]  ;;  %279 = vst [vmem:[#allocation0 + $0x48] sm:$0x3] %v593_v14  ;;  %284 = vst [vmem:[#allocation0 + $0x40] sm:$0x3] %v594_v15 }
   0xc   :  { %129 = vst [vmem:[#allocation0 + $0x138] sm:$0x3] %v563_v16  ;;  %v564_v17 = vld [vmem:[%s908_s0 + $0x4c] sm:$0x3]  ;;  %v565_v18 = vld [vmem:[%s908_s0 + $0x4a] sm:$0x3] }
   0xd   :  { %v566_v19 = vld [vmem:[%s908_s0 + $0x48] sm:$0x3]  ;;  %134 = vst [vmem:[#allocation0 + $0x130] sm:$0x3] %v564_v17  ;;  %139 = vst [vmem:[#allocation0 + $0x128] sm:$0x3] %v565_v18 }
   0xe   :  { %144 = vst [vmem:[#allocation0 + $0x120] sm:$0x3] %v566_v19  ;;  %v567_v20 = vld [vmem:[%s908_s0 + $0x46] sm:$0x3]  ;;  %v568_v21 = vld [vmem:[%s908_s0 + $0x44] sm:$0x3] }
   0xf   :  { %v569_v22 = vld [vmem:[%s908_s0 + $0x42] sm:$0x3]  ;;  %149 = vst [vmem:[#allocation0 + $0x118] sm:$0x3] %v567_v20  ;;  %154 = vst [vmem:[#allocation0 + $0x110] sm:$0x3] %v568_v21 }
  0x10   :  { %159 = vst [vmem:[#allocation0 + $0x108] sm:$0x3] %v569_v22  ;;  %v570_v23 = vld [vmem:[%s908_s0 + $0x40] sm:$0x3]  ;;  %v555_v24 = vld [vmem:[%s908_s0 + $0x5e] sm:$0x3] }
  0x11   :  { %v556_v25 = vld [vmem:[%s908_s0 + $0x5c] sm:$0x3]  ;;  %v393_v26 = vld [vmem:[#allocation0 + $0x1] ss:$8 sm:$0xf0]  }
  0x12   :  { %164 = vst [vmem:[#allocation0 + $0x100] sm:$0x3] %v570_v23  ;;  %89 = vst [vmem:[#allocation0 + $0x178] sm:$0x3] %v555_v24  ;;  %v557_v27 = vld [vmem:[%s908_s0 + $0x5a] sm:$0x3] }
  0x13   :  { %94 = vst [vmem:[#allocation0 + $0x170] sm:$0x3] %v556_v25  ;;  %v391_v28 = vld [vmem:[#allocation0 + $0x1] ss:$8 sm:$0xf]  }
  0x14   :  { %99 = vst [vmem:[#allocation0 + $0x168] sm:$0x3] %v557_v27  ;;  %v558_v29 = vld [vmem:[%s908_s0 + $0x58] sm:$0x3]  ;;  %v395_v30 = vsel %vm323_vm0, %v393_v26, %v391_v28  ;;  %v559_v31 = vld [vmem:[%s908_s0 + $0x56] sm:$0x3] }
  0x15   :  { %104 = vst [vmem:[#allocation0 + $0x160] sm:$0x3] %v558_v29  ;;  %v560_v32 = vld [vmem:[%s908_s0 + $0x54] sm:$0x3]  ;;  %v561_v33 = vld [vmem:[%s908_s0 + $0x52] sm:$0x3]  ;;  %396 = vrot.lane.b32.xlu0 %v395_v30, %s617_s10 }
  0x16   :  { %v414_v34 = vld [vmem:[#allocation0 + $0x41] ss:$8 sm:$0xf0]   ;;  %109 = vst [vmem:[#allocation0 + $0x158] sm:$0x3] %v559_v31 }
  0x17   :  { %114 = vst [vmem:[#allocation0 + $0x150] sm:$0x3] %v560_v32  ;;  %119 = vst [vmem:[#allocation0 + $0x148] sm:$0x3] %v561_v33  ;;  %v562_v35 = vld [vmem:[%s908_s0 + $0x50] sm:$0x3] }
  0x18   :  { %v412_v36 = vld [vmem:[#allocation0 + $0x41] ss:$8 sm:$0xf]   ;;  %124 = vst [vmem:[#allocation0 + $0x140] sm:$0x3] %v562_v35 }
  0x19   :  { %v579_v37 = vld [vmem:[%s908_s0 + $0x2e] sm:$0x3]  ;;  %v416_v38 = vsel %vm323_vm0, %v414_v34, %v412_v36  ;;  %v403_v39 = vld [vmem:[#allocation0 + $0x101] ss:$8 sm:$0xf0]  }
  0x1a   :  { %209 = vst [vmem:[#allocation0 + $0xb8] sm:$0x3] %v579_v37  ;;  %v580_v40 = vld [vmem:[%s908_s0 + $0x2c] sm:$0x3]  ;;  %417 = vrot.lane.b32.xlu1 %v416_v38, %s617_s10  ;;  %v581_v41 = vld [vmem:[%s908_s0 + $0x2a] sm:$0x3] }
  0x1b   :  { %214 = vst [vmem:[#allocation0 + $0xb0] sm:$0x3] %v580_v40  ;;  %v582_v42 = vld [vmem:[%s908_s0 + $0x28] sm:$0x3]  ;;  %v583_v43 = vld [vmem:[%s908_s0 + $0x26] sm:$0x3] }
  0x1c   :  { %v401_v44 = vld [vmem:[#allocation0 + $0x101] ss:$8 sm:$0xf]   ;;  %219 = vst [vmem:[#allocation0 + $0xa8] sm:$0x3] %v581_v41 }
  0x1d   :  { %224 = vst [vmem:[#allocation0 + $0xa0] sm:$0x3] %v582_v42  ;;  %229 = vst [vmem:[#allocation0 + $0x98] sm:$0x3] %v583_v43  ;;  %v584_v45 = vld [vmem:[%s908_s0 + $0x24] sm:$0x3]  ;;  %v405_v46 = vsel %vm323_vm0, %v403_v39, %v401_v44 }
  0x1e   :  { %234 = vst [vmem:[#allocation0 + $0x90] sm:$0x3] %v584_v45  ;;  %v585_v47 = vld [vmem:[%s908_s0 + $0x22] sm:$0x3]  ;;  %v586_v48 = vld [vmem:[%s908_s0 + $0x20] sm:$0x3]  ;;  %406 = vrot.lane.b32.xlu0 %v405_v46, %s617_s10 }
  0x1f   :  { %v547_v49 = vld [vmem:[%s908_s0 + $0x6e] sm:$0x3]  ;;  %v425_v50 = vld [vmem:[#allocation0 + $0x141] ss:$8 sm:$0xf0]  }
  0x20   :  { %239 = vst [vmem:[#allocation0 + $0x88] sm:$0x3] %v585_v47  ;;  %244 = vst [vmem:[#allocation0 + $0x80] sm:$0x3] %v586_v48  ;;  %v548_v51 = vld [vmem:[%s908_s0 + $0x6c] sm:$0x3] }
  0x21   :  { %49 = vst [vmem:[#allocation0 + $0x1b8] sm:$0x3] %v547_v49  ;;  %54 = vst [vmem:[#allocation0 + $0x1b0] sm:$0x3] %v548_v51  ;;  %v549_v52 = vld [vmem:[%s908_s0 + $0x6a] sm:$0x3] }
  0x22   :  { %v550_v53 = vld [vmem:[%s908_s0 + $0x68] sm:$0x3]  ;;  %v551_v54 = vld [vmem:[%s908_s0 + $0x66] sm:$0x3]  ;;  %59 = vst [vmem:[#allocation0 + $0x1a8] sm:$0x3] %v549_v52 }
  0x23   :  { %v423_v55 = vld [vmem:[#allocation0 + $0x141] ss:$8 sm:$0xf]   ;;  %64 = vst [vmem:[#allocation0 + $0x1a0] sm:$0x3] %v550_v53 }
  0x24   :  { %69 = vst [vmem:[#allocation0 + $0x198] sm:$0x3] %v551_v54  ;;  %v552_v56 = vld [vmem:[%s908_s0 + $0x64] sm:$0x3]  ;;  %v427_v57 = vsel %vm323_vm0, %v425_v50, %v423_v55  ;;  %v553_v58 = vld [vmem:[%s908_s0 + $0x62] sm:$0x3] }
  0x25   :  { %74 = vst [vmem:[#allocation0 + $0x190] sm:$0x3] %v552_v56  ;;  %v554_v59 = vld [vmem:[%s908_s0 + $0x60] sm:$0x3]  ;;  %v571_v60 = vld [vmem:[%s908_s0 + $0x3e] sm:$0x3]  ;;  %428 = vrot.lane.b32.xlu1 %v427_v57, %s617_s10 }
  0x26   :  { %79 = vst [vmem:[#allocation0 + $0x188] sm:$0x3] %v553_v58  ;;  %84 = vst [vmem:[#allocation0 + $0x180] sm:$0x3] %v554_v59  ;;  %v572_v61 = vld [vmem:[%s908_s0 + $0x3c] sm:$0x3] }
  0x27   :  { %169 = vst [vmem:[#allocation0 + $0xf8] sm:$0x3] %v571_v60  ;;  %v573_v62 = vld [vmem:[%s908_s0 + $0x3a] sm:$0x3]  ;;  %v574_v63 = vld [vmem:[%s908_s0 + $0x38] sm:$0x3] }
  0x28   :  { %v436_v0 = vld [vmem:[#allocation0 + $0x81] ss:$8 sm:$0xf0]   ;;  %174 = vst [vmem:[#allocation0 + $0xf0] sm:$0x3] %v572_v61 }
  0x29   :  { %179 = vst [vmem:[#allocation0 + $0xe8] sm:$0x3] %v573_v62  ;;  %184 = vst [vmem:[#allocation0 + $0xe0] sm:$0x3] %v574_v63  ;;  %v575_v1 = vld [vmem:[%s908_s0 + $0x36] sm:$0x3] }
  0x2a   :  { %189 = vst [vmem:[#allocation0 + $0xd8] sm:$0x3] %v575_v1  ;;  %v576_v2 = vld [vmem:[%s908_s0 + $0x34] sm:$0x3]  ;;  %v577_v3 = vld [vmem:[%s908_s0 + $0x32] sm:$0x3] }
  0x2b   :  { %v578_v4 = vld [vmem:[%s908_s0 + $0x30] sm:$0x3]  ;;  %194 = vst [vmem:[#allocation0 + $0xd0] sm:$0x3] %v576_v2  ;;  %199 = vst [vmem:[#allocation0 + $0xc8] sm:$0x3] %v577_v3 }
  0x2c   :  { %v434_v5 = vld [vmem:[#allocation0 + $0x81] ss:$8 sm:$0xf]   ;;  %204 = vst [vmem:[#allocation0 + $0xc0] sm:$0x3] %v578_v4 }
  0x2d   :  { %v539_v6 = vld [vmem:[%s908_s0 + $0x7e] sm:$0x3]  ;;  %v438_v7 = vsel %vm323_vm0, %v436_v0, %v434_v5  ;;  %v540_v8 = vld [vmem:[%s908_s0 + $0x7c] sm:$0x3]  ;;  %v541_v9 = vld [vmem:[%s908_s0 + $0x7a] sm:$0x3] }
  0x2e   :  { %9 = vst [vmem:[#allocation0 + $0x1f8] sm:$0x3] %v539_v6  ;;  %v542_v10 = vld [vmem:[%s908_s0 + $0x78] sm:$0x3]  ;;  %439 = vrot.lane.b32.xlu0 %v438_v7, %s617_s10  ;;  %14 = vst [vmem:[#allocation0 + $0x1f0] sm:$0x3] %v540_v8 }
  0x2f   :  { %v447_v11 = vld [vmem:[#allocation0 + $0x181] ss:$8 sm:$0xf0]   ;;  %19 = vst [vmem:[#allocation0 + $0x1e8] sm:$0x3] %v541_v9 }
  0x30   :  { %24 = vst [vmem:[#allocation0 + $0x1e0] sm:$0x3] %v542_v10  ;;  %v543_v12 = vld [vmem:[%s908_s0 + $0x76] sm:$0x3]  ;;  %v544_v13 = vld [vmem:[%s908_s0 + $0x74] sm:$0x3] }
  0x31   :  { %29 = vst [vmem:[#allocation0 + $0x1d8] sm:$0x3] %v543_v12  ;;  %v545_v14 = vld [vmem:[%s908_s0 + $0x72] sm:$0x3]  ;;  %v546_v15 = vld [vmem:[%s908_s0 + $0x70] sm:$0x3] }
  0x32   :  { %v445_v16 = vld [vmem:[#allocation0 + $0x181] ss:$8 sm:$0xf]   ;;  %34 = vst [vmem:[#allocation0 + $0x1d0] sm:$0x3] %v544_v13 }
  0x33   :  { %39 = vst [vmem:[#allocation0 + $0x1c8] sm:$0x3] %v545_v14  ;;  %44 = vst [vmem:[#allocation0 + $0x1c0] sm:$0x3] %v546_v15  ;;  %v449_v18 = vsel %vm323_vm0, %v447_v11, %v445_v16 }
  0x34   :  { %v321_v17 = vld [vmem:[#allocation0] ss:$8 sm:$0xf]   ;;  %v458_v19 = vld [vmem:[#allocation0 + $0xc1] ss:$8 sm:$0xf0]   ;;  %450 = vrot.lane.b32.xlu1 %v449_v18, %s617_s10 }
  0x35   :  { %v322_v20 = vld [vmem:[#allocation0] ss:$8 sm:$0xf0]   ;;  %v456_v24 = vld [vmem:[#allocation0 + $0xc1] ss:$8 sm:$0xf]  }
  0x36   :  { %v324_v21 = vsel %vm323_vm0, %v322_v20, %v321_v17  ;;  %v328_v22 = vld [vmem:[#allocation0 + $0x40] ss:$8 sm:$0xf]   ;;  %v460_v27 = vsel %vm323_vm0, %v458_v19, %v456_v24 }
  0x37   :  { %v330_v23 = vld [vmem:[#allocation0 + $0x40] ss:$8 sm:$0xf0]   ;;  %326 = vst.msk [vmem:[%s909_s1] sm:$0xff] %vm325_vm1, %v324_v21   ;;  %461 = vrot.lane.b32.xlu0 %v460_v27, %s617_s10 }
  0x38   :  { %v332_v25 = vsel %vm323_vm0, %v330_v23, %v328_v22  ;;  %v355_v26 = vld [vmem:[#allocation0 + $0x100] ss:$8 sm:$0xf]   ;;  %v469_v30 = vld [vmem:[#allocation0 + $0x1c1] ss:$8 sm:$0xf0]  }
  0x39   :  { %602 = vst.msk [vmem:[%s909_s1 + $0x8] sm:$0xff] %vm325_vm1, %v332_v25   ;;  %v357_v28 = vld [vmem:[#allocation0 + $0x100] ss:$8 sm:$0xf0]  }
  0x3a   :  { %v364_v29 = vld [vmem:[#allocation0 + $0x140] ss:$8 sm:$0xf]   ;;  %v359_v31 = vsel %vm323_vm0, %v357_v28, %v355_v26  ;;  %v467_v36 = vld [vmem:[#allocation0 + $0x1c1] ss:$8 sm:$0xf]  }
  0x3b   :  { %v366_v32 = vld [vmem:[#allocation0 + $0x140] ss:$8 sm:$0xf0]   ;;  %605 = vst.msk [vmem:[%s909_s1 + $0x20] sm:$0xff] %vm325_vm1, %v359_v31   ;;  %v471_v39 = vsel %vm323_vm0, %v469_v30, %v467_v36 }
  0x3c   :  { %v368_v33 = vsel %vm323_vm0, %v366_v32, %v364_v29  ;;  %v337_v34 = vld [vmem:[#allocation0 + $0x80] ss:$8 sm:$0xf]   ;;  %472 = vrot.lane.b32.xlu1 %v471_v39, %s617_s10 }
  0x3d   :  { %v339_v35 = vld [vmem:[#allocation0 + $0x80] ss:$8 sm:$0xf0]   ;;  %606 = vst.msk [vmem:[%s909_s1 + $0x28] sm:$0xff] %vm325_vm1, %v368_v33  }
  0x3e   :  { %v341_v37 = vsel %vm323_vm0, %v339_v35, %v337_v34  ;;  %v373_v38 = vld [vmem:[#allocation0 + $0x180] ss:$8 sm:$0xf]  }
  0x3f   :  { %603 = vst.msk [vmem:[%s909_s1 + $0x10] sm:$0xff] %vm325_vm1, %v341_v37   ;;  %v375_v40 = vld [vmem:[#allocation0 + $0x180] ss:$8 sm:$0xf0]  }
  0x40   :  { %v346_v41 = vld [vmem:[#allocation0 + $0xc0] ss:$8 sm:$0xf]   ;;  %v377_v42 = vsel %vm323_vm0, %v375_v40, %v373_v38 }
  0x41   :  { %v348_v43 = vld [vmem:[#allocation0 + $0xc0] ss:$8 sm:$0xf0]   ;;  %607 = vst.msk [vmem:[%s909_s1 + $0x30] sm:$0xff] %vm325_vm1, %v377_v42  }
  0x42   :  { %v382_v44 = vld [vmem:[#allocation0 + $0x1c0] ss:$8 sm:$0xf]   ;;  %v350_v45 = vsel %vm323_vm0, %v348_v43, %v346_v41 }
  0x43   :  { %v384_v46 = vld [vmem:[#allocation0 + $0x1c0] ss:$8 sm:$0xf0]   ;;  %604 = vst.msk [vmem:[%s909_s1 + $0x18] sm:$0xff] %vm325_vm1, %v350_v45  }
  0x44   :  { %v386_v47 = vsel %vm323_vm0, %v384_v46, %v382_v44 }
  0x45   :  { %608 = vst.msk [vmem:[%s909_s1 + $0x38] sm:$0xff] %vm325_vm1, %v386_v47  }
  0x87   :  { %v397_v48 = vpop.permute.xlu0 %396  }
  0x88   :  { %399 = vst.msk [vmem:[%s909_s1] sm:$0xff] %vm398_vm2, %v397_v48  }
  0x8c   :  { %v418_v49 = vpop.permute.xlu1 %417  }
  0x8d   :  { %610 = vst.msk [vmem:[%s909_s1 + $0x8] sm:$0xff] %vm398_vm2, %v418_v49  }
  0x90   :  { %v407_v50 = vpop.permute.xlu0 %406  }
  0x91   :  { %609 = vst.msk [vmem:[%s909_s1 + $0x20] sm:$0xff] %vm398_vm2, %v407_v50  }
  0x97   :  { %v429_v51 = vpop.permute.xlu1 %428  }
  0x98   :  { %611 = vst.msk [vmem:[%s909_s1 + $0x28] sm:$0xff] %vm398_vm2, %v429_v51  }
  0xa0   :  { %v440_v52 = vpop.permute.xlu0 %439  }
  0xa1   :  { %612 = vst.msk [vmem:[%s909_s1 + $0x10] sm:$0xff] %vm398_vm2, %v440_v52  }
  0xa6   :  { %v451_v53 = vpop.permute.xlu1 %450  }
  0xa7   :  { %613 = vst.msk [vmem:[%s909_s1 + $0x30] sm:$0xff] %vm398_vm2, %v451_v53  }
  0xa9   :  { %v462_v54 = vpop.permute.xlu0 %461  }
  0xaa   :  { %614 = vst.msk [vmem:[%s909_s1 + $0x18] sm:$0xff] %vm398_vm2, %v462_v54  }
  0xae   :  { %v473_v55 = vpop.permute.xlu1 %472  }
  0xaf   :  { %615 = vst.msk [vmem:[%s909_s1 + $0x38] sm:$0xff] %vm398_vm2, %v473_v55  }

// kernel: tile.66
= control target key start
LH: loop header
LB: loop body
LE: loop exit
PB: predicated region body
PF: predicated region fallthrough
CT: control target
= control target key end

     0   :  { %vm323_vm0 = vcmask 1047556   ;;  %s617_s10 = smov 16   ;;  %vm325_vm1 = vcmask 130048   ;;  %vm398_vm2 = vcmask 261248   ;;  %s908_s0 = inlined_call_operand.vmem [shape: f32[2,1,16,16,2,2], index: 0, kind: input, shape index: {}]   ;;  %s909_s1 = inlined_call_operand.vmem [shape: f32[32,64], index: 1, kind: output, shape index: {}]  }
   0x1   :  { %v595_v0 = vld [vmem:[%s908_s0 + $0xe] sm:$0x3]  ;;  %v596_v1 = vld [vmem:[%s908_s0 + $0xc] sm:$0x3]  ;;  %v597_v2 = vld [vmem:[%s908_s0 + $0xa] sm:$0x3] }
   0x2   :  { %289 = vst [vmem:[#allocation0 + $0x38] sm:$0x3] %v595_v0  ;;  %294 = vst [vmem:[#allocation0 + $0x30] sm:$0x3] %v596_v1  ;;  %v598_v3 = vld [vmem:[%s908_s0 + $0x8] sm:$0x3] }
   0x3   :  { %299 = vst [vmem:[#allocation0 + $0x28] sm:$0x3] %v597_v2  ;;  %v599_v4 = vld [vmem:[%s908_s0 + $0x6] sm:$0x3]  ;;  %v600_v5 = vld [vmem:[%s908_s0 + $0x4] sm:$0x3] }
   0x4   :  { %304 = vst [vmem:[#allocation0 + $0x20] sm:$0x3] %v598_v3  ;;  %309 = vst [vmem:[#allocation0 + $0x18] sm:$0x3] %v599_v4  ;;  %v601_v6 = vld [vmem:[%s908_s0 + $0x2] sm:$0x3] }
   0x5   :  { %314 = vst [vmem:[#allocation0 + $0x10] sm:$0x3] %v600_v5  ;;  %v319_v7 = vld [vmem:[%s908_s0] sm:$0x3]  ;;  %318 = vst [vmem:[#allocation0 + $0x8] sm:$0x3] %v601_v6 }
   0x6   :  { %320 = vst [vmem:[#allocation0] sm:$0x3] %v319_v7  ;;  %v587_v8 = vld [vmem:[%s908_s0 + $0x1e] sm:$0x3]  ;;  %v588_v9 = vld [vmem:[%s908_s0 + $0x1c] sm:$0x3] }
   0x7   :  { %v589_v10 = vld [vmem:[%s908_s0 + $0x1a] sm:$0x3]  ;;  %249 = vst [vmem:[#allocation0 + $0x78] sm:$0x3] %v587_v8  ;;  %254 = vst [vmem:[#allocation0 + $0x70] sm:$0x3] %v588_v9 }
   0x8   :  { %259 = vst [vmem:[#allocation0 + $0x68] sm:$0x3] %v589_v10  ;;  %v590_v11 = vld [vmem:[%s908_s0 + $0x18] sm:$0x3]  ;;  %v591_v12 = vld [vmem:[%s908_s0 + $0x16] sm:$0x3] }
   0x9   :  { %v592_v13 = vld [vmem:[%s908_s0 + $0x14] sm:$0x3]  ;;  %264 = vst [vmem:[#allocation0 + $0x60] sm:$0x3] %v590_v11  ;;  %269 = vst [vmem:[#allocation0 + $0x58] sm:$0x3] %v591_v12 }
   0xa   :  { %274 = vst [vmem:[#allocation0 + $0x50] sm:$0x3] %v592_v13  ;;  %v593_v14 = vld [vmem:[%s908_s0 + $0x12] sm:$0x3]  ;;  %v594_v15 = vld [vmem:[%s908_s0 + $0x10] sm:$0x3] }
   0xb   :  { %v563_v16 = vld [vmem:[%s908_s0 + $0x4e] sm:$0x3]  ;;  %279 = vst [vmem:[#allocation0 + $0x48] sm:$0x3] %v593_v14  ;;  %284 = vst [vmem:[#allocation0 + $0x40] sm:$0x3] %v594_v15 }
   0xc   :  { %129 = vst [vmem:[#allocation0 + $0x138] sm:$0x3] %v563_v16  ;;  %v564_v17 = vld [vmem:[%s908_s0 + $0x4c] sm:$0x3]  ;;  %v565_v18 = vld [vmem:[%s908_s0 + $0x4a] sm:$0x3] }
   0xd   :  { %v566_v19 = vld [vmem:[%s908_s0 + $0x48] sm:$0x3]  ;;  %134 = vst [vmem:[#allocation0 + $0x130] sm:$0x3] %v564_v17  ;;  %139 = vst [vmem:[#allocation0 + $0x128] sm:$0x3] %v565_v18 }
   0xe   :  { %144 = vst [vmem:[#allocation0 + $0x120] sm:$0x3] %v566_v19  ;;  %v567_v20 = vld [vmem:[%s908_s0 + $0x46] sm:$0x3]  ;;  %v568_v21 = vld [vmem:[%s908_s0 + $0x44] sm:$0x3] }
   0xf   :  { %v569_v22 = vld [vmem:[%s908_s0 + $0x42] sm:$0x3]  ;;  %149 = vst [vmem:[#allocation0 + $0x118] sm:$0x3] %v567_v20  ;;  %154 = vst [vmem:[#allocation0 + $0x110] sm:$0x3] %v568_v21 }
  0x10   :  { %159 = vst [vmem:[#allocation0 + $0x108] sm:$0x3] %v569_v22  ;;  %v570_v23 = vld [vmem:[%s908_s0 + $0x40] sm:$0x3]  ;;  %v555_v24 = vld [vmem:[%s908_s0 + $0x5e] sm:$0x3] }
  0x11   :  { %v556_v25 = vld [vmem:[%s908_s0 + $0x5c] sm:$0x3]  ;;  %v393_v26 = vld [vmem:[#allocation0 + $0x1] ss:$8 sm:$0xf0]  }
  0x12   :  { %164 = vst [vmem:[#allocation0 + $0x100] sm:$0x3] %v570_v23  ;;  %89 = vst [vmem:[#allocation0 + $0x178] sm:$0x3] %v555_v24  ;;  %v557_v27 = vld [vmem:[%s908_s0 + $0x5a] sm:$0x3] }
  0x13   :  { %94 = vst [vmem:[#allocation0 + $0x170] sm:$0x3] %v556_v25  ;;  %v391_v28 = vld [vmem:[#allocation0 + $0x1] ss:$8 sm:$0xf]  }
  0x14   :  { %99 = vst [vmem:[#allocation0 + $0x168] sm:$0x3] %v557_v27  ;;  %v558_v29 = vld [vmem:[%s908_s0 + $0x58] sm:$0x3]  ;;  %v395_v30 = vsel %vm323_vm0, %v393_v26, %v391_v28  ;;  %v559_v31 = vld [vmem:[%s908_s0 + $0x56] sm:$0x3] }
  0x15   :  { %104 = vst [vmem:[#allocation0 + $0x160] sm:$0x3] %v558_v29  ;;  %v560_v32 = vld [vmem:[%s908_s0 + $0x54] sm:$0x3]  ;;  %v561_v33 = vld [vmem:[%s908_s0 + $0x52] sm:$0x3]  ;;  %396 = vrot.lane.b32.xlu0 %v395_v30, %s617_s10 }
  0x16   :  { %v414_v34 = vld [vmem:[#allocation0 + $0x41] ss:$8 sm:$0xf0]   ;;  %109 = vst [vmem:[#allocation0 + $0x158] sm:$0x3] %v559_v31 }
  0x17   :  { %114 = vst [vmem:[#allocation0 + $0x150] sm:$0x3] %v560_v32  ;;  %119 = vst [vmem:[#allocation0 + $0x148] sm:$0x3] %v561_v33  ;;  %v562_v35 = vld [vmem:[%s908_s0 + $0x50] sm:$0x3] }
  0x18   :  { %v412_v36 = vld [vmem:[#allocation0 + $0x41] ss:$8 sm:$0xf]   ;;  %124 = vst [vmem:[#allocation0 + $0x140] sm:$0x3] %v562_v35 }
  0x19   :  { %v579_v37 = vld [vmem:[%s908_s0 + $0x2e] sm:$0x3]  ;;  %v416_v38 = vsel %vm323_vm0, %v414_v34, %v412_v36  ;;  %v403_v39 = vld [vmem:[#allocation0 + $0x101] ss:$8 sm:$0xf0]  }
  0x1a   :  { %209 = vst [vmem:[#allocation0 + $0xb8] sm:$0x3] %v579_v37  ;;  %v580_v40 = vld [vmem:[%s908_s0 + $0x2c] sm:$0x3]  ;;  %417 = vrot.lane.b32.xlu1 %v416_v38, %s617_s10  ;;  %v581_v41 = vld [vmem:[%s908_s0 + $0x2a] sm:$0x3] }
  0x1b   :  { %214 = vst [vmem:[#allocation0 + $0xb0] sm:$0x3] %v580_v40  ;;  %v582_v42 = vld [vmem:[%s908_s0 + $0x28] sm:$0x3]  ;;  %v583_v43 = vld [vmem:[%s908_s0 + $0x26] sm:$0x3] }
  0x1c   :  { %v401_v44 = vld [vmem:[#allocation0 + $0x101] ss:$8 sm:$0xf]   ;;  %219 = vst [vmem:[#allocation0 + $0xa8] sm:$0x3] %v581_v41 }
  0x1d   :  { %224 = vst [vmem:[#allocation0 + $0xa0] sm:$0x3] %v582_v42  ;;  %229 = vst [vmem:[#allocation0 + $0x98] sm:$0x3] %v583_v43  ;;  %v584_v45 = vld [vmem:[%s908_s0 + $0x24] sm:$0x3]  ;;  %v405_v46 = vsel %vm323_vm0, %v403_v39, %v401_v44 }
  0x1e   :  { %234 = vst [vmem:[#allocation0 + $0x90] sm:$0x3] %v584_v45  ;;  %v585_v47 = vld [vmem:[%s908_s0 + $0x22] sm:$0x3]  ;;  %v586_v48 = vld [vmem:[%s908_s0 + $0x20] sm:$0x3]  ;;  %406 = vrot.lane.b32.xlu0 %v405_v46, %s617_s10 }
  0x1f   :  { %v547_v49 = vld [vmem:[%s908_s0 + $0x6e] sm:$0x3]  ;;  %v425_v50 = vld [vmem:[#allocation0 + $0x141] ss:$8 sm:$0xf0]  }
  0x20   :  { %239 = vst [vmem:[#allocation0 + $0x88] sm:$0x3] %v585_v47  ;;  %244 = vst [vmem:[#allocation0 + $0x80] sm:$0x3] %v586_v48  ;;  %v548_v51 = vld [vmem:[%s908_s0 + $0x6c] sm:$0x3] }
  0x21   :  { %49 = vst [vmem:[#allocation0 + $0x1b8] sm:$0x3] %v547_v49  ;;  %54 = vst [vmem:[#allocation0 + $0x1b0] sm:$0x3] %v548_v51  ;;  %v549_v52 = vld [vmem:[%s908_s0 + $0x6a] sm:$0x3] }
  0x22   :  { %v550_v53 = vld [vmem:[%s908_s0 + $0x68] sm:$0x3]  ;;  %v551_v54 = vld [vmem:[%s908_s0 + $0x66] sm:$0x3]  ;;  %59 = vst [vmem:[#allocation0 + $0x1a8] sm:$0x3] %v549_v52 }
  0x23   :  { %v423_v55 = vld [vmem:[#allocation0 + $0x141] ss:$8 sm:$0xf]   ;;  %64 = vst [vmem:[#allocation0 + $0x1a0] sm:$0x3] %v550_v53 }
  0x24   :  { %69 = vst [vmem:[#allocation0 + $0x198] sm:$0x3] %v551_v54  ;;  %v552_v56 = vld [vmem:[%s908_s0 + $0x64] sm:$0x3]  ;;  %v427_v57 = vsel %vm323_vm0, %v425_v50, %v423_v55  ;;  %v553_v58 = vld [vmem:[%s908_s0 + $0x62] sm:$0x3] }
  0x25   :  { %74 = vst [vmem:[#allocation0 + $0x190] sm:$0x3] %v552_v56  ;;  %v554_v59 = vld [vmem:[%s908_s0 + $0x60] sm:$0x3]  ;;  %v571_v60 = vld [vmem:[%s908_s0 + $0x3e] sm:$0x3]  ;;  %428 = vrot.lane.b32.xlu1 %v427_v57, %s617_s10 }
  0x26   :  { %79 = vst [vmem:[#allocation0 + $0x188] sm:$0x3] %v553_v58  ;;  %84 = vst [vmem:[#allocation0 + $0x180] sm:$0x3] %v554_v59  ;;  %v572_v61 = vld [vmem:[%s908_s0 + $0x3c] sm:$0x3] }
  0x27   :  { %169 = vst [vmem:[#allocation0 + $0xf8] sm:$0x3] %v571_v60  ;;  %v573_v62 = vld [vmem:[%s908_s0 + $0x3a] sm:$0x3]  ;;  %v574_v63 = vld [vmem:[%s908_s0 + $0x38] sm:$0x3] }
  0x28   :  { %v436_v0 = vld [vmem:[#allocation0 + $0x81] ss:$8 sm:$0xf0]   ;;  %174 = vst [vmem:[#allocation0 + $0xf0] sm:$0x3] %v572_v61 }
  0x29   :  { %179 = vst [vmem:[#allocation0 + $0xe8] sm:$0x3] %v573_v62  ;;  %184 = vst [vmem:[#allocation0 + $0xe0] sm:$0x3] %v574_v63  ;;  %v575_v1 = vld [vmem:[%s908_s0 + $0x36] sm:$0x3] }
  0x2a   :  { %189 = vst [vmem:[#allocation0 + $0xd8] sm:$0x3] %v575_v1  ;;  %v576_v2 = vld [vmem:[%s908_s0 + $0x34] sm:$0x3]  ;;  %v577_v3 = vld [vmem:[%s908_s0 + $0x32] sm:$0x3] }
  0x2b   :  { %v578_v4 = vld [vmem:[%s908_s0 + $0x30] sm:$0x3]  ;;  %194 = vst [vmem:[#allocation0 + $0xd0] sm:$0x3] %v576_v2  ;;  %199 = vst [vmem:[#allocation0 + $0xc8] sm:$0x3] %v577_v3 }
  0x2c   :  { %v434_v5 = vld [vmem:[#allocation0 + $0x81] ss:$8 sm:$0xf]   ;;  %204 = vst [vmem:[#allocation0 + $0xc0] sm:$0x3] %v578_v4 }
  0x2d   :  { %v539_v6 = vld [vmem:[%s908_s0 + $0x7e] sm:$0x3]  ;;  %v438_v7 = vsel %vm323_vm0, %v436_v0, %v434_v5  ;;  %v540_v8 = vld [vmem:[%s908_s0 + $0x7c] sm:$0x3]  ;;  %v541_v9 = vld [vmem:[%s908_s0 + $0x7a] sm:$0x3] }
  0x2e   :  { %9 = vst [vmem:[#allocation0 + $0x1f8] sm:$0x3] %v539_v6  ;;  %v542_v10 = vld [vmem:[%s908_s0 + $0x78] sm:$0x3]  ;;  %439 = vrot.lane.b32.xlu0 %v438_v7, %s617_s10  ;;  %14 = vst [vmem:[#allocation0 + $0x1f0] sm:$0x3] %v540_v8 }
  0x2f   :  { %v447_v11 = vld [vmem:[#allocation0 + $0x181] ss:$8 sm:$0xf0]   ;;  %19 = vst [vmem:[#allocation0 + $0x1e8] sm:$0x3] %v541_v9 }
  0x30   :  { %24 = vst [vmem:[#allocation0 + $0x1e0] sm:$0x3] %v542_v10  ;;  %v543_v12 = vld [vmem:[%s908_s0 + $0x76] sm:$0x3]  ;;  %v544_v13 = vld [vmem:[%s908_s0 + $0x74] sm:$0x3] }
  0x31   :  { %29 = vst [vmem:[#allocation0 + $0x1d8] sm:$0x3] %v543_v12  ;;  %v545_v14 = vld [vmem:[%s908_s0 + $0x72] sm:$0x3]  ;;  %v546_v15 = vld [vmem:[%s908_s0 + $0x70] sm:$0x3] }
  0x32   :  { %v445_v16 = vld [vmem:[#allocation0 + $0x181] ss:$8 sm:$0xf]   ;;  %34 = vst [vmem:[#allocation0 + $0x1d0] sm:$0x3] %v544_v13 }
  0x33   :  { %39 = vst [vmem:[#allocation0 + $0x1c8] sm:$0x3] %v545_v14  ;;  %44 = vst [vmem:[#allocation0 + $0x1c0] sm:$0x3] %v546_v15  ;;  %v449_v18 = vsel %vm323_vm0, %v447_v11, %v445_v16 }
  0x34   :  { %v321_v17 = vld [vmem:[#allocation0] ss:$8 sm:$0xf]   ;;  %v458_v19 = vld [vmem:[#allocation0 + $0xc1] ss:$8 sm:$0xf0]   ;;  %450 = vrot.lane.b32.xlu1 %v449_v18, %s617_s10 }
  0x35   :  { %v322_v20 = vld [vmem:[#allocation0] ss:$8 sm:$0xf0]   ;;  %v456_v24 = vld [vmem:[#allocation0 + $0xc1] ss:$8 sm:$0xf]  }
  0x36   :  { %v324_v21 = vsel %vm323_vm0, %v322_v20, %v321_v17  ;;  %v328_v22 = vld [vmem:[#allocation0 + $0x40] ss:$8 sm:$0xf]   ;;  %v460_v27 = vsel %vm323_vm0, %v458_v19, %v456_v24 }
  0x37   :  { %v330_v23 = vld [vmem:[#allocation0 + $0x40] ss:$8 sm:$0xf0]   ;;  %326 = vst.msk [vmem:[%s909_s1] sm:$0xff] %vm325_vm1, %v324_v21   ;;  %461 = vrot.lane.b32.xlu0 %v460_v27, %s617_s10 }
  0x38   :  { %v332_v25 = vsel %vm323_vm0, %v330_v23, %v328_v22  ;;  %v355_v26 = vld [vmem:[#allocation0 + $0x100] ss:$8 sm:$0xf]   ;;  %v469_v30 = vld [vmem:[#allocation0 + $0x1c1] ss:$8 sm:$0xf0]  }
  0x39   :  { %602 = vst.msk [vmem:[%s909_s1 + $0x8] sm:$0xff] %vm325_vm1, %v332_v25   ;;  %v357_v28 = vld [vmem:[#allocation0 + $0x100] ss:$8 sm:$0xf0]  }
  0x3a   :  { %v364_v29 = vld [vmem:[#allocation0 + $0x140] ss:$8 sm:$0xf]   ;;  %v359_v31 = vsel %vm323_vm0, %v357_v28, %v355_v26  ;;  %v467_v36 = vld [vmem:[#allocation0 + $0x1c1] ss:$8 sm:$0xf]  }
  0x3b   :  { %v366_v32 = vld [vmem:[#allocation0 + $0x140] ss:$8 sm:$0xf0]   ;;  %605 = vst.msk [vmem:[%s909_s1 + $0x20] sm:$0xff] %vm325_vm1, %v359_v31   ;;  %v471_v39 = vsel %vm323_vm0, %v469_v30, %v467_v36 }
  0x3c   :  { %v368_v33 = vsel %vm323_vm0, %v366_v32, %v364_v29  ;;  %v337_v34 = vld [vmem:[#allocation0 + $0x80] ss:$8 sm:$0xf]   ;;  %472 = vrot.lane.b32.xlu1 %v471_v39, %s617_s10 }
  0x3d   :  { %v339_v35 = vld [vmem:[#allocation0 + $0x80] ss:$8 sm:$0xf0]   ;;  %606 = vst.msk [vmem:[%s909_s1 + $0x28] sm:$0xff] %vm325_vm1, %v368_v33  }
  0x3e   :  { %v341_v37 = vsel %vm323_vm0, %v339_v35, %v337_v34  ;;  %v373_v38 = vld [vmem:[#allocation0 + $0x180] ss:$8 sm:$0xf]  }
  0x3f   :  { %603 = vst.msk [vmem:[%s909_s1 + $0x10] sm:$0xff] %vm325_vm1, %v341_v37   ;;  %v375_v40 = vld [vmem:[#allocation0 + $0x180] ss:$8 sm:$0xf0]  }
  0x40   :  { %v346_v41 = vld [vmem:[#allocation0 + $0xc0] ss:$8 sm:$0xf]   ;;  %v377_v42 = vsel %vm323_vm0, %v375_v40, %v373_v38 }
  0x41   :  { %v348_v43 = vld [vmem:[#allocation0 + $0xc0] ss:$8 sm:$0xf0]   ;;  %607 = vst.msk [vmem:[%s909_s1 + $0x30] sm:$0xff] %vm325_vm1, %v377_v42  }
  0x42   :  { %v382_v44 = vld [vmem:[#allocation0 + $0x1c0] ss:$8 sm:$0xf]   ;;  %v350_v45 = vsel %vm323_vm0, %v348_v43, %v346_v41 }
  0x43   :  { %v384_v46 = vld [vmem:[#allocation0 + $0x1c0] ss:$8 sm:$0xf0]   ;;  %604 = vst.msk [vmem:[%s909_s1 + $0x18] sm:$0xff] %vm325_vm1, %v350_v45  }
  0x44   :  { %v386_v47 = vsel %vm323_vm0, %v384_v46, %v382_v44 }
  0x45   :  { %608 = vst.msk [vmem:[%s909_s1 + $0x38] sm:$0xff] %vm325_vm1, %v386_v47  }
  0x87   :  { %v397_v48 = vpop.permute.xlu0 %396  }
  0x88   :  { %399 = vst.msk [vmem:[%s909_s1] sm:$0xff] %vm398_vm2, %v397_v48  }
  0x8c   :  { %v418_v49 = vpop.permute.xlu1 %417  }
  0x8d   :  { %610 = vst.msk [vmem:[%s909_s1 + $0x8] sm:$0xff] %vm398_vm2, %v418_v49  }
  0x90   :  { %v407_v50 = vpop.permute.xlu0 %406  }
  0x91   :  { %609 = vst.msk [vmem:[%s909_s1 + $0x20] sm:$0xff] %vm398_vm2, %v407_v50  }
  0x97   :  { %v429_v51 = vpop.permute.xlu1 %428  }
  0x98   :  { %611 = vst.msk [vmem:[%s909_s1 + $0x28] sm:$0xff] %vm398_vm2, %v429_v51  }
  0xa0   :  { %v440_v52 = vpop.permute.xlu0 %439  }
  0xa1   :  { %612 = vst.msk [vmem:[%s909_s1 + $0x10] sm:$0xff] %vm398_vm2, %v440_v52  }
  0xa6   :  { %v451_v53 = vpop.permute.xlu1 %450  }
  0xa7   :  { %613 = vst.msk [vmem:[%s909_s1 + $0x30] sm:$0xff] %vm398_vm2, %v451_v53  }
  0xa9   :  { %v462_v54 = vpop.permute.xlu0 %461  }
  0xaa   :  { %614 = vst.msk [vmem:[%s909_s1 + $0x18] sm:$0xff] %vm398_vm2, %v462_v54  }
  0xae   :  { %v473_v55 = vpop.permute.xlu1 %472  }
  0xaf   :  { %615 = vst.msk [vmem:[%s909_s1 + $0x38] sm:$0xff] %vm398_vm2, %v473_v55  }

// kernel: dec_bottleneck_forward.1
= control target key start
LH: loop header
LB: loop body
LE: loop exit
PB: predicated region body
PF: predicated region fallthrough
CT: control target
= control target key end

     0   :  { %vm80_vm0 = vcmask 130048   ;;  %vm295_vm1 = vcmask 523264   ;;  %vm529_vm2 = vcmask 261120   ;;  %vm4311_vm3 = vmmov 0   ;;  %s5398_s0 = inlined_call_operand.vmem [shape: f32[16,64], index: 0, kind: input, shape index: {}]   ;;  %s5399_s1 = inlined_call_operand.vmem [shape: f32[32,16], index: 1, kind: input, shape index: {}]   ;;  %s5400_s2 = inlined_call_operand.vmem [shape: f32[32,16], index: 2, kind: input, shape index: {}]   ;;  %s5401_s4 = inlined_call_operand.vmem [shape: f32[64,64], index: 4, kind: input, shape index: {}]   ;;  %s5402_s3 = inlined_call_operand.vmem [shape: f32[64,64], index: 3, kind: input, shape index: {}]   ;;  %s5403_s8 = inlined_call_operand.vmem [shape: f32[3,32,32], index: 8, kind: input, shape index: {}]   ;;  %s5404_s10 = inlined_call_operand.vmem [shape: f32[3,64,64], index: 10, kind: input, shape index: {}]   ;;  %s5405_s5 = inlined_call_operand.vmem [shape: f32[1,64], index: 5, kind: input, shape index: {}]   ;;  %s5406_s6 = inlined_call_operand.vmem [shape: f32[32,64], index: 6, kind: input, shape index: {}]   ;;  %s5407_s7 = inlined_call_operand.vmem [shape: f32[32,64], index: 7, kind: input, shape index: {}]   ;;  %s5408_s11 = inlined_call_operand.vmem [shape: f32[3,64,64], index: 11, kind: input, shape index: {}]   ;;  %s5409_s9 = inlined_call_operand.vmem [shape: f32[64,64], index: 9, kind: input, shape index: {}]   ;;  %s5410_s12 = inlined_call_operand.vmem [shape: f32[1,64], index: 12, kind: input, shape index: {}]   ;;  %s5411_s15 = inlined_call_operand.vmem [shape: f32[3,64,64], index: 15, kind: input, shape index: {}]   ;;  %s5412_s13 = inlined_call_operand.vmem [shape: f32[1,64], index: 13, kind: input, shape index: {}]   ;;  %s5413_s14 = inlined_call_operand.vmem [shape: f32[1,64], index: 14, kind: input, shape index: {}]   ;;  %s5414_s16 = inlined_call_operand.vmem [shape: f32[1,64], index: 16, kind: input, shape index: {}]   ;;  %s5415_s19 = inlined_call_operand.vmem [shape: f32[3,64,64], index: 19, kind: input, shape index: {}]   ;;  %s5416_s17 = inlined_call_operand.vmem [shape: f32[1,64], index: 17, kind: input, shape index: {}]   ;;  %s5417_s18 = inlined_call_operand.vmem [shape: f32[1,64], index: 18, kind: input, shape index: {}]   ;;  %s5418_s20 = inlined_call_operand.vmem [shape: f32[1,64], index: 20, kind: input, shape index: {}]   ;;  %s5419_s21 = inlined_call_operand.vmem [shape: f32[1,64], index: 21, kind: input, shape index: {}]   ;;  %s5420_s22 = inlined_call_operand.vmem [shape: f32[1,64], index: 22, kind: input, shape index: {}]   ;;  %s5421_s23 = inlined_call_operand.vmem [shape: f32[32,64], index: 23, kind: output, shape index: {}]  }
   0x1   :  { %5429 = sst [smem:[#allocation2_spill]] %s5398_s0 }
   0x2   :  { %5430 = sst [smem:[#allocation3_spill]] %s5399_s1 }
   0x3   :  { %5431 = sst [smem:[#allocation4_spill]] %s5400_s2 }
   0x4   :  { %5432 = sst [smem:[#allocation5_spill]] %s5401_s4 }
   0x5   :  { %5433 = sst [smem:[#allocation6_spill]] %s5402_s3 }
   0x6   :  { %5434 = sst [smem:[#allocation7_spill]] %s5403_s8 }
   0x7   :  { %5435 = sst [smem:[#allocation8_spill]] %s5404_s10 }
   0x8   :  { %5436 = sst [smem:[#allocation9_spill]] %s5405_s5 }
   0x9   :  { %s5437_s24 = sld [smem:[#allocation2_spill]] }
   0xa   :  { %s5438_s2 = sld [smem:[#allocation3_spill]] }
   0xb   :  { %s5439_s5 = sld [smem:[#allocation4_spill]] }
   0xc   :  { %s5440_s26 = sld [smem:[#allocation5_spill]] }
   0xd   :  { %s5441_s28 = sld [smem:[#allocation6_spill]] }
   0xe   :  { %s5442_s25 = sld [smem:[#allocation7_spill]] }
   0xf   :  { %v75_v0 = vld [vmem:[%s5437_s24 + $0x8] sm:$0xff]  ;;  %v74_v1 = vld [vmem:[%s5437_s24] sm:$0xff]  ;;  %s5443_s1 = sld [smem:[#allocation8_spill]] }
  0x10   :  { %3728 = vmatprep.subr.mxu0 %v75_v0  ;;  %3738 = vmatprep.subr.mxu1 %v75_v0  ;;  %v76_v2 = vld [vmem:[%s5438_s2] sm:$0xff]  ;;  %v77_v4 = vld [vmem:[%s5438_s2 + $0x8] sm:$0xff]  ;;  %v78_v6 = vld [vmem:[%s5438_s2 + $0x10] sm:$0xff] }
  0x11   :  { %3729 = vmatpush3.msra.mxu0 %v75_v0  ;;  %3739 = vmatpush3.msra.mxu1 %v75_v0  ;;  %v186_v3 = vld [vmem:[%s5439_s5] sm:$0xff]  ;;  %v187_v5 = vld [vmem:[%s5439_s5 + $0x8] sm:$0xff]  ;;  %v188_v7 = vld [vmem:[%s5439_s5 + $0x10] sm:$0xff] }
  0x12   :  { %3730 = vmatprep.subr.mxu0 %v74_v1  ;;  %3740 = vmatprep.subr.mxu1 %v74_v1  ;;  %v294_v8 = vld [vmem:[%s5440_s26 + $0x38] sm:$0xff]  ;;  %v293_v12 = vld [vmem:[%s5440_s26 + $0x30] sm:$0xff]  ;;  %v292_v14 = vld [vmem:[%s5440_s26 + $0x28] sm:$0xff] }
  0x13   :  { %3731 = vmatpush3.msra.mxu0 %v74_v1  ;;  %3732 = vmatprep.mubr.msk.f32.mxu0 %vm80_vm0, %v76_v2  ;;  %v185_v9 = vld [vmem:[%s5441_s28 + $0x38] sm:$0xff]  ;;  %v184_v13 = vld [vmem:[%s5441_s28 + $0x30] sm:$0xff]  ;;  %v183_v15 = vld [vmem:[%s5441_s28 + $0x28] sm:$0xff] }
  0x14   :  { %3741 = vmatpush3.msra.mxu1 %v74_v1  ;;  %3742 = vmatprep.mubr.msk.f32.mxu1 %vm80_vm0, %v186_v3  ;;  %v79_v10 = vld [vmem:[%s5438_s2 + $0x18] sm:$0xff]  ;;  %v291_v16 = vld [vmem:[%s5440_s26 + $0x20] sm:$0xff]  ;;  %v289_v20 = vld [vmem:[%s5440_s26 + $0x10] sm:$0xff]  ;;  %s5444_s2 = sld [smem:[#allocation9_spill]] }
  0x15   :  { %3733 = vmatmul.mubr.msk.f32.vlgmr.msra.gmra.mxu0 %vm80_vm0, %v77_v4  ;;  %3743 = vmatmul.mubr.msk.f32.vlgmr.msra.gmra.mxu1 %vm80_vm0, %v187_v5  ;;  %v189_v11 = vld [vmem:[%s5439_s5 + $0x18] sm:$0xff]  ;;  %v182_v17 = vld [vmem:[%s5441_s28 + $0x20] sm:$0xff]  ;;  %v180_v21 = vld [vmem:[%s5441_s28 + $0x10] sm:$0xff] }
  0x16   :  { %3735 = vmatprep.mubr.msk.f32.mxu0 %vm80_vm0, %v78_v6  ;;  %3745 = vmatprep.mubr.msk.f32.mxu1 %vm80_vm0, %v188_v7  ;;  %v290_v18 = vld [vmem:[%s5440_s26 + $0x18] sm:$0xff]  ;;  %v288_v22 = vld [vmem:[%s5440_s26 + $0x8] sm:$0xff]  ;;  %v287_v24 = vld [vmem:[%s5440_s26] sm:$0xff] }
  0x17   :  { %3748 = vmatprep.subr.mxu0 %v294_v8  ;;  %3770 = vmatprep.subr.mxu1 %v185_v9  ;;  %v181_v19 = vld [vmem:[%s5441_s28 + $0x18] sm:$0xff]  ;;  %v179_v23 = vld [vmem:[%s5441_s28 + $0x8] sm:$0xff]  ;;  %v178_v25 = vld [vmem:[%s5441_s28] sm:$0xff] }
  0x18   :  { %3749 = vmatpush3.msra.mxu0 %v294_v8  ;;  %3771 = vmatpush3.msra.mxu1 %v185_v9  ;;  %v4529_v34 = vld [vmem:[%s5442_s25] sm:$0xff]  ;;  %v634_v35 = vld [vmem:[%s5443_s1 + $0x38] sm:$0xff]  ;;  %v633_v36 = vld [vmem:[%s5443_s1 + $0x30] sm:$0xff] }
  0x19   :  { %3736 = vmatmul.mubr.msk.f32.gmra.mxu0 %vm80_vm0, %v79_v10  ;;  %3746 = vmatmul.mubr.msk.f32.gmra.mxu1 %vm80_vm0, %v189_v11  ;;  %v632_v37 = vld [vmem:[%s5443_s1 + $0x28] sm:$0xff]  ;;  %v631_v38 = vld [vmem:[%s5443_s1 + $0x20] sm:$0xff]  ;;  %v630_v39 = vld [vmem:[%s5443_s1 + $0x18] sm:$0xff] }
  0x1a   :  { %3750 = vmatprep.subr.mxu0 %v293_v12  ;;  %3772 = vmatprep.subr.mxu1 %v184_v13  ;;  %v629_v40 = vld [vmem:[%s5443_s1 + $0x10] sm:$0xff]  ;;  %v3266_v48 = vld [vmem:[%s5444_s2] ss:$0 sm:$0xff]  ;;  %v4571_v58 = vld [vmem:[%s5442_s25 + $0x8] sm:$0xff] }
  0x1b   :  { %3751 = vmatpush3.msra.mxu0 %v293_v12  ;;  %3773 = vmatpush3.msra.mxu1 %v184_v13  ;;  %v3278_v59 = vld [vmem:[%s5443_s1 + $0x78] sm:$0xff]  ;;  %v4580_v60 = vld [vmem:[%s5442_s25 + $0x10] sm:$0xff]  ;;  %v3276_v63 = vld [vmem:[%s5443_s1 + $0x68] sm:$0xff] }
  0x1c   :  { %3752 = vmatprep.subr.mxu0 %v292_v14  ;;  %3774 = vmatprep.subr.mxu1 %v183_v15  ;;  %v3277_v61 = vld [vmem:[%s5443_s1 + $0x70] sm:$0xff]  ;;  %v4593_v62 = vld [vmem:[%s5442_s25 + $0x18] sm:$0xff]  ;;  %v3275_v0 = vld [vmem:[%s5443_s1 + $0x60] sm:$0xff] }
  0x1d   :  { %3753 = vmatpush3.msra.mxu0 %v292_v14  ;;  %3775 = vmatpush3.msra.mxu1 %v183_v15  ;;  %v3274_v1 = vld [vmem:[%s5443_s1 + $0x58] sm:$0xff]  ;;  %v3273_v2 = vld [vmem:[%s5443_s1 + $0x50] sm:$0xff]  ;;  %v3272_v3 = vld [vmem:[%s5443_s1 + $0x48] sm:$0xff] }
  0x1e   :  { %3754 = vmatprep.subr.mxu0 %v291_v16  ;;  %3776 = vmatprep.subr.mxu1 %v182_v17  ;;  %v3271_v4 = vld [vmem:[%s5443_s1 + $0x40] sm:$0xff]  ;;  %v504_v5 = vld [vmem:[%s5406_s6 + $0x18] sm:$0xff]  ;;  %v503_v7 = vld [vmem:[%s5406_s6 + $0x10] sm:$0xff] }
  0x1f   :  { %3755 = vmatpush3.msra.mxu0 %v291_v16  ;;  %3777 = vmatpush3.msra.mxu1 %v182_v17  ;;  %v508_v6 = vld [vmem:[%s5407_s7 + $0x18] sm:$0xff]  ;;  %v507_v8 = vld [vmem:[%s5407_s7 + $0x10] sm:$0xff]  ;;  %v502_v10 = vld [vmem:[%s5406_s6 + $0x8] sm:$0xff] }
  0x20   :  { %3756 = vmatprep.subr.mxu0 %v290_v18  ;;  %3778 = vmatprep.subr.mxu1 %v181_v19  ;;  %v512_v9 = vadd.f32 %v508_v6, %v504_v5  ;;  %v506_v11 = vld [vmem:[%s5407_s7 + $0x8] sm:$0xff]  ;;  %v4645_v12 = vld [vmem:[%s5442_s25 + $0x40] sm:$0xff]  ;;  %v511_v13 = vadd.f32 %v507_v8, %v503_v7  ;;  %v3317_v6 = vld [vmem:[%s5408_s11 + $0x50] sm:$0xff] }
  0x21   :  { %3757 = vmatpush3.msra.mxu0 %v290_v18  ;;  %3779 = vmatpush3.msra.mxu1 %v181_v19  ;;  %v501_v14 = vld [vmem:[%s5406_s6] sm:$0xff]  ;;  %v510_v17 = vadd.f32 %v506_v11, %v502_v10  ;;  %v4665_v18 = vld [vmem:[%s5442_s25 + $0x48] sm:$0xff]  ;;  %v3338_v11 = vld [vmem:[%s5408_s11 + $0xb8] sm:$0xff] }
  0x22   :  { %3758 = vmatprep.subr.mxu0 %v289_v20  ;;  %3780 = vmatprep.subr.mxu1 %v180_v21  ;;  %v505_v15 = vld [vmem:[%s5407_s7] sm:$0xff]  ;;  %v4657_v16 = vmax.f32 %v512_v9, 0.0  ;;  %v4668_v19 = vmax.f32 %v511_v13, 0.0  ;;  %v3316_v8 = vld [vmem:[%s5408_s11 + $0x48] sm:$0xff]  ;;  %v3337_v13 = vld [vmem:[%s5408_s11 + $0xb0] sm:$0xff] }
  0x23   :  { %3759 = vmatpush3.msra.mxu0 %v289_v20  ;;  %3781 = vmatpush3.msra.mxu1 %v180_v21  ;;  %v4673_v20 = vld [vmem:[%s5442_s25 + $0x50] sm:$0xff]  ;;  %v509_v21 = vadd.f32 %v505_v15, %v501_v14  ;;  %v3315_v10 = vld [vmem:[%s5408_s11 + $0x40] sm:$0xff]  ;;  %v3336_v14 = vld [vmem:[%s5408_s11 + $0xa8] sm:$0xff] }
  0x24   :  { %3760 = vmatprep.subr.mxu0 %v288_v22  ;;  %3782 = vmatprep.subr.mxu1 %v179_v23  ;;  %v3335_v15 = vld [vmem:[%s5408_s11 + $0xa0] sm:$0xff] }
  0x25   :  { %3761 = vmatpush3.msra.mxu0 %v288_v22  ;;  %3783 = vmatpush3.msra.mxu1 %v179_v23  ;;  %v4679_v22 = vmax.f32 %v510_v17, 0.0  ;;  %v4687_v23 = vld [vmem:[%s5442_s25 + $0x58] sm:$0xff]  ;;  %v3333_v17 = vld [vmem:[%s5408_s11 + $0x90] sm:$0xff] }
  0x26   :  { %3762 = vmatprep.subr.mxu0 %v287_v24  ;;  %3784 = vmatprep.subr.mxu1 %v178_v25 }
  0x27   :  { %3763 = vmatpush3.msra.mxu0 %v287_v24  ;;  %3785 = vmatpush3.msra.mxu1 %v178_v25  ;;  %v4690_v24 = vmax.f32 %v509_v21, 0.0  ;;  %v628_v25 = vld [vmem:[%s5443_s1 + $0x8] sm:$0xff]  ;;  %v3331_v21 = vld [vmem:[%s5408_s11 + $0x80] sm:$0xff] }
  0x28   :  { %3828 = vmatprep.subr.mxu0 %v634_v35 }
  0xd5   :  { %v3734_v26 = vpop.f32.mrf.mxu0  ;;  %v3744_v27 = vpop.f32.mrf.mxu1 }
  0xd7   :  { %v159_v28 = vpop.f32.mrf.mxu0  ;;  %v268_v29 = vpop.f32.mrf.mxu1 }
  0xd8   :  { %3764 = vmatprep.mubr.msk.f32.mxu0 %vm295_vm1, %v268_v29  ;;  %3786 = vmatprep.mubr.msk.f32.mxu1 %vm295_vm1, %v159_v28  ;;  %v1142_v28 = vld [vmem:[%s5408_s11 + $0x38] sm:$0xff]  ;;  %v1141_v29 = vld [vmem:[%s5408_s11 + $0x30] sm:$0xff] }
  0xd9   :  { %v3737_v30 = vpop.f32.mrf.mxu0  ;;  %v3747_v31 = vpop.f32.mrf.mxu1  ;;  %3765 = vmatmul.mubr.msk.f32.vlgmr.msra.gmra.mxu0 %vm295_vm1, %v3744_v27  ;;  %3787 = vmatmul.mubr.msk.f32.vlgmr.msra.gmra.mxu1 %vm295_vm1, %v3734_v26  ;;  %v627_v26 = vld [vmem:[%s5443_s1] sm:$0xff]  ;;  %v3302_v27 = vld [vmem:[%s5443_s1 + $0xb8] sm:$0xff] }
  0xda   :  { %3829 = vmatpush3.msra.mxu0 %v634_v35  ;;  %v1136_v35 = vld [vmem:[%s5408_s11 + $0x8] sm:$0xff] }
  0xdb   :  { %v169_v32 = vpop.f32.mrf.mxu0  ;;  %v278_v33 = vpop.f32.mrf.mxu1  ;;  %3830 = vmatprep.subr.mxu0 %v633_v36 }
  0xdc   :  { %3767 = vmatprep.mubr.msk.f32.mxu0 %vm295_vm1, %v278_v33  ;;  %3789 = vmatprep.mubr.msk.f32.mxu1 %vm295_vm1, %v169_v32  ;;  %v1138_v32 = vld [vmem:[%s5408_s11 + $0x18] sm:$0xff]  ;;  %v1137_v33 = vld [vmem:[%s5408_s11 + $0x10] sm:$0xff] }
  0xdd   :  { %3768 = vmatmul.mubr.msk.f32.gmra.mxu0 %vm295_vm1, %v3747_v31  ;;  %3790 = vmatmul.mubr.msk.f32.gmra.mxu1 %vm295_vm1, %v3737_v30  ;;  %v1140_v30 = vld [vmem:[%s5408_s11 + $0x28] sm:$0xff]  ;;  %v1139_v31 = vld [vmem:[%s5408_s11 + $0x20] sm:$0xff] }
  0xde   :  { %3800 = vmatprep.mubr.msk.f32.mxu1 %vm529_vm2, %v4529_v34  ;;  %3831 = vmatpush3.msra.mxu0 %v633_v36  ;;  %v1135_v36 = vld [vmem:[%s5408_s11] sm:$0xff] }
  0xdf   :  { %3832 = vmatprep.subr.mxu0 %v632_v37 }
  0xe0   :  { %3833 = vmatpush3.msra.mxu0 %v632_v37 }
  0xe1   :  { %3834 = vmatprep.subr.mxu0 %v631_v38 }
  0xe2   :  { %3835 = vmatpush3.msra.mxu0 %v631_v38 }
  0xe3   :  { %3836 = vmatprep.subr.mxu0 %v630_v39 }
  0xe4   :  { %3837 = vmatpush3.msra.mxu0 %v630_v39  ;;  %v3301_v39 = vld [vmem:[%s5443_s1 + $0xb0] sm:$0xff] }
  0xe5   :  { %3838 = vmatprep.subr.mxu0 %v629_v40 }
  0xe6   :  { %3839 = vmatpush3.msra.mxu0 %v629_v40 }
  0xe7   :  { %3840 = vmatprep.subr.mxu0 %v628_v25 }
  0xe8   :  { %3841 = vmatpush3.msra.mxu0 %v628_v25 }
  0xe9   :  { %3842 = vmatprep.subr.mxu0 %v627_v26 }
  0xea   :  { %3843 = vmatpush3.msra.mxu0 %v627_v26 }
  0xeb   :  { %3864 = vmatprep.subr.mxu0 %v3302_v27 }
 0x199   :  { %v3766_v41 = vpop.f32.mrf.mxu0  ;;  %v3788_v42 = vpop.f32.mrf.mxu1 }
 0x19a   :  { %v477_v51 = vadd.f32 %v3788_v42, %v3766_v41  ;;  %v3300_v41 = vld [vmem:[%s5443_s1 + $0xa8] sm:$0xff] }
 0x19b   :  { %v374_v43 = vpop.f32.mrf.mxu0  ;;  %v471_v44 = vpop.f32.mrf.mxu1 }
 0x19c   :  { %v472_v54 = vadd.f32 %v471_v44, %v374_v43  ;;  %v4560_v56 = vadd.f32 %v3266_v48, %v477_v51  ;;  %v3299_v43 = vld [vmem:[%s5443_s1 + $0xa0] sm:$0xff]  ;;  %v3298_v44 = vld [vmem:[%s5443_s1 + $0x98] sm:$0xff] }
 0x19d   :  { %v3769_v45 = vpop.f32.mrf.mxu0  ;;  %v3791_v46 = vpop.f32.mrf.mxu1 }
 0x19e   :  { %v487_v47 = vadd.f32 %v3791_v46, %v3769_v45  ;;  %v4564_v57 = vadd.f32 %v3266_v48, %v472_v54  ;;  %v3297_v45 = vld [vmem:[%s5443_s1 + $0x90] sm:$0xff]  ;;  %v3296_v46 = vld [vmem:[%s5443_s1 + $0x88] sm:$0xff] }
 0x19f   :  { %v384_v49 = vpop.f32.mrf.mxu0  ;;  %v481_v50 = vpop.f32.mrf.mxu1 }
 0x1a0   :  { %v4554_v52 = vadd.f32 %v3266_v48, %v487_v47  ;;  %v482_v53 = vadd.f32 %v481_v50, %v384_v49  ;;  %v3295_v47 = vld [vmem:[%s5443_s1 + $0x80] sm:$0xff]  ;;  %v3322_v49 = vld [vmem:[%s5408_s11 + $0x78] sm:$0xff] }
 0x1a2   :  { %v4556_v55 = vadd.f32 %v3266_v48, %v482_v53  ;;  %3792 = vmatprep.subr.mxu1 %v4554_v52 }
 0x1a3   :  { %3793 = vmatpush3.msra.mxu1 %v4554_v52 }
 0x1a4   :  { %3794 = vmatprep.subr.mxu1 %v4556_v55 }
 0x1a5   :  { %3795 = vmatpush3.msra.mxu1 %v4556_v55 }
 0x1a6   :  { %3796 = vmatprep.subr.mxu1 %v4560_v56 }
 0x1a7   :  { %3797 = vmatpush3.msra.mxu1 %v4560_v56 }
 0x1a8   :  { %3798 = vmatprep.subr.mxu1 %v4564_v57 }
 0x1a9   :  { %3799 = vmatpush3.msra.mxu1 %v4564_v57 }
 0x1aa   :  { %3801 = vmatmul.mubr.msk.f32.vlgmr.msra.gmra.mxu1 %vm529_vm2, %v4571_v58  ;;  %3806 = vmatprep.subr.mxu1 %v3278_v59 }
 0x1ab   :  { %3807 = vmatpush3.msra.mxu1 %v3278_v59  ;;  %3803 = vmatprep.mubr.msk.f32.mxu1 %vm529_vm2, %v4580_v60 }
 0x1ac   :  { %3808 = vmatprep.subr.mxu1 %v3277_v61 }
 0x1ad   :  { %3809 = vmatpush3.msra.mxu1 %v3277_v61  ;;  %v3321_v61 = vld [vmem:[%s5408_s11 + $0x70] sm:$0xff] }
 0x1ae   :  { %3804 = vmatmul.mubr.msk.f32.gmra.mxu1 %vm529_vm2, %v4593_v62  ;;  %3810 = vmatprep.subr.mxu1 %v3276_v63 }
 0x1af   :  { %3811 = vmatpush3.msra.mxu1 %v3276_v63  ;;  %3822 = vmatprep.mubr.msk.f32.mxu1 %vm295_vm1, %v4564_v57 }
 0x1b0   :  { %3812 = vmatprep.subr.mxu1 %v3275_v0 }
 0x1b1   :  { %3813 = vmatpush3.msra.mxu1 %v3275_v0  ;;  %v3320_v0 = vld [vmem:[%s5408_s11 + $0x68] sm:$0xff] }
 0x1b2   :  { %3814 = vmatprep.subr.mxu1 %v3274_v1 }
 0x1b3   :  { %3815 = vmatpush3.msra.mxu1 %v3274_v1 }
 0x1b4   :  { %3816 = vmatprep.subr.mxu1 %v3273_v2 }
 0x1b5   :  { %3817 = vmatpush3.msra.mxu1 %v3273_v2  ;;  %v3319_v2 = vld [vmem:[%s5408_s11 + $0x60] sm:$0xff] }
 0x1b6   :  { %3818 = vmatprep.subr.mxu1 %v3272_v3 }
 0x1b7   :  { %3819 = vmatpush3.msra.mxu1 %v3272_v3 }
 0x1b8   :  { %3820 = vmatprep.subr.mxu1 %v3271_v4 }
 0x1b9   :  { %3821 = vmatpush3.msra.mxu1 %v3271_v4  ;;  %v3318_v4 = vld [vmem:[%s5408_s11 + $0x58] sm:$0xff] }
 0x1ba   :  { %3823 = vmatmul.mubr.msk.f32.vlgmr.msra.gmra.mxu1 %vm295_vm1, %v4560_v56  ;;  %3850 = vmatprep.subr.mxu1 %v4554_v52 }
 0x1bb   :  { %3825 = vmatprep.mubr.msk.f32.mxu1 %vm295_vm1, %v4556_v55  ;;  %3851 = vmatpush3.msra.mxu1 %v4554_v52 }
 0x1bc   :  { %3852 = vmatprep.subr.mxu1 %v4556_v55 }
 0x1bd   :  { %3853 = vmatpush3.msra.mxu1 %v4556_v55 }
 0x1be   :  { %3826 = vmatmul.mubr.msk.f32.gmra.mxu1 %vm295_vm1, %v4554_v52  ;;  %3854 = vmatprep.subr.mxu1 %v4560_v56 }
 0x1bf   :  { %3855 = vmatpush3.msra.mxu1 %v4560_v56  ;;  %3858 = vmatprep.mubr.msk.f32.mxu1 %vm529_vm2, %v4645_v12 }
 0x1c0   :  { %3856 = vmatprep.subr.mxu1 %v4564_v57 }
 0x1c1   :  { %3857 = vmatpush3.msra.mxu1 %v4564_v57 }
 0x1c2   :  { %3859 = vmatmul.mubr.msk.f32.vlgmr.msra.gmra.mxu1 %vm529_vm2, %v4665_v18  ;;  %3886 = vmatprep.subr.mxu1 %v4657_v16 }
 0x1c3   :  { %3887 = vmatpush3.msra.mxu1 %v4657_v16  ;;  %3861 = vmatprep.mubr.msk.f32.mxu1 %vm529_vm2, %v4673_v20 }
 0x1c4   :  { %3888 = vmatprep.subr.mxu1 %v4668_v19 }
 0x1c5   :  { %3889 = vmatpush3.msra.mxu1 %v4668_v19 }
 0x1c6   :  { %3862 = vmatmul.mubr.msk.f32.gmra.mxu1 %vm529_vm2, %v4687_v23  ;;  %3890 = vmatprep.subr.mxu1 %v4679_v22 }
 0x1c7   :  { %3891 = vmatpush3.msra.mxu1 %v4679_v22  ;;  %3894 = vmatprep.mubr.msk.f32.mxu1 %vm529_vm2, %v4529_v34 }
 0x1c8   :  { %3892 = vmatprep.subr.mxu1 %v4690_v24 }
 0x1c9   :  { %3893 = vmatpush3.msra.mxu1 %v4690_v24 }
 0x1ca   :  { %3895 = vmatmul.mubr.msk.f32.vlgmr.msra.gmra.mxu1 %vm529_vm2, %v4571_v58  ;;  %3900 = vmatprep.subr.mxu1 %v1142_v28 }
 0x1cb   :  { %3897 = vmatprep.mubr.msk.f32.mxu1 %vm529_vm2, %v4580_v60  ;;  %3901 = vmatpush3.msra.mxu1 %v1142_v28 }
 0x1cc   :  { %3902 = vmatprep.subr.mxu1 %v1141_v29 }
 0x1cd   :  { %3903 = vmatpush3.msra.mxu1 %v1141_v29 }
 0x1ce   :  { %3898 = vmatmul.mubr.msk.f32.gmra.mxu1 %vm529_vm2, %v4593_v62  ;;  %3904 = vmatprep.subr.mxu1 %v1140_v30 }
 0x1cf   :  { %3905 = vmatpush3.msra.mxu1 %v1140_v30 }
 0x1d0   :  { %3906 = vmatprep.subr.mxu1 %v1139_v31 }
 0x1d1   :  { %3907 = vmatpush3.msra.mxu1 %v1139_v31  ;;  %v4310_v31 = vmov 0.0  }
 0x1d2   :  { %3908 = vmatprep.subr.mxu1 %v1138_v32 }
 0x1d3   :  { %3909 = vmatpush3.msra.mxu1 %v1138_v32  ;;  %v4869_v32 = vld [vmem:[%s5409_s9 + $0x38] sm:$0xff] }
 0x1d4   :  { %3910 = vmatprep.subr.mxu1 %v1137_v33 }
 0x1d5   :  { %3911 = vmatpush3.msra.mxu1 %v1137_v33  ;;  %v4878_v33 = vld [vmem:[%s5409_s9 + $0x30] sm:$0xff] }
 0x1d6   :  { %3912 = vmatprep.subr.mxu1 %v1136_v35 }
 0x1d7   :  { %3913 = vmatpush3.msra.mxu1 %v1136_v35  ;;  %v4887_v35 = vld [vmem:[%s5409_s9 + $0x28] sm:$0xff] }
 0x1d8   :  { %3914 = vmatprep.subr.mxu1 %v1135_v36 }
 0x1d9   :  { %3915 = vmatpush3.msra.mxu1 %v1135_v36  ;;  %v4896_v36 = vld [vmem:[%s5409_s9 + $0x20] sm:$0xff] }
 0x1da   :  { %3944 = vmatprep.subr.mxu1 %v4657_v16 }
 0x26a   :  { %v3802_v37 = vpop.f32.mrf.mxu1 }
 0x26c   :  { %v608_v38 = vpop.f32.mrf.mxu1 }
 0x26d   :  { %3844 = vmatprep.mubr.msk.f32.mxu0 %vm295_vm1, %v608_v38  ;;  %v4914_v38 = vld [vmem:[%s5409_s9 + $0x10] sm:$0xff] }
 0x26e   :  { %v3805_v40 = vpop.f32.mrf.mxu1  ;;  %3845 = vmatmul.mubr.msk.f32.vlgmr.msra.gmra.mxu0 %vm295_vm1, %v3802_v37  ;;  %v4905_v37 = vld [vmem:[%s5409_s9 + $0x18] sm:$0xff] }
 0x26f   :  { %3865 = vmatpush3.msra.mxu0 %v3302_v27 }
 0x270   :  { %v618_v42 = vpop.f32.mrf.mxu1  ;;  %3866 = vmatprep.subr.mxu0 %v3301_v39 }
 0x271   :  { %3847 = vmatprep.mubr.msk.f32.mxu0 %vm295_vm1, %v618_v42  ;;  %3867 = vmatpush3.msra.mxu0 %v3301_v39  ;;  %v4923_v39 = vld [vmem:[%s5409_s9 + $0x8] sm:$0xff] }
 0x272   :  { %3848 = vmatmul.mubr.msk.f32.gmra.mxu0 %vm295_vm1, %v3805_v40  ;;  %3868 = vmatprep.subr.mxu0 %v3300_v41  ;;  %v4932_v40 = vld [vmem:[%s5409_s9] sm:$0xff] }
 0x273   :  { %3869 = vmatpush3.msra.mxu0 %v3300_v41 }
 0x274   :  { %3870 = vmatprep.subr.mxu0 %v3299_v43 }
 0x275   :  { %3871 = vmatpush3.msra.mxu0 %v3299_v43 }
 0x276   :  { %3872 = vmatprep.subr.mxu0 %v3298_v44 }
 0x277   :  { %3873 = vmatpush3.msra.mxu0 %v3298_v44 }
 0x278   :  { %3874 = vmatprep.subr.mxu0 %v3297_v45 }
 0x279   :  { %3875 = vmatpush3.msra.mxu0 %v3297_v45 }
 0x27a   :  { %v4766_v48 = vpop.f32.mrf.mxu1  ;;  %3876 = vmatprep.subr.mxu0 %v3296_v46 }
 0x27b   :  { %3877 = vmatpush3.msra.mxu0 %v3296_v46 }
 0x27c   :  { %v4771_v50 = vpop.f32.mrf.mxu1  ;;  %3878 = vmatprep.subr.mxu0 %v3295_v47 }
 0x27d   :  { %3879 = vmatpush3.msra.mxu0 %v3295_v47 }
 0x27e   :  { %v4773_v51 = vpop.f32.mrf.mxu1  ;;  %3922 = vmatprep.subr.mxu0 %v3322_v49 }
 0x280   :  { %v4775_v53 = vpop.f32.mrf.mxu1 }
 0x282   :  { %v3860_v54 = vpop.f32.mrf.mxu1 }
 0x284   :  { %v921_v59 = vpop.f32.mrf.mxu1 }
 0x285   :  { %3880 = vmatprep.mubr.msk.f32.mxu0 %vm295_vm1, %v921_v59 }
 0x286   :  { %v3863_v63 = vpop.f32.mrf.mxu1  ;;  %3881 = vmatmul.mubr.msk.f32.vlgmr.msra.gmra.mxu0 %vm295_vm1, %v3860_v54 }
 0x287   :  { %3923 = vmatpush3.msra.mxu0 %v3322_v49 }
 0x288   :  { %3924 = vmatprep.subr.mxu0 %v3321_v61  ;;  %v931_v1 = vpop.f32.mrf.mxu1 }
 0x289   :  { %3925 = vmatpush3.msra.mxu0 %v3321_v61  ;;  %3883 = vmatprep.mubr.msk.f32.mxu0 %vm295_vm1, %v931_v1 }
 0x28a   :  { %3926 = vmatprep.subr.mxu0 %v3320_v0  ;;  %3884 = vmatmul.mubr.msk.f32.gmra.mxu0 %vm295_vm1, %v3863_v63  ;;  %v3896_v3 = vpop.f32.mrf.mxu1 }
 0x28b   :  { %3927 = vmatpush3.msra.mxu0 %v3320_v0  ;;  %3938 = vmatprep.mubr.msk.f32.mxu0 %vm295_vm1, %v4690_v24 }
 0x28c   :  { %3928 = vmatprep.subr.mxu0 %v3319_v2  ;;  %v1116_v5 = vpop.f32.mrf.mxu1 }
 0x28d   :  { %3929 = vmatpush3.msra.mxu0 %v3319_v2  ;;  %3916 = vmatprep.mubr.msk.f32.mxu1 %vm295_vm1, %v1116_v5 }
 0x28e   :  { %3930 = vmatprep.subr.mxu0 %v3318_v4  ;;  %v3899_v7 = vpop.f32.mrf.mxu1  ;;  %3917 = vmatmul.mubr.msk.f32.vlgmr.msra.gmra.mxu1 %vm295_vm1, %v3896_v3 }
 0x28f   :  { %3931 = vmatpush3.msra.mxu0 %v3318_v4  ;;  %3945 = vmatpush3.msra.mxu1 %v4657_v16 }
 0x290   :  { %3932 = vmatprep.subr.mxu0 %v3317_v6  ;;  %v1126_v9 = vpop.f32.mrf.mxu1  ;;  %3946 = vmatprep.subr.mxu1 %v4668_v19 }
 0x291   :  { %3933 = vmatpush3.msra.mxu0 %v3317_v6  ;;  %3919 = vmatprep.mubr.msk.f32.mxu1 %vm295_vm1, %v1126_v9 }
 0x292   :  { %3934 = vmatprep.subr.mxu0 %v3316_v8  ;;  %3947 = vmatpush3.msra.mxu1 %v4668_v19 }
 0x293   :  { %3920 = vmatmul.mubr.msk.f32.gmra.mxu1 %vm295_vm1, %v3899_v7  ;;  %3935 = vmatpush3.msra.mxu0 %v3316_v8 }
 0x294   :  { %3948 = vmatprep.subr.mxu1 %v4679_v22  ;;  %3936 = vmatprep.subr.mxu0 %v3315_v10 }
 0x295   :  { %3949 = vmatpush3.msra.mxu1 %v4679_v22  ;;  %3937 = vmatpush3.msra.mxu0 %v3315_v10 }
 0x296   :  { %3950 = vmatprep.subr.mxu1 %v4690_v24  ;;  %3939 = vmatmul.mubr.msk.f32.vlgmr.msra.gmra.mxu0 %vm295_vm1, %v4679_v22 }
 0x297   :  { %3951 = vmatpush3.msra.mxu1 %v4690_v24  ;;  %3952 = vmatprep.mubr.msk.f32.mxu1 %vm529_vm2, %v4645_v12 }
 0x298   :  { %3953 = vmatmul.mubr.msk.f32.vlgmr.msra.gmra.mxu1 %vm529_vm2, %v4665_v18  ;;  %3941 = vmatprep.mubr.msk.f32.mxu0 %vm295_vm1, %v4668_v19  ;;  %v3332_v19 = vld [vmem:[%s5408_s11 + $0x88] sm:$0xff] }
 0x299   :  { %3955 = vmatprep.mubr.msk.f32.mxu1 %vm529_vm2, %v4673_v20  ;;  %3958 = vmatprep.subr.mxu0 %v3338_v11 }
 0x29a   :  { %3942 = vmatmul.mubr.msk.f32.gmra.mxu0 %vm295_vm1, %v4657_v16  ;;  %v3334_v16 = vld [vmem:[%s5408_s11 + $0x98] sm:$0xff]  ;;  %3980 = vmatprep.subr.mxu1 %v4310_v31 }
 0x29b   :  { %3959 = vmatpush3.msra.mxu0 %v3338_v11  ;;  %3981 = vmatpush3.msra.mxu1 %v4869_v32 }
 0x29c   :  { %3956 = vmatmul.mubr.msk.f32.gmra.mxu1 %vm529_vm2, %v4687_v23  ;;  %3960 = vmatprep.subr.mxu0 %v3337_v13 }
 0x29d   :  { %3961 = vmatpush3.msra.mxu0 %v3337_v13  ;;  %3982 = vmatprep.subr.mxu1 %v4310_v31 }
 0x29e   :  { %3962 = vmatprep.subr.mxu0 %v3336_v14  ;;  %3983 = vmatpush3.msra.mxu1 %v4878_v33 }
 0x29f   :  { %3963 = vmatpush3.msra.mxu0 %v3336_v14  ;;  %3984 = vmatprep.subr.mxu1 %v4310_v31 }
 0x2a0   :  { %3964 = vmatprep.subr.mxu0 %v3335_v15  ;;  %3985 = vmatpush3.msra.mxu1 %v4887_v35 }
 0x2a1   :  { %3965 = vmatpush3.msra.mxu0 %v3335_v15  ;;  %3986 = vmatprep.subr.mxu1 %v4310_v31 }
 0x2a2   :  { %3966 = vmatprep.subr.mxu0 %v3334_v16  ;;  %3987 = vmatpush3.msra.mxu1 %v4896_v36 }
 0x2a3   :  { %3967 = vmatpush3.msra.mxu0 %v3334_v16  ;;  %3988 = vmatprep.subr.mxu1 %v4310_v31 }
 0x2a4   :  { %3968 = vmatprep.subr.mxu0 %v3333_v17  ;;  %3989 = vmatpush3.msra.mxu1 %v4905_v37 }
 0x2a5   :  { %3969 = vmatpush3.msra.mxu0 %v3333_v17  ;;  %3990 = vmatprep.subr.mxu1 %v4310_v31 }
 0x2a6   :  { %3970 = vmatprep.subr.mxu0 %v3332_v19  ;;  %3991 = vmatpush3.msra.mxu1 %v4914_v38 }
 0x2a7   :  { %3971 = vmatpush3.msra.mxu0 %v3332_v19  ;;  %3992 = vmatprep.subr.mxu1 %v4310_v31 }
 0x2a8   :  { %3972 = vmatprep.subr.mxu0 %v3331_v21  ;;  %3993 = vmatpush3.msra.mxu1 %v4923_v39 }
 0x2a9   :  { %3973 = vmatpush3.msra.mxu0 %v3331_v21  ;;  %3994 = vmatprep.subr.mxu1 %v4310_v31 }
 0x2aa   :  { %3999 = vmatprep.subr.mxu0 %v4310_v31  ;;  %3995 = vmatpush3.msra.mxu1 %v4932_v40 }
 0x2ab   :  { %3996 = vmatprep.mubr.msk.f32.mxu1 %vm4311_vm3, %v4310_v31 }
 0x32e   :  { %v3846_v41 = vpop.f32.mrf.mxu0 }
 0x32f   :  { %v825_v61 = vadd.f32 %v3846_v41, %v4766_v48 }
 0x330   :  { %v819_v42 = vpop.f32.mrf.mxu0 }
 0x331   :  { %v820_v0 = vadd.f32 %v819_v42, %v4771_v50  ;;  %v3343_v50 = vld [vmem:[%s5410_s12] ss:$0 sm:$0xff] }
 0x332   :  { %v3849_v43 = vpop.f32.mrf.mxu0 }
 0x333   :  { %v835_v2 = vadd.f32 %v3849_v43, %v4773_v51 }
 0x334   :  { %v829_v44 = vpop.f32.mrf.mxu0 }
 0x335   :  { %v830_v9 = vadd.f32 %v829_v44, %v4775_v53 }
 0x346   :  { %v3882_v45 = vpop.f32.mrf.mxu0 }
 0x347   :  { %v1047_v1 = vadd.f32 %v3882_v45, %v825_v61 }
 0x348   :  { %v1027_v46 = vpop.f32.mrf.mxu0 }
 0x349   :  { %v1046_v3 = vadd.f32 %v1027_v46, %v820_v0 }
 0x34a   :  { %v3885_v47 = vpop.f32.mrf.mxu0 }
 0x34b   :  { %v1049_v6 = vadd.f32 %v3885_v47, %v835_v2 }
 0x34c   :  { %v1037_v49 = vpop.f32.mrf.mxu0 }
 0x34d   :  { %v1048_v51 = vadd.f32 %v1037_v49, %v830_v9 }
 0x34e   :  { %v4853_v22 = vpop.f32.mrf.mxu1 }
 0x34f   :  { %v1241_v4 = vadd.f32 %v4853_v22, %v1047_v1 }
 0x350   :  { %v4855_v24 = vpop.f32.mrf.mxu1 }
 0x351   :  { %v1240_v7 = vadd.f32 %v4855_v24, %v1046_v3 }
 0x353   :  { %v4857_v25 = vpop.f32.mrf.mxu1 }
 0x354   :  { %v1243_v11 = vadd.f32 %v4857_v25, %v1049_v6 }
 0x355   :  { %v4859_v26 = vpop.f32.mrf.mxu1 }
 0x356   :  { %v3940_v54 = vpop.f32.mrf.mxu0  ;;  %v1242_v17 = vadd.f32 %v4859_v26, %v1048_v51 }
 0x357   :  { %v1351_v8 = vadd.f32 %v3940_v54, %v1241_v4 }
 0x358   :  { %v3954_v27 = vpop.f32.mrf.mxu1  ;;  %v1331_v59 = vpop.f32.mrf.mxu0 }
 0x359   :  { %v1350_v48 = vadd.f32 %v1331_v59, %v1240_v7 }
 0x35a   :  { %v1420_v28 = vpop.f32.mrf.mxu1  ;;  %v3943_v63 = vpop.f32.mrf.mxu0 }
 0x35b   :  { %3974 = vmatprep.mubr.msk.f32.mxu0 %vm295_vm1, %v1420_v28  ;;  %v1353_v15 = vadd.f32 %v3943_v63, %v1243_v11 }
 0x35c   :  { %v3957_v29 = vpop.f32.mrf.mxu1  ;;  %3975 = vmatmul.mubr.msk.f32.vlgmr.msra.gmra.mxu0 %vm295_vm1, %v3954_v27  ;;  %v1341_v5 = vpop.f32.mrf.mxu0 }
 0x35d   :  { %4000 = vmatpush3.msra.mxu0 %v4869_v32  ;;  %v1352_v24 = vadd.f32 %v1341_v5, %v1242_v17  ;;  %v1870_v17 = vld [vmem:[%s5411_s15 + $0x18] sm:$0xff] }
 0x35e   :  { %v1430_v30 = vpop.f32.mrf.mxu1  ;;  %4001 = vmatprep.subr.mxu0 %v4310_v31 }
 0x35f   :  { %3977 = vmatprep.mubr.msk.f32.mxu0 %vm295_vm1, %v1430_v30  ;;  %4002 = vmatpush3.msra.mxu0 %v4878_v33 }
 0x360   :  { %3978 = vmatmul.mubr.msk.f32.gmra.mxu0 %vm295_vm1, %v3957_v29  ;;  %4003 = vmatprep.subr.mxu0 %v4310_v31 }
 0x361   :  { %4004 = vmatpush3.msra.mxu0 %v4887_v35  ;;  %4015 = vmatprep.mubr.msk.f32.mxu0 %vm4311_vm3, %v4310_v31 }
 0x362   :  { %4005 = vmatprep.subr.mxu0 %v4310_v31 }
 0x363   :  { %4006 = vmatpush3.msra.mxu0 %v4896_v36 }
 0x364   :  { %4007 = vmatprep.subr.mxu0 %v4310_v31 }
 0x365   :  { %4008 = vmatpush3.msra.mxu0 %v4905_v37 }
 0x366   :  { %4009 = vmatprep.subr.mxu0 %v4310_v31 }
 0x367   :  { %4010 = vmatpush3.msra.mxu0 %v4914_v38 }
 0x368   :  { %4011 = vmatprep.subr.mxu0 %v4310_v31 }
 0x369   :  { %4012 = vmatpush3.msra.mxu0 %v4923_v39 }
 0x36a   :  { %4013 = vmatprep.subr.mxu0 %v4310_v31 }
 0x36b   :  { %4014 = vmatpush3.msra.mxu0 %v4932_v40 }
 0x41c   :  { %v3976_v10 = vpop.f32.mrf.mxu0 }
 0x41d   :  { %v1546_v13 = vadd.f32 %v3976_v10, %v1351_v8 }
 0x41e   :  { %v1526_v14 = vpop.f32.mrf.mxu0 }
 0x41f   :  { %v1545_v16 = vadd.f32 %v1526_v14, %v1350_v48  ;;  %v4952_v19 = vadd.f32 %v3343_v50, %v1546_v13  ;;  %v1874_v14 = vld [vmem:[%s5411_s15 + $0x38] sm:$0xff] }
 0x420   :  { %v3979_v21 = vpop.f32.mrf.mxu0  ;;  %4054 = vmatprep.subr.mxu0 %v1874_v14 }
 0x421   :  { %v4954_v22 = vadd.f32 %v3343_v50, %v1545_v16  ;;  %v1548_v53 = vadd.f32 %v3979_v21, %v1353_v15  ;;  %v1574_v28 = vmul.f32 %v4952_v19, %v4952_v19  ;;  %v1561_v41 = vsel %vm295_vm1, %v4952_v19, 0.0  ;;  %v1873_v15 = vld [vmem:[%s5411_s15 + $0x30] sm:$0xff]  ;;  %v1872_v16 = vld [vmem:[%s5411_s15 + $0x28] sm:$0xff] }
 0x422   :  { %v1536_v25 = vpop.f32.mrf.mxu0  ;;  %v1869_v21 = vld [vmem:[%s5411_s15 + $0x10] sm:$0xff] }
 0x423   :  { %v1573_v27 = vmul.f32 %v4954_v22, %v4954_v22  ;;  %v1560_v29 = vsel %vm295_vm1, %v4954_v22, 0.0  ;;  %v4962_v30 = vadd.f32 %v3343_v50, %v1548_v53  ;;  %v1547_v26 = vadd.f32 %v1536_v25, %v1352_v24 }
 0x424   :  { %v1562_v44 = vadd.f32 %v1561_v41, %v1560_v29  ;;  %v1578_v45 = vsel %vm295_vm1, %v1574_v28, 0.0 }
 0x425   :  { %v1577_v42 = vsel %vm295_vm1, %v1573_v27, 0.0  ;;  %v4967_v43 = vadd.f32 %v3343_v50, %v1547_v26  ;;  %v1576_v46 = vmul.f32 %v4962_v30, %v4962_v30  ;;  %v1565_v61 = vsel %vm295_vm1, %v4962_v30, 0.0 }
 0x426   :  { %v1579_v54 = vadd.f32 %v1578_v45, %v1577_v42  ;;  %v1738_v26 = vlaneseq }
 0x427   :  { %v1563_v47 = vsel %vm295_vm1, %v4967_v43, 0.0  ;;  %v1575_v49 = vmul.f32 %v4967_v43, %v4967_v43  ;;  %v1582_v2 = vsel %vm295_vm1, %v1576_v46, 0.0 }
 0x428   :  { %v1564_v59 = vadd.f32 %v1563_v47, %v1562_v44  ;;  %v1739_v42 = vshrl.u32 %v1738_v26, 7 }
 0x429   :  { %v1580_v63 = vsel %vm295_vm1, %v1575_v49, 0.0 }
 0x42a   :  { %v1566_v0 = vadd.f32 %v1565_v61, %v1564_v59  ;;  %v1581_v1 = vadd.f32 %v1580_v63, %v1579_v54  ;;  %v5002_v44 = vsub.s32 0, %v1739_v42  ;;  %v3346_v63 = vld [vmem:[%s5412_s13] ss:$0 sm:$0xff] }
 0x42c   :  { %v1567_v3 = vrot.slane %v1566_v0, 4  ;;  %v1583_v4 = vadd.f32 %v1582_v2, %v1581_v1 }
 0x42e   :  { %v1568_v5 = vadd.f32 %v1567_v3, %v1566_v0  ;;  %v1584_v6 = vrot.slane %v1583_v4, 4 }
 0x430   :  { %v1569_v7 = vrot.slane %v1568_v5, 2  ;;  %v1585_v8 = vadd.f32 %v1584_v6, %v1583_v4 }
 0x432   :  { %v1570_v9 = vadd.f32 %v1569_v7, %v1568_v5  ;;  %v1586_v10 = vrot.slane %v1585_v8, 2 }
 0x434   :  { %v1571_v11 = vrot.slane %v1570_v9, 1  ;;  %v1587_v48 = vadd.f32 %v1586_v10, %v1585_v8 }
 0x436   :  { %v1572_v13 = vadd.f32 %v1571_v11, %v1570_v9  ;;  %v1588_v50 = vrot.slane %v1587_v48, 1 }
 0x438   :  { %3997 = vmatmul.mubr.msk.f32.vlgmr.msra.gmra.mxu1 %vm295_vm1, %v1572_v13  ;;  %v1589_v51 = vadd.f32 %v1588_v50, %v1587_v48  ;;  %v3359_v13 = vld [vmem:[%s5411_s15 + $0x78] sm:$0xff]  ;;  %v3358_v50 = vld [vmem:[%s5411_s15 + $0x70] sm:$0xff] }
 0x439   :  { %4026 = vmatprep.mubr.msk.f32.mxu1 %vm529_vm2, %v4529_v34  ;;  %v1871_v34 = vld [vmem:[%s5411_s15 + $0x20] sm:$0xff] }
 0x43a   :  { %4016 = vmatmul.mubr.msk.f32.vlgmr.msra.gmra.mxu0 %vm295_vm1, %v1589_v51  ;;  %v3357_v51 = vld [vmem:[%s5411_s15 + $0x68] sm:$0xff] }
 0x43b   :  { %4055 = vmatpush3.msra.mxu0 %v1874_v14  ;;  %v3356_v14 = vld [vmem:[%s5411_s15 + $0x60] sm:$0xff] }
 0x43c   :  { %4056 = vmatprep.subr.mxu0 %v1873_v15 }
 0x43d   :  { %4057 = vmatpush3.msra.mxu0 %v1873_v15  ;;  %v3352_v15 = vld [vmem:[%s5411_s15 + $0x40] sm:$0xff] }
 0x43e   :  { %4058 = vmatprep.subr.mxu0 %v1872_v16 }
 0x43f   :  { %4059 = vmatpush3.msra.mxu0 %v1872_v16 }
 0x440   :  { %4060 = vmatprep.subr.mxu0 %v1871_v34 }
 0x441   :  { %4061 = vmatpush3.msra.mxu0 %v1871_v34  ;;  %v3378_v34 = vld [vmem:[%s5411_s15 + $0xb0] sm:$0xff] }
 0x442   :  { %4062 = vmatprep.subr.mxu0 %v1870_v17 }
 0x443   :  { %4063 = vmatpush3.msra.mxu0 %v1870_v17 }
 0x444   :  { %4064 = vmatprep.subr.mxu0 %v1869_v21 }
 0x445   :  { %4065 = vmatpush3.msra.mxu0 %v1869_v21  ;;  %v3377_v21 = vld [vmem:[%s5411_s15 + $0xa8] sm:$0xff] }
 0x4f8   :  { %v1659_v53 = vpop.f32.mrf.mxu1 }
 0x4f9   :  { %v1736_v24 = vmul.f32 %v1659_v53, %v1659_v53  ;;  %v1741_v45 = vrot.slane %v1659_v53, %v5002_v44 }
 0x4fa   :  { %v3998_v25 = vpop.f32.mrf.mxu1  ;;  %v1732_v27 = vpop.f32.mrf.mxu0 }
 0x4fb   :  { %v1737_v28 = vsub.f32 %v1732_v27, %v1736_v24  ;;  %v1742_v47 = vsub.f32 %v4954_v22, %v1741_v45  ;;  %v1743_v49 = vsub.f32 %v4952_v19, %v1741_v45  ;;  %v1744_v54 = vsub.f32 %v4967_v43, %v1741_v45  ;;  %v3347_v22 = vld [vmem:[%s5413_s14] ss:$0 sm:$0xff]  ;;  %v3375_v25 = vld [vmem:[%s5411_s15 + $0x98] sm:$0xff]  ;;  %v3374_v27 = vld [vmem:[%s5411_s15 + $0x90] sm:$0xff] }
 0x4fc   :  { %v4017_v29 = vpop.f32.mrf.mxu0  ;;  %v1745_v59 = vsub.f32 %v4962_v30, %v1741_v45  ;;  %v3376_v24 = vld [vmem:[%s5411_s15 + $0xa0] sm:$0xff] }
 0x4fd   :  { %v1746_v41 = vadd.f32 1e-05, %v1737_v28  ;;  %v3373_v28 = vld [vmem:[%s5411_s15 + $0x88] sm:$0xff]  ;;  %v3372_v29 = vld [vmem:[%s5411_s15 + $0x80] sm:$0xff] }
 0x4ff   :  { %4284 = vrsqrt.f32 %v1746_v41 }
 0x50c   :  { %v4285_v46 = vpop.eup %4284 }
 0x50d   :  { %v1751_v61 = vrot.slane %v4285_v46, %v5002_v44 }
 0x50f   :  { %v1755_v0 = vmul.f32 %v1751_v61, %v1745_v59  ;;  %v1754_v1 = vmul.f32 %v1751_v61, %v1744_v54  ;;  %v1753_v2 = vmul.f32 %v1751_v61, %v1743_v49  ;;  %v1752_v3 = vmul.f32 %v1751_v61, %v1742_v47 }
 0x511   :  { %v1766_v4 = vmul.f32 %v3346_v63, %v1755_v0  ;;  %v1765_v19 = vmul.f32 %v3346_v63, %v1754_v1  ;;  %v1764_v5 = vmul.f32 %v3346_v63, %v1753_v2  ;;  %v1763_v30 = vmul.f32 %v3346_v63, %v1752_v3 }
 0x513   :  { %v1777_v43 = vadd.f32 %v3347_v22, %v1766_v4  ;;  %v1776_v6 = vadd.f32 %v3347_v22, %v1765_v19  ;;  %v1775_v8 = vadd.f32 %v3347_v22, %v1764_v5  ;;  %v1774_v10 = vadd.f32 %v3347_v22, %v1763_v30  ;;  %v3384_v4 = vld [vmem:[%s5414_s16] ss:$0 sm:$0xff] }
 0x515   :  { %v1781_v7 = vmax.f32 %v1777_v43, 0.0  ;;  %v1780_v9 = vmax.f32 %v1776_v6, 0.0  ;;  %v1779_v11 = vmax.f32 %v1775_v8, 0.0  ;;  %v1778_v48 = vmax.f32 %v1774_v10, 0.0 }
 0x517   :  { %4018 = vmatprep.subr.mxu1 %v1781_v7 }
 0x518   :  { %4019 = vmatpush3.msra.mxu1 %v1781_v7 }
 0x519   :  { %4020 = vmatprep.subr.mxu1 %v1780_v9 }
 0x51a   :  { %4021 = vmatpush3.msra.mxu1 %v1780_v9 }
 0x51b   :  { %4022 = vmatprep.subr.mxu1 %v1779_v11 }
 0x51c   :  { %4023 = vmatpush3.msra.mxu1 %v1779_v11 }
 0x51d   :  { %4024 = vmatprep.subr.mxu1 %v1778_v48 }
 0x51e   :  { %4025 = vmatpush3.msra.mxu1 %v1778_v48 }
 0x51f   :  { %4027 = vmatmul.mubr.msk.f32.vlgmr.msra.gmra.mxu1 %vm529_vm2, %v4571_v58  ;;  %4032 = vmatprep.subr.mxu1 %v3359_v13  ;;  %v3355_v58 = vld [vmem:[%s5411_s15 + $0x58] sm:$0xff] }
 0x520   :  { %4033 = vmatpush3.msra.mxu1 %v3359_v13  ;;  %4029 = vmatprep.mubr.msk.f32.mxu1 %vm529_vm2, %v4580_v60  ;;  %v3354_v60 = vld [vmem:[%s5411_s15 + $0x50] sm:$0xff] }
 0x521   :  { %4034 = vmatprep.subr.mxu1 %v3358_v50 }
 0x522   :  { %4035 = vmatpush3.msra.mxu1 %v3358_v50 }
 0x523   :  { %4030 = vmatmul.mubr.msk.f32.gmra.mxu1 %vm529_vm2, %v4593_v62  ;;  %4036 = vmatprep.subr.mxu1 %v3357_v51  ;;  %v3353_v62 = vld [vmem:[%s5411_s15 + $0x48] sm:$0xff] }
 0x524   :  { %4037 = vmatpush3.msra.mxu1 %v3357_v51  ;;  %4048 = vmatprep.mubr.msk.f32.mxu1 %vm295_vm1, %v1778_v48 }
 0x525   :  { %4038 = vmatprep.subr.mxu1 %v3356_v14 }
 0x526   :  { %4039 = vmatpush3.msra.mxu1 %v3356_v14 }
 0x527   :  { %4040 = vmatprep.subr.mxu1 %v3355_v58 }
 0x528   :  { %4041 = vmatpush3.msra.mxu1 %v3355_v58 }
 0x529   :  { %4042 = vmatprep.subr.mxu1 %v3354_v60 }
 0x52a   :  { %4043 = vmatpush3.msra.mxu1 %v3354_v60 }
 0x52b   :  { %4044 = vmatprep.subr.mxu1 %v3353_v62 }
 0x52c   :  { %4045 = vmatpush3.msra.mxu1 %v3353_v62 }
 0x52d   :  { %4046 = vmatprep.subr.mxu1 %v3352_v15 }
 0x52e   :  { %4047 = vmatpush3.msra.mxu1 %v3352_v15 }
 0x52f   :  { %4049 = vmatmul.mubr.msk.f32.vlgmr.msra.gmra.mxu1 %vm295_vm1, %v1779_v11  ;;  %4076 = vmatprep.subr.mxu1 %v1781_v7 }
 0x530   :  { %4051 = vmatprep.mubr.msk.f32.mxu1 %vm295_vm1, %v1780_v9  ;;  %4077 = vmatpush3.msra.mxu1 %v1781_v7 }
 0x531   :  { %4078 = vmatprep.subr.mxu1 %v1780_v9 }
 0x532   :  { %4079 = vmatpush3.msra.mxu1 %v1780_v9 }
 0x533   :  { %4052 = vmatmul.mubr.msk.f32.gmra.mxu1 %vm295_vm1, %v1781_v7  ;;  %4080 = vmatprep.subr.mxu1 %v1779_v11 }
 0x534   :  { %4081 = vmatpush3.msra.mxu1 %v1779_v11  ;;  %4084 = vmatprep.mubr.msk.f32.mxu1 %vm529_vm2, %v4645_v12  ;;  %v1868_v12 = vld [vmem:[%s5411_s15 + $0x8] sm:$0xff] }
 0x535   :  { %4082 = vmatprep.subr.mxu1 %v1778_v48  ;;  %4066 = vmatprep.subr.mxu0 %v1868_v12 }
 0x536   :  { %4083 = vmatpush3.msra.mxu1 %v1778_v48  ;;  %4067 = vmatpush3.msra.mxu0 %v1868_v12 }
 0x537   :  { %4085 = vmatmul.mubr.msk.f32.vlgmr.msra.gmra.mxu1 %vm529_vm2, %v4665_v18  ;;  %4112 = vmatprep.subr.mxu1 %v4310_v31  ;;  %v1867_v18 = vld [vmem:[%s5411_s15] sm:$0xff] }
 0x538   :  { %4087 = vmatprep.mubr.msk.f32.mxu1 %vm529_vm2, %v4673_v20  ;;  %4113 = vmatpush3.msra.mxu1 %v4869_v32  ;;  %v3379_v20 = vld [vmem:[%s5411_s15 + $0xb8] sm:$0xff] }
 0x539   :  { %4114 = vmatprep.subr.mxu1 %v4310_v31  ;;  %4068 = vmatprep.subr.mxu0 %v1867_v18 }
 0x53a   :  { %4115 = vmatpush3.msra.mxu1 %v4878_v33  ;;  %4069 = vmatpush3.msra.mxu0 %v1867_v18 }
 0x53b   :  { %4088 = vmatmul.mubr.msk.f32.gmra.mxu1 %vm529_vm2, %v4687_v23  ;;  %4116 = vmatprep.subr.mxu1 %v4310_v31 }
 0x53c   :  { %4117 = vmatpush3.msra.mxu1 %v4887_v35  ;;  %4128 = vmatprep.mubr.msk.f32.mxu1 %vm4311_vm3, %v4310_v31 }
 0x53d   :  { %4118 = vmatprep.subr.mxu1 %v4310_v31  ;;  %4090 = vmatprep.subr.mxu0 %v3379_v20 }
 0x53e   :  { %4119 = vmatpush3.msra.mxu1 %v4896_v36 }
 0x53f   :  { %4120 = vmatprep.subr.mxu1 %v4310_v31 }
 0x540   :  { %4121 = vmatpush3.msra.mxu1 %v4905_v37 }
 0x541   :  { %4122 = vmatprep.subr.mxu1 %v4310_v31 }
 0x542   :  { %4123 = vmatpush3.msra.mxu1 %v4914_v38 }
 0x543   :  { %4124 = vmatprep.subr.mxu1 %v4310_v31 }
 0x544   :  { %4125 = vmatpush3.msra.mxu1 %v4923_v39 }
 0x545   :  { %4126 = vmatprep.subr.mxu1 %v4310_v31 }
 0x546   :  { %4127 = vmatpush3.msra.mxu1 %v4932_v40 }
 0x5df   :  { %v4028_v23 = vpop.f32.mrf.mxu1 }
 0x5e1   :  { %v1848_v16 = vpop.f32.mrf.mxu1 }
 0x5e2   :  { %4070 = vmatprep.mubr.msk.f32.mxu0 %vm295_vm1, %v1848_v16 }
 0x5e3   :  { %v4031_v17 = vpop.f32.mrf.mxu1  ;;  %4071 = vmatmul.mubr.msk.f32.vlgmr.msra.gmra.mxu0 %vm295_vm1, %v4028_v23 }
 0x5e4   :  { %4091 = vmatpush3.msra.mxu0 %v3379_v20 }
 0x5e5   :  { %v1858_v53 = vpop.f32.mrf.mxu1  ;;  %4092 = vmatprep.subr.mxu0 %v3378_v34 }
 0x5e6   :  { %4073 = vmatprep.mubr.msk.f32.mxu0 %vm295_vm1, %v1858_v53  ;;  %4093 = vmatpush3.msra.mxu0 %v3378_v34 }
 0x5e7   :  { %4074 = vmatmul.mubr.msk.f32.gmra.mxu0 %vm295_vm1, %v4031_v17  ;;  %4094 = vmatprep.subr.mxu0 %v3377_v21 }
 0x5e8   :  { %4095 = vmatpush3.msra.mxu0 %v3377_v21 }
 0x5e9   :  { %4096 = vmatprep.subr.mxu0 %v3376_v24 }
 0x5ea   :  { %4097 = vmatpush3.msra.mxu0 %v3376_v24 }
 0x5eb   :  { %4098 = vmatprep.subr.mxu0 %v3375_v25 }
 0x5ec   :  { %4099 = vmatpush3.msra.mxu0 %v3375_v25 }
 0x5ed   :  { %4100 = vmatprep.subr.mxu0 %v3374_v27 }
 0x5ee   :  { %4101 = vmatpush3.msra.mxu0 %v3374_v27 }
 0x5ef   :  { %v4050_v26 = vpop.f32.mrf.mxu1  ;;  %4102 = vmatprep.subr.mxu0 %v3373_v28 }
 0x5f0   :  { %4103 = vmatpush3.msra.mxu0 %v3373_v28 }
 0x5f1   :  { %v1962_v41 = vpop.f32.mrf.mxu1  ;;  %4104 = vmatprep.subr.mxu0 %v3372_v29 }
 0x5f2   :  { %4105 = vmatpush3.msra.mxu0 %v3372_v29 }
 0x5f3   :  { %v4053_v42 = vpop.f32.mrf.mxu1  ;;  %4131 = vmatprep.subr.mxu0 %v4310_v31 }
 0x5f5   :  { %v1972_v45 = vpop.f32.mrf.mxu1 }
 0x5f7   :  { %v4086_v46 = vpop.f32.mrf.mxu1 }
 0x5f9   :  { %v2144_v47 = vpop.f32.mrf.mxu1 }
 0x5fa   :  { %4106 = vmatprep.mubr.msk.f32.mxu0 %vm295_vm1, %v2144_v47 }
 0x5fb   :  { %v4089_v49 = vpop.f32.mrf.mxu1  ;;  %4107 = vmatmul.mubr.msk.f32.vlgmr.msra.gmra.mxu0 %vm295_vm1, %v4086_v46 }
 0x5fc   :  { %4132 = vmatpush3.msra.mxu0 %v4869_v32 }
 0x5fd   :  { %v2154_v54 = vpop.f32.mrf.mxu1  ;;  %4133 = vmatprep.subr.mxu0 %v4310_v31 }
 0x5fe   :  { %4109 = vmatprep.mubr.msk.f32.mxu0 %vm295_vm1, %v2154_v54  ;;  %4134 = vmatpush3.msra.mxu0 %v4878_v33 }
 0x5ff   :  { %4110 = vmatmul.mubr.msk.f32.gmra.mxu0 %vm295_vm1, %v4089_v49  ;;  %4135 = vmatprep.subr.mxu0 %v4310_v31 }
 0x600   :  { %4136 = vmatpush3.msra.mxu0 %v4887_v35  ;;  %4147 = vmatprep.mubr.msk.f32.mxu0 %vm4311_vm3, %v4310_v31 }
 0x601   :  { %4137 = vmatprep.subr.mxu0 %v4310_v31 }
 0x602   :  { %4138 = vmatpush3.msra.mxu0 %v4896_v36 }
 0x603   :  { %4139 = vmatprep.subr.mxu0 %v4310_v31 }
 0x604   :  { %4140 = vmatpush3.msra.mxu0 %v4905_v37 }
 0x605   :  { %4141 = vmatprep.subr.mxu0 %v4310_v31 }
 0x606   :  { %4142 = vmatpush3.msra.mxu0 %v4914_v38 }
 0x607   :  { %4143 = vmatprep.subr.mxu0 %v4310_v31 }
 0x608   :  { %4144 = vmatpush3.msra.mxu0 %v4923_v39 }
 0x609   :  { %4145 = vmatprep.subr.mxu0 %v4310_v31 }
 0x60a   :  { %4146 = vmatpush3.msra.mxu0 %v4932_v40 }
 0x6a3   :  { %v4072_v59 = vpop.f32.mrf.mxu0 }
 0x6a4   :  { %v2065_v1 = vadd.f32 %v4072_v59, %v4050_v26 }
 0x6a5   :  { %v2059_v61 = vpop.f32.mrf.mxu0 }
 0x6a6   :  { %v2060_v3 = vadd.f32 %v2059_v61, %v1962_v41  ;;  %v4290_v61 = vld [vmem:[%s5442_s25] sm:$0xff] }
 0x6a7   :  { %v4075_v63 = vpop.f32.mrf.mxu0 }
 0x6a8   :  { %v2075_v5 = vadd.f32 %v4075_v63, %v4053_v42  ;;  %v2598_v63 = vld [vmem:[%s5415_s19 + $0x38] sm:$0xff] }
 0x6a9   :  { %v2069_v0 = vpop.f32.mrf.mxu0  ;;  %4186 = vmatprep.subr.mxu0 %v2598_v63 }
 0x6aa   :  { %v2070_v9 = vadd.f32 %v2069_v0, %v1972_v45  ;;  %v2597_v0 = vld [vmem:[%s5415_s19 + $0x30] sm:$0xff] }
 0x6bb   :  { %v4108_v2 = vpop.f32.mrf.mxu0 }
 0x6bc   :  { %v2270_v22 = vadd.f32 %v4108_v2, %v2065_v1  ;;  %v2596_v1 = vld [vmem:[%s5415_s19 + $0x28] sm:$0xff]  ;;  %v2595_v2 = vld [vmem:[%s5415_s19 + $0x20] sm:$0xff] }
 0x6bd   :  { %v2250_v19 = vpop.f32.mrf.mxu0 }
 0x6be   :  { %v2269_v43 = vadd.f32 %v2250_v19, %v2060_v3  ;;  %v5135_v6 = vadd.f32 %v3384_v4, %v2270_v22  ;;  %v2594_v3 = vld [vmem:[%s5415_s19 + $0x18] sm:$0xff]  ;;  %v2593_v22 = vld [vmem:[%s5415_s19 + $0x10] sm:$0xff] }
 0x6bf   :  { %v4111_v30 = vpop.f32.mrf.mxu0 }
 0x6c0   :  { %v5137_v7 = vadd.f32 %v3384_v4, %v2269_v43  ;;  %v2272_v8 = vadd.f32 %v4111_v30, %v2075_v5  ;;  %v2298_v48 = vmul.f32 %v5135_v6, %v5135_v6  ;;  %v2285_v14 = vsel %vm295_vm1, %v5135_v6, 0.0 }
 0x6c1   :  { %v2260_v10 = vpop.f32.mrf.mxu0 }
 0x6c2   :  { %v2297_v11 = vmul.f32 %v5137_v7, %v5137_v7  ;;  %v2284_v13 = vsel %vm295_vm1, %v5137_v7, 0.0  ;;  %v5145_v50 = vadd.f32 %v3384_v4, %v2272_v8  ;;  %v2271_v51 = vadd.f32 %v2260_v10, %v2070_v9 }
 0x6c3   :  { %v2286_v62 = vadd.f32 %v2285_v14, %v2284_v13  ;;  %v2302_v15 = vsel %vm295_vm1, %v2298_v48, 0.0 }
 0x6c4   :  { %v2301_v58 = vsel %vm295_vm1, %v2297_v11, 0.0  ;;  %v5150_v60 = vadd.f32 %v3384_v4, %v2271_v51  ;;  %v2300_v12 = vmul.f32 %v5145_v50, %v5145_v50  ;;  %v2289_v34 = vsel %vm295_vm1, %v5145_v50, 0.0 }
 0x6c5   :  { %v2303_v23 = vadd.f32 %v2302_v15, %v2301_v58 }
 0x6c6   :  { %v2287_v18 = vsel %vm295_vm1, %v5150_v60, 0.0  ;;  %v2299_v20 = vmul.f32 %v5150_v60, %v5150_v60  ;;  %v2306_v24 = vsel %vm295_vm1, %v2300_v12, 0.0 }
 0x6c7   :  { %v2288_v16 = vadd.f32 %v2287_v18, %v2286_v62  ;;  %v3387_v62 = vld [vmem:[%s5416_s17] ss:$0 sm:$0xff] }
 0x6c8   :  { %v2304_v17 = vsel %vm295_vm1, %v2299_v20, 0.0 }
 0x6c9   :  { %v2290_v21 = vadd.f32 %v2289_v34, %v2288_v16  ;;  %v2305_v53 = vadd.f32 %v2304_v17, %v2303_v23 }
 0x6cb   :  { %v2291_v25 = vrot.slane %v2290_v21, 4  ;;  %v2307_v27 = vadd.f32 %v2306_v24, %v2305_v53 }
 0x6cd   :  { %v2292_v28 = vadd.f32 %v2291_v25, %v2290_v21  ;;  %v2308_v29 = vrot.slane %v2307_v27, 4 }
 0x6cf   :  { %v2293_v26 = vrot.slane %v2292_v28, 2  ;;  %v2309_v41 = vadd.f32 %v2308_v29, %v2307_v27  ;;  %v3399_v29 = vld [vmem:[%s5415_s19 + $0x70] sm:$0xff] }
 0x6d1   :  { %v2294_v42 = vadd.f32 %v2293_v26, %v2292_v28  ;;  %v2310_v45 = vrot.slane %v2309_v41, 2  ;;  %v3400_v28 = vld [vmem:[%s5415_s19 + $0x78] sm:$0xff]  ;;  %v4291_v26 = vld [vmem:[%s5442_s25 + $0x8] sm:$0xff] }
 0x6d3   :  { %v2295_v46 = vrot.slane %v2294_v42, 1  ;;  %v2311_v47 = vadd.f32 %v2310_v45, %v2309_v41  ;;  %v4292_v41 = vld [vmem:[%s5442_s25 + $0x10] sm:$0xff]  ;;  %v3397_v45 = vld [vmem:[%s5415_s19 + $0x60] sm:$0xff] }
 0x6d5   :  { %v2296_v49 = vadd.f32 %v2295_v46, %v2294_v42  ;;  %v2312_v54 = vrot.slane %v2311_v47, 1  ;;  %v3398_v42 = vld [vmem:[%s5415_s19 + $0x68] sm:$0xff]  ;;  %v4293_v46 = vld [vmem:[%s5442_s25 + $0x18] sm:$0xff] }
 0x6d7   :  { %4129 = vmatmul.mubr.msk.f32.vlgmr.msra.gmra.mxu1 %vm295_vm1, %v2296_v49  ;;  %v2313_v59 = vadd.f32 %v2312_v54, %v2311_v47  ;;  %v3396_v47 = vld [vmem:[%s5415_s19 + $0x58] sm:$0xff]  ;;  %v3395_v49 = vld [vmem:[%s5415_s19 + $0x50] sm:$0xff]  ;;  %v3394_v54 = vld [vmem:[%s5415_s19 + $0x48] sm:$0xff] }
 0x6d8   :  { %4158 = vmatprep.mubr.msk.f32.mxu1 %vm529_vm2, %v4290_v61  ;;  %v4294_v61 = vld [vmem:[%s5442_s25 + $0x40] sm:$0xff] }
 0x6d9   :  { %4148 = vmatmul.mubr.msk.f32.vlgmr.msra.gmra.mxu0 %vm295_vm1, %v2313_v59  ;;  %v3393_v59 = vld [vmem:[%s5415_s19 + $0x40] sm:$0xff] }
 0x6da   :  { %4187 = vmatpush3.msra.mxu0 %v2598_v63  ;;  %v4295_v63 = vld [vmem:[%s5442_s25 + $0x48] sm:$0xff] }
 0x6db   :  { %4188 = vmatprep.subr.mxu0 %v2597_v0 }
 0x6dc   :  { %4189 = vmatpush3.msra.mxu0 %v2597_v0  ;;  %v4296_v0 = vld [vmem:[%s5442_s25 + $0x50] sm:$0xff] }
 0x6dd   :  { %4190 = vmatprep.subr.mxu0 %v2596_v1 }
 0x6de   :  { %4191 = vmatpush3.msra.mxu0 %v2596_v1  ;;  %v4297_v1 = vld [vmem:[%s5442_s25 + $0x58] sm:$0xff] }
 0x6df   :  { %4192 = vmatprep.subr.mxu0 %v2595_v2 }
 0x6e0   :  { %4193 = vmatpush3.msra.mxu0 %v2595_v2 }
 0x6e1   :  { %4194 = vmatprep.subr.mxu0 %v2594_v3 }
 0x6e2   :  { %4195 = vmatpush3.msra.mxu0 %v2594_v3  ;;  %v3417_v3 = vld [vmem:[%s5415_s19 + $0xa0] sm:$0xff] }
 0x6e3   :  { %4196 = vmatprep.subr.mxu0 %v2593_v22 }
 0x6e4   :  { %4197 = vmatpush3.msra.mxu0 %v2593_v22  ;;  %v3416_v22 = vld [vmem:[%s5415_s19 + $0x98] sm:$0xff] }
 0x797   :  { %v2383_v4 = vpop.f32.mrf.mxu1 }
 0x798   :  { %v2460_v19 = vmul.f32 %v2383_v4, %v2383_v4  ;;  %v2465_v10 = vrot.slane %v2383_v4, %v5002_v44  ;;  %v3415_v4 = vld [vmem:[%s5415_s19 + $0x90] sm:$0xff] }
 0x799   :  { %v4130_v5 = vpop.f32.mrf.mxu1  ;;  %v2456_v43 = vpop.f32.mrf.mxu0 }
 0x79a   :  { %v2461_v30 = vsub.f32 %v2456_v43, %v2460_v19  ;;  %v2466_v48 = vsub.f32 %v5137_v7, %v2465_v10  ;;  %v2467_v13 = vsub.f32 %v5135_v6, %v2465_v10  ;;  %v2468_v51 = vsub.f32 %v5150_v60, %v2465_v10  ;;  %v3388_v7 = vld [vmem:[%s5417_s18] ss:$0 sm:$0xff]  ;;  %v3414_v19 = vld [vmem:[%s5415_s19 + $0x88] sm:$0xff] }
 0x79b   :  { %v4149_v8 = vpop.f32.mrf.mxu0  ;;  %v2469_v14 = vsub.f32 %v5145_v50, %v2465_v10  ;;  %v3413_v5 = vld [vmem:[%s5415_s19 + $0x80] sm:$0xff] }
 0x79c   :  { %v2470_v9 = vadd.f32 1e-05, %v2461_v30 }
 0x79e   :  { %4286 = vrsqrt.f32 %v2470_v9 }
 0x7ab   :  { %v4287_v11 = vpop.eup %4286 }
 0x7ac   :  { %v2475_v58 = vrot.slane %v4287_v11, %v5002_v44 }
 0x7ae   :  { %v2479_v15 = vmul.f32 %v2475_v58, %v2469_v14  ;;  %v2478_v12 = vmul.f32 %v2475_v58, %v2468_v51  ;;  %v2477_v18 = vmul.f32 %v2475_v58, %v2467_v13  ;;  %v2476_v20 = vmul.f32 %v2475_v58, %v2466_v48  ;;  %v4298_v13 = vld [vmem:[%s5409_s9 + $0x38] sm:$0xff]  ;;  %v4299_v14 = vld [vmem:[%s5409_s9 + $0x30] sm:$0xff]  ;;  %v4300_v58 = vld [vmem:[%s5409_s9 + $0x28] sm:$0xff] }
 0x7b0   :  { %v2490_v23 = vmul.f32 %v3387_v62, %v2479_v15  ;;  %v2489_v6 = vmul.f32 %v3387_v62, %v2478_v12  ;;  %v2488_v16 = vmul.f32 %v3387_v62, %v2477_v18  ;;  %v2487_v50 = vmul.f32 %v3387_v62, %v2476_v20  ;;  %v4301_v62 = vld [vmem:[%s5409_s9 + $0x20] sm:$0xff]  ;;  %v4302_v15 = vld [vmem:[%s5409_s9 + $0x18] sm:$0xff]  ;;  %v4303_v12 = vld [vmem:[%s5409_s9 + $0x10] sm:$0xff] }
 0x7b1   :  { %v4304_v18 = vld [vmem:[%s5409_s9 + $0x8] sm:$0xff]  ;;  %v4305_v20 = vld [vmem:[%s5409_s9] sm:$0xff] }
 0x7b2   :  { %v2501_v60 = vadd.f32 %v3388_v7, %v2490_v23  ;;  %v2500_v34 = vadd.f32 %v3388_v7, %v2489_v6  ;;  %v2499_v21 = vadd.f32 %v3388_v7, %v2488_v16  ;;  %v2498_v24 = vadd.f32 %v3388_v7, %v2487_v50 }
 0x7b4   :  { %v2505_v17 = vmax.f32 %v2501_v60, 0.0  ;;  %v2504_v53 = vmax.f32 %v2500_v34, 0.0  ;;  %v2503_v25 = vmax.f32 %v2499_v21, 0.0  ;;  %v2502_v27 = vmax.f32 %v2498_v24, 0.0  ;;  %v3425_v21 = vld [vmem:[%s5418_s20] ss:$0 sm:$0xff] }
 0x7b6   :  { %4150 = vmatprep.subr.mxu1 %v2505_v17 }
 0x7b7   :  { %4151 = vmatpush3.msra.mxu1 %v2505_v17 }
 0x7b8   :  { %4152 = vmatprep.subr.mxu1 %v2504_v53 }
 0x7b9   :  { %4153 = vmatpush3.msra.mxu1 %v2504_v53 }
 0x7ba   :  { %4154 = vmatprep.subr.mxu1 %v2503_v25 }
 0x7bb   :  { %4155 = vmatpush3.msra.mxu1 %v2503_v25 }
 0x7bc   :  { %4156 = vmatprep.subr.mxu1 %v2502_v27 }
 0x7bd   :  { %4157 = vmatpush3.msra.mxu1 %v2502_v27 }
 0x7be   :  { %4159 = vmatmul.mubr.msk.f32.vlgmr.msra.gmra.mxu1 %vm529_vm2, %v4291_v26  ;;  %4164 = vmatprep.subr.mxu1 %v3400_v28 }
 0x7bf   :  { %4165 = vmatpush3.msra.mxu1 %v3400_v28  ;;  %4161 = vmatprep.mubr.msk.f32.mxu1 %vm529_vm2, %v4292_v41 }
 0x7c0   :  { %4166 = vmatprep.subr.mxu1 %v3399_v29 }
 0x7c1   :  { %4167 = vmatpush3.msra.mxu1 %v3399_v29 }
 0x7c2   :  { %4162 = vmatmul.mubr.msk.f32.gmra.mxu1 %vm529_vm2, %v4293_v46  ;;  %4168 = vmatprep.subr.mxu1 %v3398_v42 }
 0x7c3   :  { %4169 = vmatpush3.msra.mxu1 %v3398_v42  ;;  %4180 = vmatprep.mubr.msk.f32.mxu1 %vm295_vm1, %v2502_v27 }
 0x7c4   :  { %4170 = vmatprep.subr.mxu1 %v3397_v45 }
 0x7c5   :  { %4171 = vmatpush3.msra.mxu1 %v3397_v45 }
 0x7c6   :  { %4172 = vmatprep.subr.mxu1 %v3396_v47 }
 0x7c7   :  { %4173 = vmatpush3.msra.mxu1 %v3396_v47 }
 0x7c8   :  { %4174 = vmatprep.subr.mxu1 %v3395_v49 }
 0x7c9   :  { %4175 = vmatpush3.msra.mxu1 %v3395_v49 }
 0x7ca   :  { %4176 = vmatprep.subr.mxu1 %v3394_v54 }
 0x7cb   :  { %4177 = vmatpush3.msra.mxu1 %v3394_v54 }
 0x7cc   :  { %4178 = vmatprep.subr.mxu1 %v3393_v59 }
 0x7cd   :  { %4179 = vmatpush3.msra.mxu1 %v3393_v59 }
 0x7ce   :  { %4181 = vmatmul.mubr.msk.f32.vlgmr.msra.gmra.mxu1 %vm295_vm1, %v2503_v25  ;;  %4208 = vmatprep.subr.mxu1 %v2505_v17 }
 0x7cf   :  { %4183 = vmatprep.mubr.msk.f32.mxu1 %vm295_vm1, %v2504_v53  ;;  %4209 = vmatpush3.msra.mxu1 %v2505_v17 }
 0x7d0   :  { %4210 = vmatprep.subr.mxu1 %v2504_v53 }
 0x7d1   :  { %4211 = vmatpush3.msra.mxu1 %v2504_v53 }
 0x7d2   :  { %4184 = vmatmul.mubr.msk.f32.gmra.mxu1 %vm295_vm1, %v2505_v17  ;;  %4212 = vmatprep.subr.mxu1 %v2503_v25 }
 0x7d3   :  { %4213 = vmatpush3.msra.mxu1 %v2503_v25  ;;  %4216 = vmatprep.mubr.msk.f32.mxu1 %vm529_vm2, %v4294_v61 }
 0x7d4   :  { %4214 = vmatprep.subr.mxu1 %v2502_v27 }
 0x7d5   :  { %4215 = vmatpush3.msra.mxu1 %v2502_v27 }
 0x7d6   :  { %4217 = vmatmul.mubr.msk.f32.vlgmr.msra.gmra.mxu1 %vm529_vm2, %v4295_v63  ;;  %4244 = vmatprep.subr.mxu1 %v4310_v31 }
 0x7d7   :  { %4219 = vmatprep.mubr.msk.f32.mxu1 %vm529_vm2, %v4296_v0  ;;  %4245 = vmatpush3.msra.mxu1 %v4869_v32  ;;  %v2592_v32 = vld [vmem:[%s5415_s19 + $0x8] sm:$0xff] }
 0x7d8   :  { %4246 = vmatprep.subr.mxu1 %v4310_v31  ;;  %4198 = vmatprep.subr.mxu0 %v2592_v32 }
 0x7d9   :  { %4247 = vmatpush3.msra.mxu1 %v4878_v33  ;;  %4199 = vmatpush3.msra.mxu0 %v2592_v32  ;;  %v2591_v33 = vld [vmem:[%s5415_s19] sm:$0xff] }
 0x7da   :  { %4220 = vmatmul.mubr.msk.f32.gmra.mxu1 %vm529_vm2, %v4297_v1  ;;  %4248 = vmatprep.subr.mxu1 %v4310_v31 }
 0x7db   :  { %4249 = vmatpush3.msra.mxu1 %v4887_v35  ;;  %4260 = vmatprep.mubr.msk.f32.mxu1 %vm4311_vm3, %v4310_v31  ;;  %v3420_v35 = vld [vmem:[%s5415_s19 + $0xb8] sm:$0xff] }
 0x7dc   :  { %4250 = vmatprep.subr.mxu1 %v4310_v31  ;;  %4200 = vmatprep.subr.mxu0 %v2591_v33 }
 0x7dd   :  { %4251 = vmatpush3.msra.mxu1 %v4896_v36  ;;  %4201 = vmatpush3.msra.mxu0 %v2591_v33 }
 0x7de   :  { %4252 = vmatprep.subr.mxu1 %v4310_v31  ;;  %4222 = vmatprep.subr.mxu0 %v3420_v35 }
 0x7df   :  { %4253 = vmatpush3.msra.mxu1 %v4905_v37 }
 0x7e0   :  { %4254 = vmatprep.subr.mxu1 %v4310_v31 }
 0x7e1   :  { %4255 = vmatpush3.msra.mxu1 %v4914_v38  ;;  %v3419_v38 = vld [vmem:[%s5415_s19 + $0xb0] sm:$0xff] }
 0x7e2   :  { %4256 = vmatprep.subr.mxu1 %v4310_v31 }
 0x7e3   :  { %4257 = vmatpush3.msra.mxu1 %v4923_v39 }
 0x7e4   :  { %4258 = vmatprep.subr.mxu1 %v4310_v31 }
 0x7e5   :  { %4259 = vmatpush3.msra.mxu1 %v4932_v40  ;;  %v3418_v40 = vld [vmem:[%s5415_s19 + $0xa8] sm:$0xff] }
 0x87e   :  { %v4160_v36 = vpop.f32.mrf.mxu1 }
 0x880   :  { %v2572_v37 = vpop.f32.mrf.mxu1 }
 0x881   :  { %4202 = vmatprep.mubr.msk.f32.mxu0 %vm295_vm1, %v2572_v37 }
 0x882   :  { %v4163_v39 = vpop.f32.mrf.mxu1  ;;  %4203 = vmatmul.mubr.msk.f32.vlgmr.msra.gmra.mxu0 %vm295_vm1, %v4160_v36 }
 0x883   :  { %4223 = vmatpush3.msra.mxu0 %v3420_v35 }
 0x884   :  { %v2582_v2 = vpop.f32.mrf.mxu1  ;;  %4224 = vmatprep.subr.mxu0 %v3419_v38 }
 0x885   :  { %4205 = vmatprep.mubr.msk.f32.mxu0 %vm295_vm1, %v2582_v2  ;;  %4225 = vmatpush3.msra.mxu0 %v3419_v38 }
 0x886   :  { %4206 = vmatmul.mubr.msk.f32.gmra.mxu0 %vm295_vm1, %v4163_v39  ;;  %4226 = vmatprep.subr.mxu0 %v3418_v40 }
 0x887   :  { %4227 = vmatpush3.msra.mxu0 %v3418_v40 }
 0x888   :  { %4228 = vmatprep.subr.mxu0 %v3417_v3 }
 0x889   :  { %4229 = vmatpush3.msra.mxu0 %v3417_v3 }
 0x88a   :  { %4230 = vmatprep.subr.mxu0 %v3416_v22 }
 0x88b   :  { %4231 = vmatpush3.msra.mxu0 %v3416_v22 }
 0x88c   :  { %4232 = vmatprep.subr.mxu0 %v3415_v4 }
 0x88d   :  { %4233 = vmatpush3.msra.mxu0 %v3415_v4 }
 0x88e   :  { %v4182_v43 = vpop.f32.mrf.mxu1  ;;  %4234 = vmatprep.subr.mxu0 %v3414_v19 }
 0x88f   :  { %4235 = vmatpush3.msra.mxu0 %v3414_v19 }
 0x890   :  { %v2686_v30 = vpop.f32.mrf.mxu1  ;;  %4236 = vmatprep.subr.mxu0 %v3413_v5 }
 0x891   :  { %4237 = vmatpush3.msra.mxu0 %v3413_v5 }
 0x892   :  { %v4185_v8 = vpop.f32.mrf.mxu1  ;;  %4263 = vmatprep.subr.mxu0 %v4310_v31 }
 0x894   :  { %v2696_v9 = vpop.f32.mrf.mxu1 }
 0x896   :  { %v4218_v10 = vpop.f32.mrf.mxu1 }
 0x898   :  { %v2868_v11 = vpop.f32.mrf.mxu1 }
 0x899   :  { %4238 = vmatprep.mubr.msk.f32.mxu0 %vm295_vm1, %v2868_v11 }
 0x89a   :  { %v4221_v48 = vpop.f32.mrf.mxu1  ;;  %4239 = vmatmul.mubr.msk.f32.vlgmr.msra.gmra.mxu0 %vm295_vm1, %v4218_v10 }
 0x89b   :  { %4264 = vmatpush3.msra.mxu0 %v4298_v13 }
 0x89c   :  { %v2878_v51 = vpop.f32.mrf.mxu1  ;;  %4265 = vmatprep.subr.mxu0 %v4310_v31 }
 0x89d   :  { %4241 = vmatprep.mubr.msk.f32.mxu0 %vm295_vm1, %v2878_v51  ;;  %4266 = vmatpush3.msra.mxu0 %v4299_v14 }
 0x89e   :  { %4242 = vmatmul.mubr.msk.f32.gmra.mxu0 %vm295_vm1, %v4221_v48  ;;  %4267 = vmatprep.subr.mxu0 %v4310_v31 }
 0x89f   :  { %4268 = vmatpush3.msra.mxu0 %v4300_v58  ;;  %4279 = vmatprep.mubr.msk.f32.mxu0 %vm4311_vm3, %v4310_v31 }
 0x8a0   :  { %4269 = vmatprep.subr.mxu0 %v4310_v31 }
 0x8a1   :  { %4270 = vmatpush3.msra.mxu0 %v4301_v62 }
 0x8a2   :  { %4271 = vmatprep.subr.mxu0 %v4310_v31 }
 0x8a3   :  { %4272 = vmatpush3.msra.mxu0 %v4302_v15 }
 0x8a4   :  { %4273 = vmatprep.subr.mxu0 %v4310_v31 }
 0x8a5   :  { %4274 = vmatpush3.msra.mxu0 %v4303_v12 }
 0x8a6   :  { %4275 = vmatprep.subr.mxu0 %v4310_v31 }
 0x8a7   :  { %4276 = vmatpush3.msra.mxu0 %v4304_v18 }
 0x8a8   :  { %4277 = vmatprep.subr.mxu0 %v4310_v31 }
 0x8a9   :  { %4278 = vmatpush3.msra.mxu0 %v4305_v20 }
 0x942   :  { %v4204_v7 = vpop.f32.mrf.mxu0 }
 0x943   :  { %v2789_v60 = vadd.f32 %v4204_v7, %v4182_v43 }
 0x944   :  { %v2783_v23 = vpop.f32.mrf.mxu0 }
 0x945   :  { %v2784_v50 = vadd.f32 %v2783_v23, %v2686_v30 }
 0x946   :  { %v4207_v6 = vpop.f32.mrf.mxu0 }
 0x947   :  { %v2799_v24 = vadd.f32 %v4207_v6, %v4185_v8 }
 0x948   :  { %v2793_v16 = vpop.f32.mrf.mxu0 }
 0x949   :  { %v2794_v26 = vadd.f32 %v2793_v16, %v2696_v9 }
 0x95a   :  { %v4240_v34 = vpop.f32.mrf.mxu0 }
 0x95b   :  { %v2994_v17 = vadd.f32 %v4240_v34, %v2789_v60 }
 0x95c   :  { %v2974_v53 = vpop.f32.mrf.mxu0 }
 0x95d   :  { %v2993_v31 = vadd.f32 %v2974_v53, %v2784_v50  ;;  %v3005_v25 = vadd.f32 %v3425_v21, %v2994_v17  ;;  %v3428_v50 = vld [vmem:[%s5419_s21] ss:$0 sm:$0xff] }
 0x95e   :  { %v4243_v27 = vpop.f32.mrf.mxu0 }
 0x95f   :  { %v3004_v28 = vadd.f32 %v3425_v21, %v2993_v31  ;;  %v2996_v29 = vadd.f32 %v4243_v27, %v2799_v24  ;;  %v3022_v45 = vmul.f32 %v3005_v25, %v3005_v25  ;;  %v3009_v54 = vsel %vm295_vm1, %v3005_v25, 0.0  ;;  %v3429_v31 = vld [vmem:[%s5420_s22] ss:$0 sm:$0xff] }
 0x960   :  { %v2984_v41 = vpop.f32.mrf.mxu0 }
 0x961   :  { %v3021_v42 = vmul.f32 %v3004_v28, %v3004_v28  ;;  %v3008_v46 = vsel %vm295_vm1, %v3004_v28, 0.0  ;;  %v3007_v47 = vadd.f32 %v3425_v21, %v2996_v29  ;;  %v2995_v49 = vadd.f32 %v2984_v41, %v2794_v26 }
 0x962   :  { %v3010_v63 = vadd.f32 %v3009_v54, %v3008_v46  ;;  %v3026_v0 = vsel %vm295_vm1, %v3022_v45, 0.0  ;;  %v4306_v54 = vld [vmem:[%s5406_s6] sm:$0xff] }
 0x963   :  { %v3025_v59 = vsel %vm295_vm1, %v3021_v42, 0.0  ;;  %v3006_v61 = vadd.f32 %v3425_v21, %v2995_v49  ;;  %v3024_v1 = vmul.f32 %v3007_v47, %v3007_v47  ;;  %v3013_v37 = vsel %vm295_vm1, %v3007_v47, 0.0 }
 0x964   :  { %v3027_v35 = vadd.f32 %v3026_v0, %v3025_v59  ;;  %v4308_v0 = vld [vmem:[%s5406_s6 + $0x10] sm:$0xff] }
 0x965   :  { %v3011_v32 = vsel %vm295_vm1, %v3006_v61, 0.0  ;;  %v3023_v33 = vmul.f32 %v3006_v61, %v3006_v61  ;;  %v3030_v2 = vsel %vm295_vm1, %v3024_v1, 0.0 }
 0x966   :  { %v3012_v36 = vadd.f32 %v3011_v32, %v3010_v63  ;;  %v4309_v32 = vld [vmem:[%s5406_s6 + $0x18] sm:$0xff] }
 0x967   :  { %v3028_v38 = vsel %vm295_vm1, %v3023_v33, 0.0 }
 0x968   :  { %v3014_v39 = vadd.f32 %v3013_v37, %v3012_v36  ;;  %v3029_v40 = vadd.f32 %v3028_v38, %v3027_v35 }
 0x96a   :  { %v3015_v3 = vrot.slane %v3014_v39, 4  ;;  %v3031_v22 = vadd.f32 %v3030_v2, %v3029_v40 }
 0x96c   :  { %v3016_v4 = vadd.f32 %v3015_v3, %v3014_v39  ;;  %v3032_v19 = vrot.slane %v3031_v22, 4 }
 0x96e   :  { %v3017_v5 = vrot.slane %v3016_v4, 2  ;;  %v3033_v43 = vadd.f32 %v3032_v19, %v3031_v22 }
 0x970   :  { %v3018_v30 = vadd.f32 %v3017_v5, %v3016_v4  ;;  %v3034_v8 = vrot.slane %v3033_v43, 2 }
 0x972   :  { %v3019_v9 = vrot.slane %v3018_v30, 1  ;;  %v3035_v10 = vadd.f32 %v3034_v8, %v3033_v43 }
 0x974   :  { %v3020_v11 = vadd.f32 %v3019_v9, %v3018_v30  ;;  %v3036_v48 = vrot.slane %v3035_v10, 1 }
 0x976   :  { %4261 = vmatmul.mubr.msk.f32.vlgmr.msra.gmra.mxu1 %vm295_vm1, %v3020_v11  ;;  %v3037_v13 = vadd.f32 %v3036_v48, %v3035_v10 }
 0x978   :  { %4280 = vmatmul.mubr.msk.f32.vlgmr.msra.gmra.mxu0 %vm295_vm1, %v3037_v13 }
 0xa36   :  { %v3107_v51 = vpop.f32.mrf.mxu1 }
 0xa37   :  { %v3184_v14 = vmul.f32 %v3107_v51, %v3107_v51  ;;  %v3189_v20 = vrot.slane %v3107_v51, %v5002_v44 }
 0xa38   :  { %v4262_v58 = vpop.f32.mrf.mxu1  ;;  %v3180_v62 = vpop.f32.mrf.mxu0 }
 0xa39   :  { %v3185_v15 = vsub.f32 %v3180_v62, %v3184_v14  ;;  %v3190_v23 = vsub.f32 %v3004_v28, %v3189_v20  ;;  %v3191_v6 = vsub.f32 %v3005_v25, %v3189_v20  ;;  %v3192_v16 = vsub.f32 %v3006_v61, %v3189_v20  ;;  %v4307_v61 = vld [vmem:[%s5406_s6 + $0x8] sm:$0xff] }
 0xa3a   :  { %v4281_v12 = vpop.f32.mrf.mxu0  ;;  %v3193_v60 = vsub.f32 %v3007_v47, %v3189_v20 }
 0xa3b   :  { %v3194_v18 = vadd.f32 1e-05, %v3185_v15 }
 0xa3d   :  { %4288 = vrsqrt.f32 %v3194_v18 }
 0xa4a   :  { %v4289_v7 = vpop.eup %4288 }
 0xa4b   :  { %v3199_v34 = vrot.slane %v4289_v7, %v5002_v44 }
 0xa4d   :  { %v3200_v17 = vmul.f32 %v3199_v34, %v3190_v23  ;;  %v3201_v21 = vmul.f32 %v3199_v34, %v3191_v6  ;;  %v3202_v53 = vmul.f32 %v3199_v34, %v3192_v16  ;;  %v3203_v24 = vmul.f32 %v3199_v34, %v3193_v60 }
 0xa4f   :  { %v3211_v27 = vmul.f32 %v3428_v50, %v3200_v17  ;;  %v3212_v29 = vmul.f32 %v3428_v50, %v3201_v21  ;;  %v3213_v28 = vmul.f32 %v3428_v50, %v3202_v53  ;;  %v3214_v25 = vmul.f32 %v3428_v50, %v3203_v24 }
 0xa51   :  { %v3222_v26 = vadd.f32 %v3429_v31, %v3211_v27  ;;  %v3223_v41 = vadd.f32 %v3429_v31, %v3212_v29  ;;  %v3224_v42 = vadd.f32 %v3429_v31, %v3213_v28  ;;  %v3225_v44 = vadd.f32 %v3429_v31, %v3214_v25 }
 0xa53   :  { %v3226_v45 = vmax.f32 %v3222_v26, 0.0  ;;  %v3227_v46 = vmax.f32 %v3223_v41, 0.0  ;;  %v3228_v47 = vmax.f32 %v3224_v42, 0.0  ;;  %v3229_v49 = vmax.f32 %v3225_v44, 0.0 }
 0xa55   :  { %v3230_v59 = vadd.f32 %v4306_v54, %v3226_v45  ;;  %v3231_v63 = vadd.f32 %v4307_v61, %v3227_v46  ;;  %v3232_v1 = vadd.f32 %v4308_v0, %v3228_v47  ;;  %v3233_v33 = vadd.f32 %v4309_v32, %v3229_v49 }
 0xa57   :  { %v3234_v35 = vadd.f32 %v3230_v59, %v4564_v57  ;;  %v3235_v36 = vadd.f32 %v3231_v63, %v4560_v56  ;;  %v3236_v37 = vadd.f32 %v3232_v1, %v4556_v55  ;;  %v3237_v38 = vadd.f32 %v3233_v33, %v4554_v52 }
 0xa59   :  { %v3238_v39 = vmax.f32 %v3234_v35, 0.0  ;;  %v3239_v40 = vmax.f32 %v3235_v36, 0.0  ;;  %v3240_v2 = vmax.f32 %v3236_v37, 0.0  ;;  %v3241_v3 = vmax.f32 %v3237_v38, 0.0 }
 0xa5b   :  { %3242 = vst.msk [vmem:[%s5421_s23] sm:$0xff] %vm295_vm1, %v3238_v39  ;;  %3243 = vst.msk [vmem:[%s5421_s23 + $0x8] sm:$0xff] %vm295_vm1, %v3239_v40 }
 0xa5c   :  { %3244 = vst.msk [vmem:[%s5421_s23 + $0x10] sm:$0xff] %vm295_vm1, %v3240_v2  ;;  %3245 = vst.msk [vmem:[%s5421_s23 + $0x18] sm:$0xff] %vm295_vm1, %v3241_v3 }

</bundles_post_ra>
